<compile_context>
chip_gen: v7x
topology: tpu7x:2x2x1
jax: 0.10.0
libtpu: 0.0.40
codegen_flags: <defaults>
</compile_context>

<pallas_src>
import functools

import jax
import jax.numpy as jnp
from jax import lax
from jax.experimental import pallas as pl
from jax.experimental.pallas import tpu as pltpu


def _cdiv(a, b):
    return -(-a // b)


def _round_up(x, m):
    return (x + m - 1) // m * m


def _vmem_capacity_bytes():
    """Per-core VMEM capacity; conservative 64 MiB (v7x) fallback."""
    try:
        return int(pltpu.get_tpu_info().vmem_capacity_bytes)
    except Exception:
        return 64 * 1024 * 1024


def _mxu_depth():
    """MXU contraction depth: 128 up to v5, 256 on v6e/v7x."""
    try:
        kind = jax.devices()[0].device_kind.lower()
    except Exception:
        return 256
    if any(v in kind for v in ("v2", "v3", "v4", "v5")):
        return 128
    return 256


def _pick_tile_rows(n, h, w, k1, cpad, tile_budget, max_th=128):
    """Largest row-tile whose per-step VMEM footprint fits the budget."""
    def vmem_bytes(th):
        r1, c1 = th + 2, w + 2
        return (2 * 2 * r1 * c1 * k1        # double-buffered bf16 input block
                + 2 * 2 * th * w * cpad     # double-buffered bf16 output block
                + 2 * r1 * c1 * cpad        # bf16 stage-1 scratch
                + 4 * r1 * c1 * cpad        # f32 stage-1 accumulator
                + 4 * th * w * cpad         # f32 stage-2 accumulator
                + 2 * 2 * th * w * cpad)    # bf16 stage-2 K-fold temp

    th = 1
    for cand in range(1, min(h, max_th) + 1):
        if vmem_bytes(cand) <= tile_budget:
            th = cand
    # Prefer a divisor of H (no padded rows) if one is close below the budget pick.
    for cand in range(th, max(1, (3 * th) // 4) - 1, -1):
        if h % cand == 0:
            th = cand
            break
    # Keep enough grid steps for megacore sharding (2 TCs on v7x) + pipelining.
    while n * _cdiv(h, th) < 4 and th > 8:
        th = max(8, th // 2)
    return th


def _convblock_kernel(cols_ref, w1_ref, w2_ref, s1_ref, b1_ref, s2_ref, b2_ref,
                      o_ref, h_ref, *, H, W, TH, k1, cpad, dx_groups):
    """Fused (conv3x3 + BN + ReLU) x2 for one (batch, row-tile) grid step.

    cols_ref : (1, 1, TH+2, W+2, k1) bf16  stage-1 im2col slab (k1 = 9*Cin)
    w1_ref   : (k1, cpad)            bf16  conv1 weights, all 9 taps folded into K
    w2_ref   : (3, 3*cpad, cpad)     bf16  conv2 weights, dx taps folded into K
    s*_ref   : (1, cpad)             f32   folded BN scale / bias (conv bias incl.)
    o_ref    : (1, TH, W, cpad)      bf16  output tile (lane-dense channels)
    h_ref    : (TH+2, W+2, cpad)     bf16  VMEM scratch: stage-1 output + halo
    """
    R1, C1 = TH + 2, W + 2
    M1, M2 = R1 * C1, TH * W
    t = pl.program_id(1)
    r0 = t * TH                       # first output row of this tile (global)

    # ------ stage 1: ONE matmul, K = 9*Cin (im2col built wrapper-side) --------
    a1 = cols_ref[0, 0].reshape(M1, k1)
    acc1 = jnp.dot(a1, w1_ref[...], preferred_element_type=jnp.float32)
    h1 = jnp.maximum(acc1 * s1_ref[...] + b1_ref[...], 0.0)
    h_ref[...] = h1.reshape(R1, C1, cpad).astype(h_ref.dtype)

    # ------ conv2 zero padding: zero only edge columns / invalid halo rows ----
    zcol = jnp.zeros((R1, 1, cpad), h_ref.dtype)
    h_ref[:, 0:1, :] = zcol
    h_ref[:, C1 - 1:C1, :] = zcol
    zrow = jnp.zeros((1, C1, cpad), h_ref.dtype)

    @pl.when(t == 0)                  # halo row above the image (global row -1)
    def _():
        h_ref[0:1, :, :] = zrow

    a_bot = H - r0 + 1                # local row holding global stage-1 row H
    @pl.when(a_bot <= R1 - 1)         # halo / padded row below the image
    def _():
        h_ref[pl.ds(a_bot, 1), :, :] = zrow

    # ------ stage 2: dx taps folded into K in MXU-depth-sized groups ----------
    acc2 = None
    for dy in range(3):
        for dx0, glen in dx_groups:
            if glen == 1:
                a = h_ref[dy:dy + TH, dx0:dx0 + W, :].reshape(M2, cpad)
            else:
                a = jnp.concatenate(
                    [h_ref[dy:dy + TH, dx0 + j:dx0 + j + W, :].reshape(M2, cpad)
                     for j in range(glen)], axis=-1)
            w = w2_ref[dy, dx0 * cpad:(dx0 + glen) * cpad, :]
            p = jnp.dot(a, w, preferred_element_type=jnp.float32)
            acc2 = p if acc2 is None else acc2 + p

    out = jnp.maximum(acc2 * s2_ref[...] + b2_ref[...], 0.0)
    # Dropout (eval mode) between the two stages = identity.
    o_ref[...] = out.reshape(1, TH, W, cpad).astype(o_ref.dtype)


def _fold_bn(conv_bias, gamma, beta, running_mean, running_var, eps=1e-5):
    """Fold conv bias + BatchNorm2d (eval mode) into per-channel scale/bias."""
    inv_std = 1.0 / jnp.sqrt(running_var + eps)
    scale = gamma * inv_std
    bias = beta - running_mean * scale + conv_bias * scale
    return scale, bias


def _pad_vec(v, cpad):
    return jnp.zeros((1, cpad), jnp.float32).at[0, :v.shape[0]].set(
        v.astype(jnp.float32))


def _prep_w1(w_hwio, cin, cpad):
    """(3,3,Cin,Cout) HWIO -> (9*Cin, cpad): all 9 taps folded into K, bf16."""
    co = w_hwio.shape[-1]
    w = jnp.zeros((3, 3, cin, cpad), jnp.float32).at[:, :, :, :co].set(w_hwio)
    return w.reshape(9 * cin, cpad).astype(jnp.bfloat16)


def _prep_w2(w_hwio, cpad):
    """(3,3,Cout,Cout) HWIO -> (3, 3*cpad, cpad): dx taps folded into K, bf16."""
    ci, co = w_hwio.shape[2], w_hwio.shape[3]
    w = jnp.zeros((3, 3, cpad, cpad), jnp.float32).at[:, :, :ci, :co].set(w_hwio)
    return w.reshape(3, 3 * cpad, cpad).astype(jnp.bfloat16)


def convblock_forward(x_nchw, params, nchw_output=True):
    """ConvBlock forward.  Input layout: NCHW (matches PyTorch).

    nchw_output=True  -> (N, Cout, H, W) float32 (PyTorch parity).
    nchw_output=False -> (N, H, W, cpad) bf16 (lane-padded NHWC; use this between
                         stacked ConvBlocks to skip the slice/transpose pass).
    """
    N, Cin, H, W = x_nchw.shape
    Cout = params["w1"].shape[-1]
    cpad = _round_up(Cout, 128)          # lane-dense channel axis
    k1 = 9 * Cin                         # stage-1 contraction depth

    # --- per-generation tiling / VMEM budget ---------------------------------
    vmem_cap = _vmem_capacity_bytes()                       # 64 MiB (v7x) .. 128 MiB
    vmem_limit = int(min(0.75 * vmem_cap, 112 * 2 ** 20))   # v7x ~48, v5e/v6e ~96
    tile_budget = int(0.60 * vmem_limit)
    TH = _pick_tile_rows(N, H, W, k1, cpad, tile_budget)
    n_tiles = _cdiv(H, TH)
    Hpad = n_tiles * TH                  # padded rows are computed then sliced off

    # stage-2 K-fold factor matched to the MXU depth (v5e: 128, v6e/v7x: 256)
    glen = max(1, min(3, _mxu_depth() // cpad))
    dx_groups, dx = [], 0
    while dx < 3:
        g = min(glen, 3 - dx)
        dx_groups.append((dx, g))
        dx += g
    dx_groups = tuple(dx_groups)

    # --- wrapper-side im2col (bf16), built per row-tile slab with 1-row halo ---
    x = jnp.transpose(x_nchw, (0, 2, 3, 1)).astype(jnp.bfloat16)        # NHWC
    x_pad = jnp.pad(x, ((0, 0), (2, 2 + Hpad - H), (2, 2), (0, 0)))
    taps = [x_pad[:, dy:dy + Hpad + 2, dxx:dxx + W + 2, :]
            for dy in range(3) for dxx in range(3)]
    im2col = jnp.concatenate(taps, axis=-1)        # (N, Hpad+2, W+2, 9*Cin)
    if n_tiles == 1:
        cols = im2col[:, None]
    else:
        cols = jnp.stack([im2col[:, t * TH:t * TH + TH + 2]
                          for t in range(n_tiles)], axis=1)
    # cols: (N, n_tiles, TH+2, W+2, 9*Cin)

    w1 = _prep_w1(params["w1"], Cin, cpad)         # (9*Cin, cpad)
    w2 = _prep_w2(params["w2"], cpad)              # (3, 3*cpad, cpad)
    s1, b1 = _fold_bn(params["b1"], params["bn1_gamma"], params["bn1_beta"],
                      params["bn1_mean"], params["bn1_var"])
    s2, b2 = _fold_bn(params["b2"], params["bn2_gamma"], params["bn2_beta"],
                      params["bn2_mean"], params["bn2_var"])
    s1p, b1p = _pad_vec(s1, cpad), _pad_vec(b1, cpad)
    s2p, b2p = _pad_vec(s2, cpad), _pad_vec(b2, cpad)

    kernel = functools.partial(_convblock_kernel, H=H, W=W, TH=TH,
                               k1=k1, cpad=cpad, dx_groups=dx_groups)

    flops = 2 * N * Hpad * W * (k1 * cpad + 9 * cpad * cpad)
    bytes_accessed = (cols.size * 2 + w1.size * 2 + w2.size * 2
                      + N * Hpad * W * cpad * 2)

    y = pl.pallas_call(
        kernel,
        out_shape=jax.ShapeDtypeStruct((N, Hpad, W, cpad), jnp.bfloat16),
        grid=(N, n_tiles),
        in_specs=[
            pl.BlockSpec((1, 1, TH + 2, W + 2, k1),
                         lambda n, t: (n, t, 0, 0, 0)),
            pl.BlockSpec((k1, cpad), lambda n, t: (0, 0)),
            pl.BlockSpec((3, 3 * cpad, cpad), lambda n, t: (0, 0, 0)),
            pl.BlockSpec((1, cpad), lambda n, t: (0, 0)),
            pl.BlockSpec((1, cpad), lambda n, t: (0, 0)),
            pl.BlockSpec((1, cpad), lambda n, t: (0, 0)),
            pl.BlockSpec((1, cpad), lambda n, t: (0, 0)),
        ],
        out_specs=pl.BlockSpec((1, TH, W, cpad), lambda n, t: (n, t, 0, 0)),
        scratch_shapes=[pltpu.VMEM((TH + 2, W + 2, cpad), jnp.bfloat16)],
        compiler_params=pltpu.CompilerParams(
            dimension_semantics=("parallel", "parallel"),
            vmem_limit_bytes=vmem_limit,
        ),
        cost_estimate=pl.CostEstimate(flops=flops, transcendentals=0,
                                      bytes_accessed=bytes_accessed),
    )(cols, w1, w2, s1p, b1p, s2p, b2p)

    if not nchw_output:
        return y[:, :H]                                   # NHWC bf16, cpad channels
    y = y[:, :H, :, :Cout]                                # drop padded rows/lanes
    return jnp.transpose(y, (0, 3, 1, 2)).astype(jnp.float32)   # NHWC -> NCHW


def make_convblock_params(key, in_channels, out_channels):
    """Deterministic synthetic parameters mirroring ConvBlock.__init__ shapes."""
    ks = jax.random.split(key, 8)
    p = {}
    # conv1: PyTorch weight (Cout, Cin, 3, 3) -> stored as HWIO (3, 3, Cin, Cout)
    p["w1"] = 0.1 * jax.random.normal(ks[0], (3, 3, in_channels, out_channels), jnp.float32)
    p["b1"] = 0.1 * jax.random.normal(ks[1], (out_channels,), jnp.float32)
    p["bn1_gamma"] = 1.0 + 0.1 * jax.random.normal(ks[2], (out_channels,), jnp.float32)
    p["bn1_beta"] = 0.1 * jax.random.normal(ks[3], (out_channels,), jnp.float32)
    p["bn1_mean"] = jnp.zeros((out_channels,), jnp.float32)
    p["bn1_var"] = jnp.ones((out_channels,), jnp.float32)
    # conv2
    p["w2"] = 0.1 * jax.random.normal(ks[4], (3, 3, out_channels, out_channels), jnp.float32)
    p["b2"] = 0.1 * jax.random.normal(ks[5], (out_channels,), jnp.float32)
    p["bn2_gamma"] = 1.0 + 0.1 * jax.random.normal(ks[6], (out_channels,), jnp.float32)
    p["bn2_beta"] = 0.1 * jax.random.normal(ks[7], (out_channels,), jnp.float32)
    p["bn2_mean"] = jnp.zeros((out_channels,), jnp.float32)
    p["bn2_var"] = jnp.ones((out_channels,), jnp.float32)
    return p


def _reference_forward(x_nchw, params):
    """Plain-JAX reference with matching bf16-input / f32-accumulate numerics."""
    def stage(x, w_hwio, scale, bias):
        xb = x.astype(jnp.bfloat16).astype(jnp.float32)
        wb = w_hwio.astype(jnp.bfloat16).astype(jnp.float32)
        y = lax.conv_general_dilated(
            xb, wb, window_strides=(1, 1), padding="SAME",
            dimension_numbers=("NHWC", "HWIO", "NHWC"),
            precision=lax.Precision.HIGHEST)
        return jnp.maximum(y * scale + bias, 0.0)

    x = jnp.transpose(x_nchw, (0, 2, 3, 1))
    s1, b1 = _fold_bn(params["b1"], params["bn1_gamma"], params["bn1_beta"],
                      params["bn1_mean"], params["bn1_var"])
    h = stage(x, params["w1"], s1, b1)
    h = h.astype(jnp.bfloat16).astype(jnp.float32)   # kernel holds h as bf16 in VMEM
    s2, b2 = _fold_bn(params["b2"], params["bn2_gamma"], params["bn2_beta"],
                      params["bn2_mean"], params["bn2_var"])
    y = stage(h, params["w2"], s2, b2)
    y = y.astype(jnp.bfloat16).astype(jnp.float32)   # kernel output is bf16
    return jnp.transpose(y, (0, 3, 1, 2))


if __name__ == "__main__":
    key = jax.random.PRNGKey(0)
    k_x, k_p = jax.random.split(key)

    N, C_IN, C_OUT, H, W = 2, 4, 8, 16, 16
    DROPOUT_P = 0.1   # eval-mode dropout = identity (kept for interface parity)
    x = jax.random.normal(k_x, (N, C_IN, H, W), jnp.float32)
    params = make_convblock_params(k_p, C_IN, C_OUT)

    out = jax.block_until_ready(convblock_forward(x, params))
    ref = jax.block_until_ready(_reference_forward(x, params))

    assert out.shape == (N, C_OUT, H, W), out.shape
    err = float(jnp.max(jnp.abs(out - ref)))
    assert err < 2e-2, f"max abs err {err}"

    print("KERNEL_OK")
</pallas_src>

<mosaic_0001>
module attributes {stable_mosaic.version = 11 : i64} {
  func.func @_convblock_kernel(%arg0: i32, %arg1: i32, %arg2: memref<1x1x10x18x36xbf16, #tpu.memory_space<vmem>>, %arg3: memref<36x128xbf16, #tpu.memory_space<vmem>>, %arg4: memref<3x384x128xbf16, #tpu.memory_space<vmem>>, %arg5: memref<1x128xf32, #tpu.memory_space<vmem>>, %arg6: memref<1x128xf32, #tpu.memory_space<vmem>>, %arg7: memref<1x128xf32, #tpu.memory_space<vmem>>, %arg8: memref<1x128xf32, #tpu.memory_space<vmem>>, %arg9: memref<1x8x16x128xbf16, #tpu.memory_space<vmem>>, %arg10: memref<10x18x128xbf16, #tpu.memory_space<vmem>>) attributes {dimension_semantics = [#tpu.dimension_semantics<parallel>, #tpu.dimension_semantics<parallel>], iteration_bounds = array<i64: 2, 2>, scalar_prefetch = 0 : i64, scratch_operands = 1 : i64, tpu.core_type = #tpu.core_type<tc>, window_params = [{transform_indices = @transform_0, window_bounds = array<i64: 1, 1, 10, 18, 36>}, {pipeline_mode = #tpu.pipeline_mode<synchronous>, transform_indices = @transform_1, window_bounds = array<i64: 36, 128>}, {pipeline_mode = #tpu.pipeline_mode<synchronous>, transform_indices = @transform_2, window_bounds = array<i64: 3, 384, 128>}, {pipeline_mode = #tpu.pipeline_mode<synchronous>, transform_indices = @transform_3, window_bounds = array<i64: 1, 128>}, {pipeline_mode = #tpu.pipeline_mode<synchronous>, transform_indices = @transform_4, window_bounds = array<i64: 1, 128>}, {pipeline_mode = #tpu.pipeline_mode<synchronous>, transform_indices = @transform_5, window_bounds = array<i64: 1, 128>}, {pipeline_mode = #tpu.pipeline_mode<synchronous>, transform_indices = @transform_6, window_bounds = array<i64: 1, 128>}, {transform_indices = @transform_7, window_bounds = array<i64: 1, 8, 16, 128>}]} {
    %c8_i32 = arith.constant 8 : i32
    %0 = arith.muli %arg1, %c8_i32 : i32
    %c0 = arith.constant 0 : index
    %c0_0 = arith.constant 0 : index
    %c0_1 = arith.constant 0 : index
    %c0_2 = arith.constant 0 : index
    %c0_3 = arith.constant 0 : index
    %1 = vector.load %arg2[%c0, %c0_0, %c0_1, %c0_2, %c0_3] : memref<1x1x10x18x36xbf16, #tpu.memory_space<vmem>>, vector<1x1x10x18x36xbf16>
    %2 = vector.shape_cast %1 : vector<1x1x10x18x36xbf16> to vector<10x18x36xbf16>
    %3 = vector.shape_cast %2 : vector<10x18x36xbf16> to vector<180x36xbf16>
    %c0_4 = arith.constant 0 : index
    %c0_5 = arith.constant 0 : index
    %4 = vector.load %arg3[%c0_4, %c0_5] : memref<36x128xbf16, #tpu.memory_space<vmem>>, vector<36x128xbf16>
    %cst = arith.constant dense<0.000000e+00> : vector<180x128xf32>
    %5 = tpu.matmul %3, %4, %cst {dimension_numbers = #tpu.dot_dimension_numbers<[1], [0], [0], [1], [0, 0, 1, 1], [], []>} : vector<180x36xbf16>, vector<36x128xbf16>, vector<180x128xf32> -> vector<180x128xf32>
    %c0_6 = arith.constant 0 : index
    %c0_7 = arith.constant 0 : index
    %6 = vector.load %arg5[%c0_6, %c0_7] : memref<1x128xf32, #tpu.memory_space<vmem>>, vector<1x128xf32>
    %7 = vector.broadcast %6 : vector<1x128xf32> to vector<180x128xf32>
    %8 = arith.mulf %5, %7 : vector<180x128xf32>
    %c0_8 = arith.constant 0 : index
    %c0_9 = arith.constant 0 : index
    %9 = vector.load %arg6[%c0_8, %c0_9] : memref<1x128xf32, #tpu.memory_space<vmem>>, vector<1x128xf32>
    %10 = vector.broadcast %9 : vector<1x128xf32> to vector<180x128xf32>
    %11 = arith.addf %8, %10 : vector<180x128xf32>
    %cst_10 = arith.constant 0.000000e+00 : f32
    %12 = vector.broadcast %cst_10 : f32 to vector<180x128xf32>
    %13 = arith.maximumf %11, %12 : vector<180x128xf32>
    %14 = vector.shape_cast %13 : vector<180x128xf32> to vector<10x18x128xf32>
    %15 = arith.truncf %14 : vector<10x18x128xf32> to vector<10x18x128xbf16>
    %c0_11 = arith.constant 0 : index
    %c0_12 = arith.constant 0 : index
    %c0_13 = arith.constant 0 : index
    %16 = vector.load %arg10[%c0_11, %c0_12, %c0_13] : memref<10x18x128xbf16, #tpu.memory_space<vmem>>, vector<10x18x128xbf16>
    tpu.vector_store %arg10[%c0_11, %c0_12, %c0_13], %15 {strides = array<i32>} : memref<10x18x128xbf16, #tpu.memory_space<vmem>>, vector<10x18x128xbf16>,
    %cst_14 = arith.constant 0.000000e+00 : bf16
    %17 = vector.broadcast %cst_14 : bf16 to vector<10x1x128xbf16>
    %c0_15 = arith.constant 0 : index
    %c0_16 = arith.constant 0 : index
    %c0_17 = arith.constant 0 : index
    %18 = vector.load %arg10[%c0_15, %c0_16, %c0_17] : memref<10x18x128xbf16, #tpu.memory_space<vmem>>, vector<10x1x128xbf16>
    tpu.vector_store %arg10[%c0_15, %c0_16, %c0_17], %17 {strides = array<i32>} : memref<10x18x128xbf16, #tpu.memory_space<vmem>>, vector<10x1x128xbf16>,
    %c0_18 = arith.constant 0 : index
    %c17 = arith.constant 17 : index
    %c0_19 = arith.constant 0 : index
    %19 = vector.load %arg10[%c0_18, %c17, %c0_19] : memref<10x18x128xbf16, #tpu.memory_space<vmem>>, vector<10x1x128xbf16>
    tpu.vector_store %arg10[%c0_18, %c17, %c0_19], %17 {strides = array<i32>} : memref<10x18x128xbf16, #tpu.memory_space<vmem>>, vector<10x1x128xbf16>,
    %cst_20 = arith.constant 0.000000e+00 : bf16
    %20 = vector.broadcast %cst_20 : bf16 to vector<1x18x128xbf16>
    %c0_i32 = arith.constant 0 : i32
    %21 = arith.cmpi eq, %arg1, %c0_i32 : i32
    %22 = arith.extui %21 : i1 to i32
    %c0_i32_21 = arith.constant 0 : i32
    %23 = arith.cmpi ne, %22, %c0_i32_21 : i32
    scf.if %23 {
      %c0_80 = arith.constant 0 : index
      %c0_81 = arith.constant 0 : index
      %c0_82 = arith.constant 0 : index
      %84 = vector.load %arg10[%c0_80, %c0_81, %c0_82] : memref<10x18x128xbf16, #tpu.memory_space<vmem>>, vector<1x18x128xbf16>
      tpu.vector_store %arg10[%c0_80, %c0_81, %c0_82], %20 {strides = array<i32>} : memref<10x18x128xbf16, #tpu.memory_space<vmem>>, vector<1x18x128xbf16>,
    } else {
    }
    %c16_i32 = arith.constant 16 : i32
    %24 = arith.subi %c16_i32, %0 : i32
    %c1_i32 = arith.constant 1 : i32
    %25 = arith.addi %24, %c1_i32 : i32
    %c9_i32 = arith.constant 9 : i32
    %26 = arith.cmpi sle, %25, %c9_i32 : i32
    %27 = arith.extui %26 : i1 to i32
    %c0_i32_22 = arith.constant 0 : i32
    %28 = arith.cmpi ne, %27, %c0_i32_22 : i32
    scf.if %28 {
      %84 = arith.index_cast %25 : i32 to index
      %c0_80 = arith.constant 0 : index
      %c0_81 = arith.constant 0 : index
      %85 = vector.load %arg10[%84, %c0_80, %c0_81] : memref<10x18x128xbf16, #tpu.memory_space<vmem>>, vector<1x18x128xbf16>
      tpu.vector_store %arg10[%84, %c0_80, %c0_81], %20 {strides = array<i32>} : memref<10x18x128xbf16, #tpu.memory_space<vmem>>, vector<1x18x128xbf16>,
    } else {
    }
    %c0_23 = arith.constant 0 : index
    %c0_24 = arith.constant 0 : index
    %c0_25 = arith.constant 0 : index
    %29 = vector.load %arg10[%c0_23, %c0_24, %c0_25] : memref<10x18x128xbf16, #tpu.memory_space<vmem>>, vector<8x16x128xbf16>
    %30 = vector.shape_cast %29 : vector<8x16x128xbf16> to vector<128x128xbf16>
    %c0_26 = arith.constant 0 : index
    %c1 = arith.constant 1 : index
    %c0_27 = arith.constant 0 : index
    %31 = vector.load %arg10[%c0_26, %c1, %c0_27] : memref<10x18x128xbf16, #tpu.memory_space<vmem>>, vector<8x16x128xbf16>
    %32 = vector.shape_cast %31 : vector<8x16x128xbf16> to vector<128x128xbf16>
    %33 = tpu.concatenate %30, %32 in 1 : vector<128x128xbf16>, vector<128x128xbf16> -> vector<128x256xbf16>
    %c0_28 = arith.constant 0 : index
    %c0_29 = arith.constant 0 : index
    %c0_30 = arith.constant 0 : index
    %34 = vector.load %arg4[%c0_28, %c0_29, %c0_30] : memref<3x384x128xbf16, #tpu.memory_space<vmem>>, vector<1x256x128xbf16>
    %35 = vector.shape_cast %34 : vector<1x256x128xbf16> to vector<256x128xbf16>
    %cst_31 = arith.constant dense<0.000000e+00> : vector<128x128xf32>
    %36 = tpu.matmul %33, %35, %cst_31 {dimension_numbers = #tpu.dot_dimension_numbers<[1], [0], [0], [1], [0, 0, 1, 1], [], []>} : vector<128x256xbf16>, vector<256x128xbf16>, vector<128x128xf32> -> vector<128x128xf32>
    %c0_32 = arith.constant 0 : index
    %c2 = arith.constant 2 : index
    %c0_33 = arith.constant 0 : index
    %37 = vector.load %arg10[%c0_32, %c2, %c0_33] : memref<10x18x128xbf16, #tpu.memory_space<vmem>>, vector<8x16x128xbf16>
    %38 = vector.shape_cast %37 : vector<8x16x128xbf16> to vector<128x128xbf16>
    %c0_34 = arith.constant 0 : index
    %c256 = arith.constant 256 : index
    %c0_35 = arith.constant 0 : index
    %39 = vector.load %arg4[%c0_34, %c256, %c0_35] : memref<3x384x128xbf16, #tpu.memory_space<vmem>>, vector<1x128x128xbf16>
    %40 = vector.shape_cast %39 : vector<1x128x128xbf16> to vector<128x128xbf16>
    %cst_36 = arith.constant dense<0.000000e+00> : vector<128x128xf32>
    %41 = tpu.matmul %38, %40, %cst_36 {dimension_numbers = #tpu.dot_dimension_numbers<[1], [0], [0], [1], [0, 0, 1, 1], [], []>} : vector<128x128xbf16>, vector<128x128xbf16>, vector<128x128xf32> -> vector<128x128xf32>
    %42 = arith.addf %36, %41 : vector<128x128xf32>
    %c1_37 = arith.constant 1 : index
    %c0_38 = arith.constant 0 : index
    %c0_39 = arith.constant 0 : index
    %43 = vector.load %arg10[%c1_37, %c0_38, %c0_39] : memref<10x18x128xbf16, #tpu.memory_space<vmem>>, vector<8x16x128xbf16>
    %44 = vector.shape_cast %43 : vector<8x16x128xbf16> to vector<128x128xbf16>
    %c1_40 = arith.constant 1 : index
    %c1_41 = arith.constant 1 : index
    %c0_42 = arith.constant 0 : index
    %45 = vector.load %arg10[%c1_40, %c1_41, %c0_42] : memref<10x18x128xbf16, #tpu.memory_space<vmem>>, vector<8x16x128xbf16>
    %46 = vector.shape_cast %45 : vector<8x16x128xbf16> to vector<128x128xbf16>
    %47 = tpu.concatenate %44, %46 in 1 : vector<128x128xbf16>, vector<128x128xbf16> -> vector<128x256xbf16>
    %c1_43 = arith.constant 1 : index
    %c0_44 = arith.constant 0 : index
    %c0_45 = arith.constant 0 : index
    %48 = vector.load %arg4[%c1_43, %c0_44, %c0_45] : memref<3x384x128xbf16, #tpu.memory_space<vmem>>, vector<1x256x128xbf16>
    %49 = vector.shape_cast %48 : vector<1x256x128xbf16> to vector<256x128xbf16>
    %cst_46 = arith.constant dense<0.000000e+00> : vector<128x128xf32>
    %50 = tpu.matmul %47, %49, %cst_46 {dimension_numbers = #tpu.dot_dimension_numbers<[1], [0], [0], [1], [0, 0, 1, 1], [], []>} : vector<128x256xbf16>, vector<256x128xbf16>, vector<128x128xf32> -> vector<128x128xf32>
    %51 = arith.addf %42, %50 : vector<128x128xf32>
    %c1_47 = arith.constant 1 : index
    %c2_48 = arith.constant 2 : index
    %c0_49 = arith.constant 0 : index
    %52 = vector.load %arg10[%c1_47, %c2_48, %c0_49] : memref<10x18x128xbf16, #tpu.memory_space<vmem>>, vector<8x16x128xbf16>
    %53 = vector.shape_cast %52 : vector<8x16x128xbf16> to vector<128x128xbf16>
    %c1_50 = arith.constant 1 : index
    %c256_51 = arith.constant 256 : index
    %c0_52 = arith.constant 0 : index
    %54 = vector.load %arg4[%c1_50, %c256_51, %c0_52] : memref<3x384x128xbf16, #tpu.memory_space<vmem>>, vector<1x128x128xbf16>
    %55 = vector.shape_cast %54 : vector<1x128x128xbf16> to vector<128x128xbf16>
    %cst_53 = arith.constant dense<0.000000e+00> : vector<128x128xf32>
    %56 = tpu.matmul %53, %55, %cst_53 {dimension_numbers = #tpu.dot_dimension_numbers<[1], [0], [0], [1], [0, 0, 1, 1], [], []>} : vector<128x128xbf16>, vector<128x128xbf16>, vector<128x128xf32> -> vector<128x128xf32>
    %57 = arith.addf %51, %56 : vector<128x128xf32>
    %c2_54 = arith.constant 2 : index
    %c0_55 = arith.constant 0 : index
    %c0_56 = arith.constant 0 : index
    %58 = vector.load %arg10[%c2_54, %c0_55, %c0_56] : memref<10x18x128xbf16, #tpu.memory_space<vmem>>, vector<8x16x128xbf16>
    %59 = vector.shape_cast %58 : vector<8x16x128xbf16> to vector<128x128xbf16>
    %c2_57 = arith.constant 2 : index
    %c1_58 = arith.constant 1 : index
    %c0_59 = arith.constant 0 : index
    %60 = vector.load %arg10[%c2_57, %c1_58, %c0_59] : memref<10x18x128xbf16, #tpu.memory_space<vmem>>, vector<8x16x128xbf16>
    %61 = vector.shape_cast %60 : vector<8x16x128xbf16> to vector<128x128xbf16>
    %62 = tpu.concatenate %59, %61 in 1 : vector<128x128xbf16>, vector<128x128xbf16> -> vector<128x256xbf16>
    %c2_60 = arith.constant 2 : index
    %c0_61 = arith.constant 0 : index
    %c0_62 = arith.constant 0 : index
    %63 = vector.load %arg4[%c2_60, %c0_61, %c0_62] : memref<3x384x128xbf16, #tpu.memory_space<vmem>>, vector<1x256x128xbf16>
    %64 = vector.shape_cast %63 : vector<1x256x128xbf16> to vector<256x128xbf16>
    %cst_63 = arith.constant dense<0.000000e+00> : vector<128x128xf32>
    %65 = tpu.matmul %62, %64, %cst_63 {dimension_numbers = #tpu.dot_dimension_numbers<[1], [0], [0], [1], [0, 0, 1, 1], [], []>} : vector<128x256xbf16>, vector<256x128xbf16>, vector<128x128xf32> -> vector<128x128xf32>
    %66 = arith.addf %57, %65 : vector<128x128xf32>
    %c2_64 = arith.constant 2 : index
    %c2_65 = arith.constant 2 : index
    %c0_66 = arith.constant 0 : index
    %67 = vector.load %arg10[%c2_64, %c2_65, %c0_66] : memref<10x18x128xbf16, #tpu.memory_space<vmem>>, vector<8x16x128xbf16>
    %68 = vector.shape_cast %67 : vector<8x16x128xbf16> to vector<128x128xbf16>
    %c2_67 = arith.constant 2 : index
    %c256_68 = arith.constant 256 : index
    %c0_69 = arith.constant 0 : index
    %69 = vector.load %arg4[%c2_67, %c256_68, %c0_69] : memref<3x384x128xbf16, #tpu.memory_space<vmem>>, vector<1x128x128xbf16>
    %70 = vector.shape_cast %69 : vector<1x128x128xbf16> to vector<128x128xbf16>
    %cst_70 = arith.constant dense<0.000000e+00> : vector<128x128xf32>
    %71 = tpu.matmul %68, %70, %cst_70 {dimension_numbers = #tpu.dot_dimension_numbers<[1], [0], [0], [1], [0, 0, 1, 1], [], []>} : vector<128x128xbf16>, vector<128x128xbf16>, vector<128x128xf32> -> vector<128x128xf32>
    %72 = arith.addf %66, %71 : vector<128x128xf32>
    %c0_71 = arith.constant 0 : index
    %c0_72 = arith.constant 0 : index
    %73 = vector.load %arg7[%c0_71, %c0_72] : memref<1x128xf32, #tpu.memory_space<vmem>>, vector<1x128xf32>
    %74 = vector.broadcast %73 : vector<1x128xf32> to vector<128x128xf32>
    %75 = arith.mulf %72, %74 : vector<128x128xf32>
    %c0_73 = arith.constant 0 : index
    %c0_74 = arith.constant 0 : index
    %76 = vector.load %arg8[%c0_73, %c0_74] : memref<1x128xf32, #tpu.memory_space<vmem>>, vector<1x128xf32>
    %77 = vector.broadcast %76 : vector<1x128xf32> to vector<128x128xf32>
    %78 = arith.addf %75, %77 : vector<128x128xf32>
    %cst_75 = arith.constant 0.000000e+00 : f32
    %79 = vector.broadcast %cst_75 : f32 to vector<128x128xf32>
    %80 = arith.maximumf %78, %79 : vector<128x128xf32>
    %81 = vector.shape_cast %80 : vector<128x128xf32> to vector<1x8x16x128xf32>
    %82 = arith.truncf %81 : vector<1x8x16x128xf32> to vector<1x8x16x128xbf16>
    %c0_76 = arith.constant 0 : index
    %c0_77 = arith.constant 0 : index
    %c0_78 = arith.constant 0 : index
    %c0_79 = arith.constant 0 : index
    %83 = vector.load %arg9[%c0_76, %c0_77, %c0_78, %c0_79] : memref<1x8x16x128xbf16, #tpu.memory_space<vmem>>, vector<1x8x16x128xbf16>
    tpu.vector_store %arg9[%c0_76, %c0_77, %c0_78, %c0_79], %82 {strides = array<i32>} : memref<1x8x16x128xbf16, #tpu.memory_space<vmem>>, vector<1x8x16x128xbf16>,
    return
  }
  func.func @transform_0(%arg0: i32, %arg1: i32) -> (i32, i32, i32, i32, i32) {
    %c0_i32 = arith.constant 0 : i32
    %c0_i32_0 = arith.constant 0 : i32
    %c0_i32_1 = arith.constant 0 : i32
    %c0_i32_2 = arith.constant 0 : i32
    return %arg0, %arg1, %c0_i32, %c0_i32_0, %c0_i32_1 : i32, i32, i32, i32, i32
  }
  func.func @transform_1(%arg0: i32, %arg1: i32) -> (i32, i32) {
    %c0_i32 = arith.constant 0 : i32
    %c0_i32_0 = arith.constant 0 : i32
    %c0_i32_1 = arith.constant 0 : i32
    return %c0_i32, %c0_i32_0 : i32, i32
  }
  func.func @transform_2(%arg0: i32, %arg1: i32) -> (i32, i32, i32) {
    %c0_i32 = arith.constant 0 : i32
    %c0_i32_0 = arith.constant 0 : i32
    %c0_i32_1 = arith.constant 0 : i32
    %c0_i32_2 = arith.constant 0 : i32
    return %c0_i32, %c0_i32_0, %c0_i32_1 : i32, i32, i32
  }
  func.func @transform_3(%arg0: i32, %arg1: i32) -> (i32, i32) {
    %c0_i32 = arith.constant 0 : i32
    %c0_i32_0 = arith.constant 0 : i32
    %c0_i32_1 = arith.constant 0 : i32
    return %c0_i32, %c0_i32_0 : i32, i32
  }
  func.func @transform_4(%arg0: i32, %arg1: i32) -> (i32, i32) {
    %c0_i32 = arith.constant 0 : i32
    %c0_i32_0 = arith.constant 0 : i32
    %c0_i32_1 = arith.constant 0 : i32
    return %c0_i32, %c0_i32_0 : i32, i32
  }
  func.func @transform_5(%arg0: i32, %arg1: i32) -> (i32, i32) {
    %c0_i32 = arith.constant 0 : i32
    %c0_i32_0 = arith.constant 0 : i32
    %c0_i32_1 = arith.constant 0 : i32
    return %c0_i32, %c0_i32_0 : i32, i32
  }
  func.func @transform_6(%arg0: i32, %arg1: i32) -> (i32, i32) {
    %c0_i32 = arith.constant 0 : i32
    %c0_i32_0 = arith.constant 0 : i32
    %c0_i32_1 = arith.constant 0 : i32
    return %c0_i32, %c0_i32_0 : i32, i32
  }
  func.func @transform_7(%arg0: i32, %arg1: i32) -> (i32, i32, i32, i32) {
    %c0_i32 = arith.constant 0 : i32
    %c0_i32_0 = arith.constant 0 : i32
    %c0_i32_1 = arith.constant 0 : i32
    return %arg0, %arg1, %c0_i32, %c0_i32_0 : i32, i32, i32, i32
  }
}

</mosaic_0001>

<bundles_post_ra>
// kernel: tpu_custom_call.1
= control target key start
LH: loop header
LB: loop body
LE: loop exit
PB: predicated region body
PF: predicated region fallthrough
CT: control target
= control target key end

     0   :  { %12 = vsyncpa [#allocation4], 0  ;;  %s8401_s0 = inlined_call_operand.vmem [shape: bf16[2,2,10,18,36], index: 0, kind: input, shape index: {}]   ;;  %s8402_s1 = inlined_call_operand.vmem [shape: bf16[36,128], index: 1, kind: input, shape index: {}]   ;;  %s8403_s2 = inlined_call_operand.vmem [shape: bf16[3,384,128], index: 2, kind: input, shape index: {}]   ;;  %s8404_s3 = inlined_call_operand.vmem [shape: f32[1,128], index: 3, kind: input, shape index: {}]   ;;  %s8405_s4 = inlined_call_operand.vmem [shape: f32[1,128], index: 4, kind: input, shape index: {}]   ;;  %s8406_s5 = inlined_call_operand.vmem [shape: f32[1,128], index: 5, kind: input, shape index: {}]   ;;  %s8407_s6 = inlined_call_operand.vmem [shape: f32[1,128], index: 6, kind: input, shape index: {}]   ;;  %s8408_s7 = inlined_call_operand.hbm [shape: bf16[2,16,16,128], index: 7, kind: output, shape index: {}]  }
   0x1   :  { %14 = vsyncpa [#allocation4 + $0x1], 0  ;;  %s6898_s24 = smov 0   ;;  %s6900_s25 = smov 0  }
   0x2   :  { %s6902_s26 = smov 0   ;;  %s6904_s27 = smov 0  }
   0x3   :  { %s6906_s28 = smov 0   ;;  %s6908_s29 = smov 0  }
   0x4   :  { %s6910_s30 = smov 0   ;;  %s6912_s8 = smov 0  }
   0x5 LB: > { %s5604_s9 = sadd.s32 4294967295, %s6849_s8   ;;  %s5605_s10 = sadd.s32 4294967294, %s6849_s8   ;;  %s6849_s8 = sphi %s6912_s8, %s20_s8   ;;  %s6845_s30 = sphi %s6910_s30, %s8431_s30   ;;  %s6841_s29 = sphi %s6908_s29, %s8430_s29   ;;  %s6837_s28 = sphi %s6906_s28, %s8429_s28   ;;  %s6833_s27 = sphi %s6904_s27, %s8428_s27   ;;  %s6829_s26 = sphi %s6902_s26, %s8427_s26   ;;  %s6825_s25 = sphi %s6900_s25, %s8426_s25   ;;  %s6821_s24 = sphi %s6898_s24, %s8425_s24  }
   0x6   : > { %s29_s11 = sadd.s32 1, %s6841_s29  ;;  %s32_s12 = sadd.s32 1, %s6845_s30 }
   0x7   : > { %p30_p0 = scmp.ge.s32.totalorder %s29_s11, 2  ;;  %p205_p1 = scmp.ne.s32.totalorder %s6829_s26, %s6825_s25 }
   0x8   : > { %p206_p2 = scmp.eq.s32.totalorder %s5604_s9, 3  ;;  %p211_p5 = scmp.ne.s32.totalorder %s6825_s25, %s6821_s24 }
   0x9   : > { %s8433_s11 = smov (%p30_p0, %s29_s11), 0  ;;  %s8435_s12 = smov (!%p30_p0, %s32_s12), %s6845_s30 }
   0xa   : > { %s191_s13 = ssub.s32 %s6841_s29, %s8433_s11  ;;  %p6949_p3 = por %p206_p2, %p205_p1 }
   0xb   : > { %p34_p4 = scmp.ge.s32.totalorder %s8435_s12, 2  ;;  %p212_p6 = scmp.eq.s32.totalorder %s5605_s10, 3 }
   0xc   : > { %p5608_p7 = scmp.ge.s32.totalorder %s6849_s8, 1  ;;  %p260_p9 = scmp.lt.s32.totalorder %s6849_s8, 5 }
   0xd   : > { %s8437_s12 = smov (%p34_p4, %s8435_s12), 0  ;;  %p6958_p8 = por %p212_p6, %p211_p5 }
   0xe   : > { %8412 = sst [smem:[#allocation6_spill]] %s8437_s12  ;;  %s190_s16 = ssub.s32 %s6845_s30, %s8437_s12 }
   0xf   : > { %s195_s17 = sadd.s32 1, %s6829_s26  ;;  %s192_s18 = sor.u32 %s191_s13, %s190_s16 }
  0x10   : > { %p261_p10 = pnand %p5608_p7, %p260_p9  ;;  %p193_p11 = scmp.eq.s32.totalorder %s192_s18, 0 }
  0x11   : > { %s8409_s20 = sand.u32 (!%p261_p10), 1, %s6825_s25   ;;  %v6656_v0 = vld [vmem:[%s8402_s1] sm:$0xff] (!%p261_p10)   ;;  %v379_v1 = vlaneseq (!%p261_p10)  ;;  %v6657_v2 = vld [vmem:[%s8402_s1 + $0x8] sm:$0xff] (!%p261_p10)   ;;  %p296_p12 = scmp.lt.s32.totalorder (!%p261_p10), %s6837_s28, 1  ;;  %v6851_v3 = vmov (!%p261_p10), 1966171168  }
  0x12   : > { %s6967_s19 = scalar_select %p193_p11, %s6829_s26, %s195_s17  }
  0x13   : > { %264 = sbr.rel (%p261_p10) target bundleno = 807 (0x327), region = 48  ;;  %s6973_s22 = sshll.u32 (!%p261_p10), %s8409_s20, 6  ;;  %6370 = vmatprep.subr.bf16.mxu0 (!%p261_p10), %v6656_v0  ;;  %v377_v4 = vunpack.c.l.s4 (!%p261_p10), %v6851_v3  ;;  %v6658_v5 = vld [vmem:[%s8402_s1 + $0x10] ss:$0 sps:$4 sm:$0x33] (!%p261_p10)   ;;  %v6988_v6 = vshrl.u32 (!%p261_p10), %v379_v1, 7 }
  0x14   : > { %p298_p13 = scmp.lt.s32.totalorder (!%p261_p10), %s6833_s27, 1  ;;  %6371 = vmatpush3.bf16.msra.mxu0 (!%p261_p10), %v6656_v0  ;;  %vm1599_vm0 = vcmask (!%p261_p10), 1041408   ;;  %vm1562_vm1 = vcmask (!%p261_p10), 293888   ;;  %vm2819_vm2 = vcmask (!%p261_p10), 1040384   ;;  %vm2852_vm3 = vsmask.f32 (!%p261_p10), 7938 }
  0x15   : > { %6372 = vmatprep.subr.bf16.mxu0 (!%p261_p10), %v6657_v2  ;;  %v378_v7 = vunpack.c.0.s8 (!%p261_p10), %v377_v4  ;;  %v1601_v8 = vsel (!%p261_p10), %vm1599_vm0, %v6658_v5, 0  ;;  %vm2820_vm4 = vsmask.f32 (!%p261_p10), 256  ;;  %vm7205_vm5 = vmand (!%p261_p10), %vm2819_vm2, %vm2852_vm3  ;;  %s7430_s18 = scalar_lea.vmem (!%p261_p10), [#allocation3], %s6973_s22  ;;  %p5699_p0 = scmp.ne.s32.totalorder (!%p261_p10), %s6833_s27, 0 }
  0x16   : > { %vm7231_vm6 = vmand (!%p261_p10), %vm2819_vm2, %vm2820_vm4 }
  0x17   : > { %v6991_v9 = vsub.s32 (!%p261_p10), %v378_v7, %v6988_v6 }
  0x18   : > { %6373 = vmatpush3.bf16.msra.mxu0 (!%p261_p10), %v6657_v2 }
  0x19   : > { %6576 = vmatprep.subr.msk.bf16.mxu0 (!%p261_p10), %vm1599_vm0, %v6658_v5 }
  0x1a   : > { %s297_s16 = scalar_select %p296_p12, %s6837_s28, 1 }
  0x1b   : > { %s299_s20 = scalar_select %p298_p13, %s6833_s27, 1 }
  0x1c   : > { %s6578_s23 = smul.u32 60, %s297_s16  ;;  %6375 = vmatpush3.bf16.msra.mxu0 %v1601_v8 }
  0x1d   : > { %s6577_s9 = smul.u32 30, %s299_s20 }
  0x1f   : > { %s302_s10 = sadd.s32 %s6578_s23, %s6577_s9 }
  0x20   : > { %s5610_s13 = sshll.u32 %s302_s10, 2 }
  0x21   : > { %s6996_s17 = scalar_lea.vmem %s8401_s0, %s5610_s13 }
  0x22   : > { %v5612_v10 = vld.sshfl [vmem:[%s6996_s17] sm:$0x33 pattern:$0x75316420] }
  0x23   : > { %v5613_v11 = vld.sshfl [vmem:[%s6996_s17 + $0x4] sm:$0x33 pattern:$0x75316420]  ;;  %v375_v12 = vcombine.high %v5612_v10, %v5612_v10  ;;  %v382_v13 = vrot.slane %v5612_v10, %v6991_v9 }
  0x24   : > { %v399_v14 = vcombine.high %v5613_v11, %v5613_v11  ;;  %v406_v15 = vrot.slane %v5613_v11, %v6991_v9  ;;  %v5614_v16 = vld.sshfl [vmem:[%s6996_s17 + $0x8] sm:$0x1 pattern:$0x75316420] }
  0x25   : > { %v389_v17 = vrot.slane %v375_v12, %v6991_v9  ;;  %v5615_v18 = vld.sshfl [vmem:[%s6996_s17 + $0xc] sm:$0x33 pattern:$0x75316420]  ;;  %v429_v21 = vrot.slane %v5614_v16, %v6991_v9 }
  0x26   : > { %v413_v19 = vrot.slane %v399_v14, %v6991_v9  ;;  %v5616_v20 = vld.sshfl [vmem:[%s6996_s17 + $0x10] sm:$0x33 pattern:$0x75316420]  ;;  %v437_v22 = vcombine.high %v5615_v18, %v5615_v18  ;;  %v444_v23 = vrot.slane %v5615_v18, %v6991_v9 }
  0x27   : > { %v993_v24 = vcombine.low %v382_v13, %v389_v17  ;;  %v5642_v25 = vcombine.high %v382_v13, %v389_v17  ;;  %v461_v26 = vcombine.high %v5616_v20, %v5616_v20  ;;  %v468_v27 = vrot.slane %v5616_v20, %v6991_v9  ;;  %v5617_v36 = vld.sshfl [vmem:[%s6996_s17 + $0x14] sm:$0x1 pattern:$0x75316420] }
  0x28   : > { %v995_v28 = vcombine.low %v406_v15, %v413_v19  ;;  %v5643_v29 = vcombine.high %v406_v15, %v413_v19  ;;  %v451_v30 = vrot.slane %v437_v22, %v6991_v9  ;;  %v452_v31 = vcombine.high %v444_v23, %v444_v23  ;;  %v5618_v41 = vld.sshfl [vmem:[%s6996_s17 + $0x18] sm:$0x33 pattern:$0x75316420] }
  0x29   : > { %v1003_v32 = vrot.slane %v993_v24, %v6991_v9  ;;  %v1010_v33 = vrot.slane %v5642_v25, %v6991_v9  ;;  %v475_v34 = vrot.slane %v461_v26, %v6991_v9  ;;  %v476_v35 = vcombine.high %v468_v27, %v468_v27  ;;  %v5619_v45 = vld.sshfl [vmem:[%s6996_s17 + $0x1c] sm:$0x33 pattern:$0x75316420] }
  0x2a   : > { %v1017_v37 = vrot.slane %v995_v28, %v6991_v9  ;;  %v1024_v38 = vrot.slane %v5643_v29, %v6991_v9  ;;  %v453_v39 = vcombine.high %v451_v30, %v451_v30  ;;  %v1042_v40 = vcombine.low %v429_v21, %v444_v23  ;;  %v5620_v55 = vld.sshfl [vmem:[%s6996_s17 + $0x20] sm:$0x1 pattern:$0x75316420] }
  0x2b   : > { %v1025_v42 = vcombine.low %v1003_v32, %v1010_v33  ;;  %v1043_v43 = vcombine.low %v451_v30, %v452_v31  ;;  %v1045_v44 = vcombine.low %v475_v34, %v476_v35  ;;  %v477_v46 = vcombine.high %v475_v34, %v475_v34  ;;  %v5621_v0 = vld.sshfl [vmem:[%s6996_s17 + $0x24] sm:$0x33 pattern:$0x75316420] }
  0x2c   : > { %v1026_v47 = vcombine.low %v1017_v37, %v1024_v38  ;;  %v1044_v48 = vcombine.low %v453_v39, %v468_v27  ;;  %v1052_v49 = vrot.slane %v1042_v40, %v6991_v9  ;;  %v491_v50 = vrot.slane %v5617_v36, %v6991_v9  ;;  %v5622_v4 = vld.sshfl [vmem:[%s6996_s17 + $0x28] sm:$0x33 pattern:$0x75316420] }
  0x2d   : > { %v1033_v51 = vrot.slane %v1025_v42, %v6991_v9  ;;  %v1059_v52 = vrot.slane %v1043_v43, %v6991_v9  ;;  %v1073_v53 = vrot.slane %v1045_v44, %v6991_v9  ;;  %v499_v54 = vcombine.high %v5618_v41, %v5618_v41  ;;  %v5623_v24 = vld.sshfl [vmem:[%s6996_s17 + $0x2c] sm:$0x1 pattern:$0x75316420] }
  0x2e   : > { %v1040_v56 = vrot.slane %v1026_v47, %v6991_v9  ;;  %v1066_v57 = vrot.slane %v1044_v48, %v6991_v9  ;;  %v506_v58 = vrot.slane %v5618_v41, %v6991_v9  ;;  %v523_v59 = vcombine.high %v5619_v45, %v5619_v45  ;;  %v5624_v28 = vld.sshfl [vmem:[%s6996_s17 + $0x30] sm:$0x33 pattern:$0x75316420] }
  0x2f   : > { %v1074_v60 = vcombine.low %v1052_v49, %v1059_v52  ;;  %v513_v61 = vrot.slane %v499_v54, %v6991_v9  ;;  %v530_v62 = vrot.slane %v5619_v45, %v6991_v9  ;;  %v1091_v63 = vcombine.low %v477_v46, %v491_v50  ;;  %v5625_v38 = vld.sshfl [vmem:[%s6996_s17 + $0x34] sm:$0x33 pattern:$0x75316420] }
  0x30   : > { %v1041_v1 = vcombine.low %v1033_v51, %v1040_v56  ;;  %v1075_v2 = vcombine.low %v1066_v57, %v1073_v53  ;;  %v537_v3 = vrot.slane %v523_v59, %v6991_v9  ;;  %v553_v5 = vrot.slane %v5620_v55, %v6991_v9  ;;  %v5626_v47 = vld.sshfl [vmem:[%s6996_s17 + $0x38] sm:$0x1 pattern:$0x75316420] }
  0x31   : > { %v1082_v7 = vrot.slane %v1074_v60, %v6991_v9  ;;  %v1092_v8 = vcombine.low %v506_v58, %v513_v61  ;;  %v5644_v10 = vcombine.high %v506_v58, %v513_v61  ;;  %v1101_v11 = vrot.slane %v1091_v63, %v6991_v9  ;;  %v5627_v51 = vld.sshfl [vmem:[%s6996_s17 + $0x3c] sm:$0x33 pattern:$0x75316420] }
  0x32   : > { %6376 = vmatprep.mubr.msk.bf16.mxu0 %vm1562_vm1, %v1041_v1  ;;  %v1089_v12 = vrot.slane %v1075_v2, %v6991_v9  ;;  %v1094_v13 = vcombine.low %v530_v62, %v537_v3  ;;  %v561_v14 = vcombine.high %v5621_v0, %v5621_v0  ;;  %v568_v15 = vrot.slane %v5621_v0, %v6991_v9 }
  0x33   : > { %v1108_v16 = vrot.slane %v1092_v8, %v6991_v9  ;;  %v1115_v17 = vrot.slane %v5644_v10, %v6991_v9  ;;  %v592_v18 = vrot.slane %v5622_v4, %v6991_v9  ;;  %v5645_v19 = vcombine.high %v530_v62, %v537_v3 }
  0x34   : > { %v1090_v20 = vcombine.low %v1082_v7, %v1089_v12  ;;  %v1122_v21 = vrot.slane %v1094_v13, %v6991_v9  ;;  %v575_v22 = vrot.slane %v561_v14, %v6991_v9  ;;  %v576_v23 = vcombine.high %v568_v15, %v568_v15  ;;  %v5629_v12 = vld.sshfl [vmem:[%s6996_s17 + $0x44] sm:$0x1 pattern:$0x75316420] }
  0x35   : > { %v1123_v25 = vcombine.low %v1101_v11, %v1108_v16  ;;  %v1141_v26 = vcombine.low %v553_v5, %v568_v15  ;;  %v1150_v27 = vrot.slane %v5645_v19, %v6991_v9  ;;  %v585_v29 = vcombine.high %v5622_v4, %v5622_v4  ;;  %v5628_v5 = vld.sshfl [vmem:[%s6996_s17 + $0x40] sm:$0x33 pattern:$0x75316420] }
  0x36   : > { %6377 = vmatmul.mubr.msk.bf16.vlgmr.msra.gmra.mrb[0].mxu0 %vm1562_vm1, %v1090_v20  ;;  %v1124_v30 = vcombine.low %v1115_v17, %v1122_v21  ;;  %v577_v31 = vcombine.high %v575_v22, %v575_v22  ;;  %v1142_v32 = vcombine.low %v575_v22, %v576_v23  ;;  %v600_v33 = vcombine.high %v592_v18, %v592_v18  ;;  %v5630_v17 = vld.sshfl [vmem:[%s6996_s17 + $0x48] sm:$0x33 pattern:$0x75316420] }
  0x37   : > { %v1131_v34 = vrot.slane %v1123_v25, %v6991_v9  ;;  %v1157_v35 = vrot.slane %v1141_v26, %v6991_v9  ;;  %v599_v36 = vrot.slane %v585_v29, %v6991_v9  ;;  %v615_v37 = vrot.slane %v5623_v24, %v6991_v9 }
  0x38   : > { %v1138_v39 = vrot.slane %v1124_v30, %v6991_v9  ;;  %v1143_v40 = vcombine.low %v577_v31, %v592_v18  ;;  %v1164_v41 = vrot.slane %v1142_v32, %v6991_v9  ;;  %v623_v42 = vcombine.high %v5624_v28, %v5624_v28  ;;  %v5631_v30 = vld.sshfl [vmem:[%s6996_s17 + $0x4c] sm:$0x33 pattern:$0x75316420] }
  0x39   : > { %v1172_v43 = vcombine.low %v1150_v27, %v1157_v35  ;;  %v601_v44 = vcombine.high %v599_v36, %v599_v36  ;;  %v630_v45 = vrot.slane %v5624_v28, %v6991_v9  ;;  %v1189_v46 = vcombine.low %v599_v36, %v600_v33  ;;  %v5632_v35 = vld.sshfl [vmem:[%s6996_s17 + $0x50] sm:$0x1 pattern:$0x75316420] }
  0x3a   : > { %v1139_v48 = vcombine.low %v1131_v34, %v1138_v39  ;;  %v1171_v49 = vrot.slane %v1143_v40, %v6991_v9  ;;  %v637_v50 = vrot.slane %v623_v42, %v6991_v9  ;;  %v647_v52 = vcombine.high %v5625_v38, %v5625_v38  ;;  %v5633_v40 = vld.sshfl [vmem:[%s6996_s17 + $0x54] sm:$0x33 pattern:$0x75316420] }
  0x3b   : > { %v1180_v53 = vrot.slane %v1172_v43, %v6991_v9  ;;  %v1190_v54 = vcombine.low %v601_v44, %v615_v37  ;;  %v1199_v55 = vrot.slane %v1189_v46, %v6991_v9  ;;  %v654_v56 = vrot.slane %v5625_v38, %v6991_v9 }
  0x3c   : > { %6380 = vmatprep.mubr.msk.bf16.mxu0 %vm1562_vm1, %v1139_v48  ;;  %v1173_v57 = vcombine.low %v1164_v41, %v1171_v49  ;;  %v1191_v58 = vcombine.low %v630_v45, %v637_v50  ;;  %v5646_v59 = vcombine.high %v630_v45, %v637_v50  ;;  %v661_v60 = vrot.slane %v647_v52, %v6991_v9 }
  0x3d   : > { %v1206_v61 = vrot.slane %v1190_v54, %v6991_v9  ;;  %v677_v62 = vrot.slane %v5626_v47, %v6991_v9  ;;  %v685_v63 = vcombine.high %v5627_v51, %v5627_v51  ;;  %v692_v0 = vrot.slane %v5627_v51, %v6991_v9 }
  0x3e   : > { %v1187_v1 = vrot.slane %v1173_v57, %v6991_v9  ;;  %v1213_v2 = vrot.slane %v1191_v58, %v6991_v9  ;;  %v1220_v3 = vrot.slane %v5646_v59, %v6991_v9  ;;  %v1238_v4 = vcombine.low %v654_v56, %v661_v60 }
  0x3f   : > { %v1221_v7 = vcombine.low %v1199_v55, %v1206_v61  ;;  %v699_v8 = vrot.slane %v685_v63, %v6991_v9  ;;  %v700_v10 = vcombine.high %v692_v0, %v692_v0  ;;  %v5647_v11 = vcombine.high %v654_v56, %v661_v60  ;;  %v5634_v61 = vld.sshfl [vmem:[%s6996_s17 + $0x58] sm:$0x33 pattern:$0x75316420] }
  0x40   : > { %v1188_v13 = vcombine.low %v1180_v53, %v1187_v1  ;;  %v1222_v14 = vcombine.low %v1213_v2, %v1220_v3  ;;  %v1240_v15 = vcombine.low %v677_v62, %v692_v0  ;;  %v1248_v16 = vrot.slane %v1238_v4, %v6991_v9  ;;  %v5635_v0 = vld.sshfl [vmem:[%s6996_s17 + $0x5c] sm:$0x1 pattern:$0x75316420] }
  0x41   : > { %v1229_v18 = vrot.slane %v1221_v7, %v6991_v9  ;;  %v1241_v19 = vcombine.low %v699_v8, %v700_v10  ;;  %v1255_v20 = vrot.slane %v5647_v11, %v6991_v9  ;;  %v701_v21 = vcombine.high %v699_v8, %v699_v8 }
  0x42   : > { %6381 = vmatmul.mubr.msk.bf16.gmra.mrb[4].mxu0 %vm1562_vm1, %v1188_v13  ;;  %v1236_v22 = vrot.slane %v1222_v14, %v6991_v9  ;;  %v1262_v23 = vrot.slane %v1240_v15, %v6991_v9  ;;  %v709_v24 = vcombine.high %v5628_v5, %v5628_v5  ;;  %v716_v25 = vrot.slane %v5628_v5, %v6991_v9  ;;  %v5636_v13 = vld.sshfl [vmem:[%s6996_s17 + $0x60] sm:$0x33 pattern:$0x75316420] }
  0x43   : > { %v1269_v26 = vrot.slane %v1241_v19, %v6991_v9  ;;  %v1270_v27 = vcombine.low %v1248_v16, %v1255_v20  ;;  %v739_v28 = vrot.slane %v5629_v12, %v6991_v9  ;;  %v747_v29 = vcombine.high %v5630_v17, %v5630_v17 }
  0x44   : > { %v1237_v31 = vcombine.low %v1229_v18, %v1236_v22  ;;  %v723_v32 = vrot.slane %v709_v24, %v6991_v9  ;;  %v724_v33 = vcombine.high %v716_v25, %v716_v25  ;;  %v754_v34 = vrot.slane %v5630_v17, %v6991_v9  ;;  %v5637_v22 = vld.sshfl [vmem:[%s6996_s17 + $0x64] sm:$0x33 pattern:$0x75316420] }
  0x45   : > { %v1271_v36 = vcombine.low %v1262_v23, %v1269_v26  ;;  %v1278_v37 = vrot.slane %v1270_v27, %v6991_v9  ;;  %v761_v38 = vrot.slane %v747_v29, %v6991_v9  ;;  %v1287_v39 = vcombine.low %v701_v21, %v716_v25 }
  0x46   : > { %6384 = vmatprep.mubr.msk.bf16.mxu0 %vm1562_vm1, %v1237_v31  ;;  %v725_v41 = vcombine.high %v723_v32, %v723_v32  ;;  %v1288_v42 = vcombine.low %v723_v32, %v724_v33  ;;  %v771_v43 = vcombine.high %v5631_v30, %v5631_v30  ;;  %v778_v44 = vrot.slane %v5631_v30, %v6991_v9  ;;  %v5638_v31 = vld.sshfl [vmem:[%s6996_s17 + $0x68] sm:$0x1 pattern:$0x75316420] }
  0x47   : > { %v1285_v45 = vrot.slane %v1271_v36, %v6991_v9  ;;  %v1290_v46 = vcombine.low %v754_v34, %v761_v38  ;;  %v1297_v47 = vrot.slane %v1287_v39, %v6991_v9  ;;  %v801_v48 = vrot.slane %v5632_v35, %v6991_v9  ;;  %v5639_v36 = vld.sshfl [vmem:[%s6996_s17 + $0x6c] sm:$0x33 pattern:$0x75316420] }
  0x48   : > { %v1289_v49 = vcombine.low %v725_v41, %v739_v28  ;;  %v1304_v50 = vrot.slane %v1288_v42, %v6991_v9  ;;  %v785_v51 = vrot.slane %v771_v43, %v6991_v9  ;;  %v816_v52 = vrot.slane %v5633_v40, %v6991_v9 }
  0x49   : > { %v1286_v53 = vcombine.low %v1278_v37, %v1285_v45  ;;  %v1318_v54 = vrot.slane %v1290_v46, %v6991_v9  ;;  %v5648_v55 = vcombine.high %v754_v34, %v761_v38  ;;  %v809_v56 = vcombine.high %v5633_v40, %v5633_v40 }
  0x4a   : > { %v1311_v57 = vrot.slane %v1289_v49, %v6991_v9  ;;  %v1319_v58 = vcombine.low %v1297_v47, %v1304_v50  ;;  %v1337_v59 = vcombine.low %v778_v44, %v785_v51  ;;  %v5649_v60 = vcombine.high %v778_v44, %v785_v51  ;;  %v5640_v44 = vld.sshfl [vmem:[%s6996_s17 + $0x70] sm:$0x33 pattern:$0x75316420] }
  0x4b   : > { %6385 = vmatmul.mubr.msk.bf16.gmra.mrb[8].mxu0 %vm1562_vm1, %v1286_v53  ;;  %v1339_v62 = vcombine.low %v801_v48, %v816_v52  ;;  %v1346_v63 = vrot.slane %v5648_v55, %v6991_v9  ;;  %v823_v1 = vrot.slane %v809_v56, %v6991_v9  ;;  %v824_v2 = vcombine.high %v816_v52, %v816_v52 }
  0x4c   : > { %v1320_v3 = vcombine.low %v1311_v57, %v1318_v54  ;;  %v1327_v4 = vrot.slane %v1319_v58, %v6991_v9  ;;  %v1353_v5 = vrot.slane %v1337_v59, %v6991_v9  ;;  %v1360_v7 = vrot.slane %v5649_v60, %v6991_v9 }
  0x4d   : > { %v1367_v8 = vrot.slane %v1339_v62, %v6991_v9  ;;  %v825_v10 = vcombine.high %v823_v1, %v823_v1  ;;  %v833_v11 = vcombine.high %v5634_v61, %v5634_v61  ;;  %v840_v12 = vrot.slane %v5634_v61, %v6991_v9 }
  0x4e   : > { %v1334_v14 = vrot.slane %v1320_v3, %v6991_v9  ;;  %v1368_v15 = vcombine.low %v1346_v63, %v1353_v5  ;;  %v863_v16 = vrot.slane %v5635_v0, %v6991_v9  ;;  %v1385_v17 = vcombine.low %v823_v1, %v824_v2  ;;  %v5641_v2 = vld.sshfl [vmem:[%s6996_s17 + $0x74] sm:$0x1 pattern:$0x75316420] }
  0x4f   : > { %v1369_v18 = vcombine.low %v1360_v7, %v1367_v8  ;;  %v847_v19 = vrot.slane %v833_v11, %v6991_v9  ;;  %v848_v20 = vcombine.high %v840_v12, %v840_v12  ;;  %v1386_v21 = vcombine.low %v825_v10, %v840_v12 }
  0x50   : > { %v1335_v23 = vcombine.low %v1327_v4, %v1334_v14  ;;  %v1376_v24 = vrot.slane %v1368_v15, %v6991_v9  ;;  %v1395_v25 = vrot.slane %v1385_v17, %v6991_v9  ;;  %v871_v26 = vcombine.high %v5636_v13, %v5636_v13 }
  0x51   : > { %v1383_v27 = vrot.slane %v1369_v18, %v6991_v9  ;;  %v849_v28 = vcombine.high %v847_v19, %v847_v19  ;;  %v1387_v29 = vcombine.low %v847_v19, %v848_v20  ;;  %v1402_v30 = vrot.slane %v1386_v21, %v6991_v9 }
  0x52   : > { %6388 = vmatprep.mubr.msk.bf16.mxu0 %vm1562_vm1, %v1335_v23  ;;  %v878_v32 = vrot.slane %v5636_v13, %v6991_v9  ;;  %v885_v33 = vrot.slane %v871_v26, %v6991_v9  ;;  %v895_v34 = vcombine.high %v5637_v22, %v5637_v22  ;;  %v902_v35 = vrot.slane %v5637_v22, %v6991_v9 }
  0x53   : > { %v1384_v37 = vcombine.low %v1376_v24, %v1383_v27  ;;  %v1388_v38 = vcombine.low %v849_v28, %v863_v16  ;;  %v1409_v39 = vrot.slane %v1387_v29, %v6991_v9  ;;  %v1417_v40 = vcombine.low %v1395_v25, %v1402_v30  ;;  %v7161_v30 = vld [vmem:[%s8404_s3] ss:$0 sm:$0xff] }
  0x54   : > { %v909_v41 = vrot.slane %v895_v34, %v6991_v9  ;;  %v1434_v42 = vcombine.low %v878_v32, %v885_v33  ;;  %v5650_v43 = vcombine.high %v878_v32, %v885_v33  ;;  %v925_v45 = vrot.slane %v5638_v31, %v6991_v9  ;;  %v7166_v33 = vld [vmem:[%s8405_s4] ss:$0 sm:$0xff] }
  0x55   : > { %6389 = vmatmul.mubr.msk.bf16.gmra.mrb[12].mxu0 %vm1562_vm1, %v1384_v37  ;;  %v1416_v46 = vrot.slane %v1388_v38, %v6991_v9  ;;  %v1425_v47 = vrot.slane %v1417_v40, %v6991_v9  ;;  %v933_v48 = vcombine.high %v5639_v36, %v5639_v36  ;;  %v940_v49 = vrot.slane %v5639_v36, %v6991_v9 }
  0x56   : > { %v1436_v50 = vcombine.low %v902_v35, %v909_v41  ;;  %v5651_v51 = vcombine.high %v902_v35, %v909_v41  ;;  %v1444_v52 = vrot.slane %v1434_v42, %v6991_v9  ;;  %v1451_v53 = vrot.slane %v5650_v43, %v6991_v9 }
  0x57   : > { %v1418_v54 = vcombine.low %v1409_v39, %v1416_v46  ;;  %v947_v55 = vrot.slane %v933_v48, %v6991_v9  ;;  %v948_v56 = vcombine.high %v940_v49, %v940_v49  ;;  %v957_v57 = vcombine.high %v5640_v44, %v5640_v44 }
  0x58   : > { %v1458_v58 = vrot.slane %v1436_v50, %v6991_v9  ;;  %v1465_v59 = vrot.slane %v5651_v51, %v6991_v9  ;;  %v1466_v60 = vcombine.low %v1444_v52, %v1451_v53  ;;  %v964_v61 = vrot.slane %v5640_v44, %v6991_v9 }
  0x59   : > { %v1432_v62 = vrot.slane %v1418_v54, %v6991_v9  ;;  %v949_v63 = vcombine.high %v947_v55, %v947_v55  ;;  %v971_v0 = vrot.slane %v957_v57, %v6991_v9  ;;  %v1483_v1 = vcombine.low %v925_v45, %v940_v49 }
  0x5a   : > { %v1467_v3 = vcombine.low %v1458_v58, %v1465_v59  ;;  %v1474_v4 = vrot.slane %v1466_v60, %v6991_v9  ;;  %v972_v5 = vcombine.high %v964_v61, %v964_v61  ;;  %v1484_v7 = vcombine.low %v947_v55, %v948_v56 }
  0x5b   : > { %v1433_v8 = vcombine.low %v1425_v47, %v1432_v62  ;;  %v1485_v10 = vcombine.low %v949_v63, %v964_v61  ;;  %v1493_v11 = vrot.slane %v1483_v1, %v6991_v9  ;;  %v973_v12 = vcombine.high %v971_v0, %v971_v0 }
  0x5c   : > { %v1481_v13 = vrot.slane %v1467_v3, %v6991_v9  ;;  %v1486_v14 = vcombine.low %v971_v0, %v972_v5  ;;  %v1500_v15 = vrot.slane %v1484_v7, %v6991_v9  ;;  %v987_v16 = vrot.slane %v5641_v2, %v6991_v9 }
  0x5d   : > { %6392 = vmatprep.mubr.msk.bf16.mxu0 %vm1562_vm1, %v1433_v8  ;;  %v1507_v17 = vrot.slane %v1485_v10, %v6991_v9  ;;  %v6852_v28 = vmov 1983009808  }
  0x5e   : > { %v1482_v18 = vcombine.low %v1474_v4, %v1481_v13  ;;  %v1514_v19 = vrot.slane %v1486_v14, %v6991_v9  ;;  %v1515_v20 = vcombine.low %v1493_v11, %v1500_v15  ;;  %v1532_v21 = vcombine.low %v973_v12, %v987_v16 }
  0x5f   : > { %v1839_v29 = vunpack.c.l.s4 %v6852_v28 }
  0x60   : > { %6393 = vmatmul.mubr.msk.bf16.gmra.mrb[16].mxu0 %vm1562_vm1, %v1482_v18  ;;  %v1516_v22 = vcombine.low %v1507_v17, %v1514_v19  ;;  %v1523_v23 = vrot.slane %v1515_v20, %v6991_v9  ;;  %v1539_v24 = vrot.slane %v1532_v21, %v6991_v9 }
  0x61   : > { %v1840_v31 = vunpack.c.0.s8 %v1839_v29  ;;  %v6853_v29 = vmov (!%p5699_p0), 0  }
  0x62   : > { %v1530_v25 = vrot.slane %v1516_v22, %v6991_v9  ;;  %v1546_v27 = vrot.slane %v1539_v24, %v6991_v9 }
  0x63   : > { %v7172_v38 = vsub.s32 %v1840_v31, %v6988_v6 }
  0x64   : > { %v1531_v26 = vcombine.low %v1523_v23, %v1530_v25 }
  0x66   : > { %6396 = vmatprep.mubr.msk.bf16.mxu0 %vm1562_vm1, %v1531_v26 }
  0x68   : > { %6397 = vmatmul.mubr.msk.bf16.gmra.mrb[20].mxu0 %vm1562_vm1, %v1546_v27 }
 0x109   : > { %v6378_v32 = vpop.f32.mrb[0].mxu0 }
 0x10a   : > { %v1740_v9 = vmul.f32 %v6378_v32, %v7161_v30  ;;  %v1637_v34 = vpop.f32.mrb[1].mxu0 }
 0x10b   : > { %v1738_v35 = vmul.f32 %v7161_v30, %v1637_v34  ;;  %v6379_v36 = vpop.f32.mrb[2].mxu0 }
 0x10c   : > { %v1770_v37 = vadd.f32 %v7166_v33, %v1740_v9  ;;  %v1741_v39 = vmul.f32 %v6379_v36, %v7161_v30  ;;  %v1640_v40 = vpop.f32.mrb[3].mxu0 }
 0x10d   : > { %v1768_v41 = vadd.f32 %v7166_v33, %v1738_v35  ;;  %v1739_v42 = vmul.f32 %v7161_v30, %v1640_v40 }
 0x10e   : > { %v1793_v43 = vmax.f32 %v1770_v37, 0.0  ;;  %v1771_v44 = vadd.f32 %v7166_v33, %v1741_v39 }
 0x10f   : > { %v1791_v45 = vmax.f32 %v1768_v41, 0.0  ;;  %v1769_v46 = vadd.f32 %v7166_v33, %v1739_v42 }
 0x110   : > { %v1871_v47 = vcombine.high %v1793_v43, %v1793_v43  ;;  %v1878_v48 = vrot.slane %v1793_v43, %v7172_v38  ;;  %v1794_v49 = vmax.f32 %v1771_v44, 0.0 }
 0x111   : > { %v1837_v6 = vcombine.high %v1791_v45, %v1791_v45  ;;  %v1844_v50 = vrot.slane %v1791_v45, %v7172_v38  ;;  %v1792_v51 = vmax.f32 %v1769_v46, 0.0 }
 0x112   : > { %v1885_v52 = vrot.slane %v1871_v47, %v7172_v38  ;;  %v1886_v53 = vcombine.high %v1878_v48, %v1878_v48  ;;  %v2259_v54 = vrot.slane %v1878_v48, %v7172_v38  ;;  %v1888_v55 = vcombine.high %v1794_v49, %v1794_v49 }
 0x113   : > { %v1851_v56 = vrot.slane %v1837_v6, %v7172_v38  ;;  %v1852_v57 = vcombine.high %v1844_v50, %v1844_v50  ;;  %v1895_v58 = vrot.slane %v1794_v49, %v7172_v38  ;;  %v1854_v59 = vcombine.high %v1792_v51, %v1792_v51 }
 0x114   : > { %v2260_v60 = vcombine.low %v1886_v53, %v1885_v52  ;;  %v5993_v61 = vpack.c.bf16 %v2259_v54, %v2259_v54  ;;  %v1887_v62 = vcombine.high %v1885_v52, %v1885_v52  ;;  %v7186_v63 = vrot.slane %v1888_v55, %v7172_v38 }
 0x115   : > { %v1853_v0 = vcombine.high %v1851_v56, %v1851_v56  ;;  %v2219_v1 = vcombine.low %v1844_v50, %v1852_v57  ;;  %v1903_v2 = vcombine.high %v1895_v58, %v1895_v58  ;;  %v1861_v3 = vrot.slane %v1792_v51, %v7172_v38  ;;  %v6382_v4 = vpop.f32.mrb[4].mxu0 }
 0x116   : > { %2791 = vst [vmem:[#allocation2 + $0x8] sm:$0x1] %v5993_v61  ;;  %v2261_v5 = vcombine.low %v1887_v62, %v1895_v58  ;;  %v1868_v7 = vrot.slane %v1854_v59, %v7172_v38  ;;  %v1744_v8 = vmul.f32 %v6382_v4, %v7161_v30  ;;  %v1653_v10 = vpop.f32.mrb[5].mxu0  ;;  %v2268_v11 = vrot.slane %v2260_v60, %v7172_v38 }
 0x117   : > { %v2220_v12 = vcombine.low %v1851_v56, %v1853_v0  ;;  %v7193_v13 = vcombine.low %v1903_v2, %v7186_v63  ;;  %v1869_v14 = vcombine.high %v1861_v3, %v1861_v3  ;;  %v6383_v15 = vpop.f32.mrb[6].mxu0  ;;  %v1742_v19 = vmul.f32 %v7161_v30, %v1653_v10 }
 0x118   : > { %v2275_v16 = vrot.slane %v2261_v5, %v7172_v38  ;;  %v1870_v17 = vcombine.high %v1868_v7, %v1868_v7  ;;  %v1774_v18 = vadd.f32 %v7166_v33, %v1744_v8  ;;  %v1656_v20 = vpop.f32.mrb[7].mxu0  ;;  %v2227_v21 = vrot.slane %v2219_v1, %v7172_v38 }
 0x119   : > { %v2234_v22 = vrot.slane %v2220_v12, %v7172_v38  ;;  %v2285_v23 = vrot.slane %v7193_v13, %v7172_v38  ;;  %v2236_v24 = vcombine.low %v1861_v3, %v1869_v14  ;;  %v1772_v28 = vadd.f32 %v7166_v33, %v1742_v19 }
 0x11a   : > { %v2276_v25 = vcombine.low %v2268_v11, %v2275_v16  ;;  %v2237_v26 = vcombine.low %v1868_v7, %v1870_v17  ;;  %v1797_v27 = vmax.f32 %v1774_v18, 0.0  ;;  %v1904_v32 = vcombine.high %v7186_v63, %v7186_v63 }
 0x11b   : > { %v2244_v31 = vrot.slane %v2236_v24, %v7172_v38  ;;  %v1745_v9 = vmul.f32 %v6383_v15, %v7161_v30  ;;  %v1743_v34 = vmul.f32 %v7161_v30, %v1656_v20  ;;  %v2235_v41 = vcombine.low %v2227_v21, %v2234_v22 }
 0x11c   : > { %v5994_v35 = vpack.c.bf16 %v2276_v25, %v2276_v25  ;;  %v2251_v36 = vrot.slane %v2237_v26, %v7172_v38  ;;  %v1939_v37 = vcombine.high %v1797_v27, %v1797_v27  ;;  %v1946_v39 = vrot.slane %v1797_v27, %v7172_v38 }
 0x11d   : > { %v2854_v40 = vld [vmem:[#allocation2 + $0x8] sm:$0x1]  ;;  %v1795_v42 = vmax.f32 %v1772_v28, 0.0  ;;  %v1775_v43 = vadd.f32 %v7166_v33, %v1745_v9  ;;  %v1773_v44 = vadd.f32 %v7166_v33, %v1743_v34 }
 0x11e   : > { %v2855_v45 = vsel %vm7205_vm5, 0, %v2854_v40  ;;  %2792 = vst [vmem:[#allocation2 + $0xc] sm:$0xf] %v5994_v35  ;;  %v2252_v46 = vcombine.low %v2244_v31, %v2251_v36  ;;  %v1953_v47 = vrot.slane %v1939_v37, %v7172_v38  ;;  %v1954_v48 = vcombine.high %v1946_v39, %v1946_v39  ;;  %v6386_v49 = vpop.f32.mrb[8].mxu0 }
 0x11f   : > { %2856 = vst [vmem:[#allocation2 + $0x8] sm:$0x1] %v2855_v45  ;;  %v1905_v6 = vcombine.high %v1795_v42, %v1795_v42  ;;  %v1912_v50 = vrot.slane %v1795_v42, %v7172_v38  ;;  %v1798_v51 = vmax.f32 %v1775_v43, 0.0  ;;  %v1796_v52 = vmax.f32 %v1773_v44, 0.0  ;;  %v1669_v53 = vpop.f32.mrb[9].mxu0 }
 0x120   : > { %v6042_v54 = vpack.c.bf16 %v2252_v46, %v2235_v41  ;;  %v7222_v55 = vcombine.low %v1946_v39, %v1954_v48  ;;  %v2341_v56 = vrot.slane %v1953_v47, %v7172_v38  ;;  %v1955_v57 = vcombine.high %v1953_v47, %v1953_v47  ;;  %v6387_v58 = vpop.f32.mrb[10].mxu0  ;;  %2890 = vst [vmem:[#allocation2 + $0x8] sm:$0x1] (!%p5699_p0), %v6853_v29 }
 0x121   : > { %v1919_v59 = vrot.slane %v1905_v6, %v7172_v38  ;;  %v1920_v60 = vcombine.high %v1912_v50, %v1912_v50  ;;  %v2278_v61 = vcombine.low %v1904_v32, %v1912_v50  ;;  %v1956_v62 = vcombine.high %v1798_v51, %v1798_v51  ;;  %v1672_v63 = vpop.f32.mrb[11].mxu0 }
 0x122   : > { %6043 = vst [vmem:[#allocation2] sm:$0xff] %v6042_v54   ;;  %v2333_v0 = vrot.slane %v7222_v55, %v7172_v38  ;;  %v5999_v1 = vpack.c.bf16 %v2341_v56, %v2341_v56  ;;  %v1963_v2 = vrot.slane %v1798_v51, %v7172_v38  ;;  %v1922_v3 = vcombine.high %v1796_v52, %v1796_v52 }
 0x123   : > { %v1921_v5 = vcombine.high %v1919_v59, %v1919_v59  ;;  %v2292_v7 = vrot.slane %v2278_v61, %v7172_v38  ;;  %v2300_v8 = vrot.slane %v1920_v60, %v7172_v38  ;;  %v7238_v10 = vrot.slane %v1956_v62, %v7172_v38  ;;  %2889 = vst [vmem:[#allocation2 + $0x4] sm:$0xf] (!%p5699_p0), %v6853_v29 }
 0x124   : > { %2797 = vst [vmem:[#allocation2 + $0x20] sm:$0x1] %v5999_v1  ;;  %v1971_v11 = vcombine.high %v1963_v2, %v1963_v2  ;;  %v2342_v12 = vcombine.low %v1955_v57, %v1963_v2  ;;  %v1929_v13 = vrot.slane %v1796_v52, %v7172_v38  ;;  %v1936_v14 = vrot.slane %v1922_v3, %v7172_v38 }
 0x125   : > { %v2825_v15 = vld [vmem:[#allocation2 + $0xc] sm:$0x1]  ;;  %v2293_v16 = vcombine.low %v2285_v23, %v2292_v7  ;;  %v2301_v17 = vcombine.low %v1919_v59, %v1921_v5  ;;  %v5996_v18 = vpack.c.bf16 %v2300_v8, %v2300_v8  ;;  %v1748_v19 = vmul.f32 %v6386_v49, %v7161_v30 }
 0x126   : > { %v2826_v20 = vsel %vm7231_vm6, 0, %v2825_v15  ;;  %v2343_v21 = vcombine.low %v1971_v11, %v7238_v10  ;;  %v2350_v22 = vrot.slane %v2342_v12, %v7172_v38  ;;  %v1937_v24 = vcombine.high %v1929_v13, %v1929_v13 }
 0x127   : > { %2827 = vst [vmem:[#allocation2 + $0xc] sm:$0x1] %v2826_v20  ;;  %v2309_v25 = vrot.slane %v2301_v17, %v7172_v38  ;;  %v5995_v26 = vpack.c.bf16 %v2293_v16, %v2293_v16  ;;  %2794 = vst [vmem:[#allocation2 + $0x14] sm:$0x1] %v5996_v18  ;;  %v1938_v27 = vcombine.high %v1936_v14, %v1936_v14 }
 0x128   : > { %v1778_v23 = vadd.f32 %v7166_v33, %v1748_v19  ;;  %v2357_v28 = vrot.slane %v2343_v21, %v7172_v38  ;;  %v2302_v31 = vcombine.low %v1929_v13, %v1937_v24  ;;  %v1746_v32 = vmul.f32 %v7161_v30, %v1669_v53  ;;  %v6390_v34 = vpop.f32.mrb[12].mxu0 }
 0x129   : > { %v1972_v9 = vcombine.high %v7238_v10, %v7238_v10  ;;  %v2822_v35 = vld [vmem:[#allocation2] sm:$0x1]  ;;  %2793 = vst [vmem:[#allocation2 + $0x10] sm:$0xf] %v5995_v26  ;;  %v2318_v36 = vcombine.low %v1936_v14, %v1938_v27  ;;  %v1749_v39 = vmul.f32 %v6387_v58, %v7161_v30  ;;  %v1747_v40 = vmul.f32 %v7161_v30, %v1672_v63  ;;  %v7255_v41 = vpop.f32.mrb[13].mxu0 }
 0x12a   : > { %v1801_v37 = vmax.f32 %v1778_v23, 0.0  ;;  %v2823_v42 = vsel %vm7231_vm6, 0, %v2822_v35  ;;  %v2358_v43 = vcombine.low %v2350_v22, %v2357_v28  ;;  %v2316_v44 = vrot.slane %v2302_v31, %v7172_v38  ;;  %v7261_v46 = vpop.f32.mrb[14].mxu0 }
 0x12b   : > { %v1776_v45 = vadd.f32 %v7166_v33, %v1746_v32  ;;  %2824 = vst [vmem:[#allocation2] sm:$0x1] %v2823_v42  ;;  %v2860_v47 = vld [vmem:[#allocation2 + $0x20] sm:$0x1]  ;;  %v2326_v48 = vrot.slane %v2318_v36, %v7172_v38  ;;  %v1779_v50 = vadd.f32 %v7166_v33, %v1749_v39  ;;  %v7266_v51 = vpop.f32.mrb[15].mxu0  ;;  %v1777_v63 = vadd.f32 %v7166_v33, %v1747_v40 }
 0x12c   : > { %v2007_v49 = vcombine.high %v1801_v37, %v1801_v37  ;;  %v2014_v6 = vrot.slane %v1801_v37, %v7172_v38  ;;  %v2861_v52 = vsel %vm7205_vm5, 0, %v2860_v47  ;;  %v6000_v53 = vpack.c.bf16 %v2358_v43, %v2358_v43  ;;  %2888 = vst [vmem:[#allocation2] sm:$0xf] (!%p5699_p0), %v6853_v29 }
 0x12d   : > { %v2317_v54 = vcombine.low %v2309_v25, %v2316_v44  ;;  %v1799_v55 = vmax.f32 %v1776_v45, 0.0  ;;  %2862 = vst [vmem:[#allocation2 + $0x20] sm:$0x1] %v2861_v52  ;;  %v2334_v56 = vcombine.low %v2326_v48, %v2333_v0  ;;  %v1802_v59 = vmax.f32 %v1779_v50, 0.0 }
 0x12e   : > { %v2021_v57 = vrot.slane %v2007_v49, %v7172_v38  ;;  %v2022_v58 = vcombine.high %v2014_v6, %v2014_v6  ;;  %v2857_v60 = vld [vmem:[#allocation2 + $0x14] sm:$0x1]  ;;  %2798 = vst [vmem:[#allocation2 + $0x24] sm:$0xf] %v6000_v53  ;;  %v1752_v1 = vmul.f32 %v6390_v34, %v7161_v30  ;;  %v1800_v15 = vmax.f32 %v1777_v63, 0.0 }
 0x12f   : > { %v1973_v61 = vcombine.high %v1799_v55, %v1799_v55  ;;  %v1980_v62 = vrot.slane %v1799_v55, %v7172_v38  ;;  %v2858_v2 = vsel %vm7205_vm5, 0, %v2857_v60  ;;  %v6047_v3 = vpack.c.bf16 %v2334_v56, %v2317_v54 }
 0x130   : > { %v2023_v5 = vcombine.high %v2021_v57, %v2021_v57  ;;  %v2400_v7 = vcombine.low %v2014_v6, %v2022_v58  ;;  %2859 = vst [vmem:[#allocation2 + $0x14] sm:$0x1] %v2858_v2  ;;  %v2024_v11 = vcombine.high %v1802_v59, %v1802_v59  ;;  %v2031_v14 = vrot.slane %v1802_v59, %v7172_v38 }
 0x131   : > { %v1987_v0 = vrot.slane %v1973_v61, %v7172_v38  ;;  %v1988_v8 = vcombine.high %v1980_v62, %v1980_v62  ;;  %v2359_v10 = vcombine.low %v1972_v9, %v1980_v62  ;;  %6104 = vst [vmem:[#allocation2 + $0x18] sm:$0xff] %v6047_v3   ;;  %v1990_v24 = vcombine.high %v1800_v15, %v1800_v15 }
 0x132   : > { %v2401_v12 = vcombine.low %v2021_v57, %v2023_v5  ;;  %v2408_v13 = vrot.slane %v2400_v7, %v7172_v38  ;;  %v7281_v19 = vrot.slane %v2024_v11, %v7172_v38  ;;  %v2039_v21 = vcombine.high %v2031_v14, %v2031_v14 }
 0x133   : > { %v1989_v16 = vcombine.high %v1987_v0, %v1987_v0  ;;  %v2360_v17 = vcombine.low %v1988_v8, %v1987_v0  ;;  %v2367_v18 = vrot.slane %v2359_v10, %v7172_v38  ;;  %v2423_v22 = vrot.slane %v2031_v14, %v7172_v38  ;;  %v6394_v25 = vpop.f32.mrb[16].mxu0 }
 0x134   : > { %v2415_v20 = vrot.slane %v2401_v12, %v7172_v38  ;;  %v1997_v23 = vrot.slane %v1800_v15, %v7172_v38  ;;  %v1782_v28 = vadd.f32 %v7166_v33, %v1752_v1  ;;  %v1701_v31 = vpop.f32.mrb[17].mxu0  ;;  %v7292_v34 = vcombine.low %v2039_v21, %v7281_v19 }
 0x135   : > { %v2374_v26 = vrot.slane %v2360_v17, %v7172_v38  ;;  %v2382_v27 = vrot.slane %v1989_v16, %v7172_v38  ;;  %v2831_v32 = vld [vmem:[#allocation2 + $0x24] sm:$0x1]  ;;  %v6005_v35 = vpack.c.bf16 %v2423_v22, %v2423_v22  ;;  %v2004_v36 = vrot.slane %v1990_v24, %v7172_v38  ;;  %v7295_v37 = vpop.f32.mrb[18].mxu0 }
 0x136   : > { %v7289_v9 = vcombine.low %v2408_v13, %v2415_v20  ;;  %v2832_v39 = vsel %vm7231_vm6, 0, %v2831_v32  ;;  %v2005_v43 = vcombine.high %v1997_v23, %v1997_v23  ;;  %v7299_v44 = vpop.f32.mrb[19].mxu0  ;;  %v2432_v45 = vrot.slane %v7292_v34, %v7172_v38 }
 0x137   : > { %v2375_v40 = vcombine.low %v2367_v18, %v2374_v26  ;;  %v6002_v42 = vpack.c.bf16 %v2382_v27, %v2382_v27  ;;  %2833 = vst [vmem:[#allocation2 + $0x24] sm:$0x1] %v2832_v39  ;;  %2803 = vst [vmem:[#allocation2 + $0x38] sm:$0x1] %v6005_v35  ;;  %v2006_v47 = vcombine.high %v2004_v36, %v2004_v36  ;;  %v1805_v48 = vmax.f32 %v1782_v28, 0.0 }
 0x138   : > { %v1750_v49 = vmul.f32 %v7161_v30, %v7255_v41  ;;  %v2828_v6 = vld [vmem:[#allocation2 + $0x18] sm:$0x1]  ;;  %v2383_v52 = vcombine.low %v1997_v23, %v2005_v43  ;;  %v2040_v53 = vcombine.high %v7281_v19, %v7281_v19  ;;  %v1753_v54 = vmul.f32 %v7261_v46, %v7161_v30 }
 0x139   : > { %v6001_v50 = vpack.c.bf16 %v2375_v40, %v2375_v40  ;;  %2800 = vst [vmem:[#allocation2 + $0x2c] sm:$0x1] %v6002_v42  ;;  %v2829_v55 = vsel %vm7231_vm6, 0, %v2828_v6  ;;  %v2384_v56 = vcombine.low %v2004_v36, %v2006_v47  ;;  %v2075_v57 = vcombine.high %v1805_v48, %v1805_v48 }
 0x13a   : > { %v2082_v58 = vrot.slane %v1805_v48, %v7172_v38  ;;  %2830 = vst [vmem:[#allocation2 + $0x18] sm:$0x1] %v2829_v55  ;;  %v2391_v41 = vrot.slane %v2383_v52, %v7172_v38  ;;  %v1780_v59 = vadd.f32 %v7166_v33, %v1750_v49  ;;  %v1783_v60 = vadd.f32 %v7166_v33, %v1753_v54 }
 0x13b   : > { %2799 = vst [vmem:[#allocation2 + $0x28] sm:$0xf] %v6001_v50  ;;  %v1751_v61 = vmul.f32 %v7161_v30, %v7266_v51  ;;  %v2398_v46 = vrot.slane %v2384_v56, %v7172_v38  ;;  %v2089_v62 = vrot.slane %v2075_v57, %v7172_v38  ;;  %v1756_v1 = vmul.f32 %v6394_v25, %v7161_v30  ;;  %v7320_v2 = vpop.f32.mrb[20].mxu0 }
 0x13c   : > { %v2090_v63 = vcombine.high %v2082_v58, %v2082_v58  ;;  %v1803_v3 = vmax.f32 %v1780_v59, 0.0  ;;  %v1806_v5 = vmax.f32 %v1783_v60, 0.0  ;;  %v1754_v0 = vmul.f32 %v7161_v30, %v1701_v31  ;;  %v7324_v8 = vpop.f32.mrb[21].mxu0 }
 0x13d   : > { %v1781_v7 = vadd.f32 %v7166_v33, %v1751_v61  ;;  %v2399_v10 = vcombine.low %v2391_v41, %v2398_v46  ;;  %v2091_v11 = vcombine.high %v2089_v62, %v2089_v62  ;;  %v1786_v12 = vadd.f32 %v7166_v33, %v1756_v1  ;;  %v6399_v13 = vpop.f32.mrb[22].mxu0 }
 0x13e   : > { %v7326_v51 = vcombine.low %v2082_v58, %v2090_v63  ;;  %v2866_v14 = vld [vmem:[#allocation2 + $0x38] sm:$0x1]  ;;  %v2041_v15 = vcombine.high %v1803_v3, %v1803_v3  ;;  %v2048_v16 = vrot.slane %v1803_v3, %v7172_v38  ;;  %v2092_v17 = vcombine.high %v1806_v5, %v1806_v5  ;;  %v7331_v19 = vpop.f32.mrb[23].mxu0 }
 0x13f   : > { %v2099_v18 = vrot.slane %v1806_v5, %v7172_v38  ;;  %v2867_v21 = vsel %vm7205_vm5, 0, %v2866_v14  ;;  %v6052_v22 = vpack.c.bf16 %v7289_v9, %v2399_v10  ;;  %v2482_v25 = vcombine.low %v2089_v62, %v2091_v11 }
 0x140   : > { %v2863_v20 = vld [vmem:[#allocation2 + $0x2c] sm:$0x1]  ;;  %v2480_v24 = vrot.slane %v7326_v51, %v7172_v38  ;;  %2868 = vst [vmem:[#allocation2 + $0x38] sm:$0x1] %v2867_v21  ;;  %v2055_v27 = vrot.slane %v2041_v15, %v7172_v38  ;;  %v2056_v23 = vcombine.high %v2048_v16, %v2048_v16  ;;  %v2425_v28 = vcombine.low %v2040_v53, %v2048_v16 }
 0x141   : > { %v2864_v26 = vsel %vm7205_vm5, 0, %v2863_v20  ;;  %6105 = vst [vmem:[#allocation2 + $0x30] sm:$0xff] %v6052_v22   ;;  %v2490_v31 = vrot.slane %v2482_v25, %v7172_v38  ;;  %v2106_v32 = vrot.slane %v2092_v17, %v7172_v38  ;;  %v2107_v35 = vcombine.high %v2099_v18, %v2099_v18 }
 0x142   : > { %2865 = vst [vmem:[#allocation2 + $0x2c] sm:$0x1] %v2864_v26  ;;  %v1804_v9 = vmax.f32 %v1781_v7, 0.0  ;;  %v2439_v36 = vrot.slane %v2425_v28, %v7172_v38  ;;  %v2441_v39 = vcombine.low %v2056_v23, %v2055_v27  ;;  %v2057_v40 = vcombine.high %v2055_v27, %v2055_v27 }
 0x143   : > { %v1809_v42 = vmax.f32 %v1786_v12, 0.0  ;;  %v2483_v43 = vcombine.low %v2099_v18, %v2107_v35  ;;  %v2505_v47 = vrot.slane %v2106_v32, %v7172_v38  ;;  %v1784_v46 = vadd.f32 %v7166_v33, %v1754_v0 }
 0x144   : > { %v2058_v48 = vcombine.high %v1804_v9, %v1804_v9  ;;  %v2065_v49 = vrot.slane %v1804_v9, %v7172_v38  ;;  %v2440_v6 = vcombine.low %v2432_v45, %v2439_v36  ;;  %v2449_v50 = vrot.slane %v2441_v39, %v7172_v38 }
 0x145   : > { %v2143_v52 = vcombine.high %v1809_v42, %v1809_v42  ;;  %v2150_v53 = vrot.slane %v1809_v42, %v7172_v38  ;;  %v2497_v54 = vrot.slane %v2483_v43, %v7172_v38  ;;  %v6011_v55 = vpack.c.bf16 %v2505_v47, %v2505_v47 }
 0x146   : > { %v2072_v56 = vrot.slane %v2058_v48, %v7172_v38  ;;  %v2073_v57 = vcombine.high %v2065_v49, %v2065_v49  ;;  %v6006_v58 = vpack.c.bf16 %v2440_v6, %v2440_v6  ;;  %v2442_v41 = vcombine.low %v2057_v40, %v2065_v49 }
 0x147   : > { %v2157_v59 = vrot.slane %v2143_v52, %v7172_v38  ;;  %v2158_v60 = vcombine.high %v2150_v53, %v2150_v53  ;;  %v2498_v61 = vcombine.low %v2490_v31, %v2497_v54  ;;  %2809 = vst [vmem:[#allocation2 + $0x50] sm:$0x1] %v6011_v55  ;;  %v2108_v5 = vcombine.high %v2106_v32, %v2106_v32 }
 0x148   : > { %v2074_v34 = vcombine.high %v2072_v56, %v2072_v56  ;;  %v2464_v45 = vrot.slane %v2073_v57, %v7172_v38  ;;  %v2834_v62 = vld [vmem:[#allocation2 + $0x30] sm:$0x1]  ;;  %2804 = vst [vmem:[#allocation2 + $0x3c] sm:$0xf] %v6006_v58  ;;  %v2456_v63 = vrot.slane %v2442_v41, %v7172_v38  ;;  %v1807_v51 = vmax.f32 %v1784_v46, 0.0 }
 0x149   : > { %v2159_v1 = vcombine.high %v2157_v59, %v2157_v59  ;;  %v2547_v3 = vcombine.low %v2150_v53, %v2158_v60  ;;  %v2835_v7 = vsel %vm7231_vm6, 0, %v2834_v62  ;;  %v1757_v0 = vmul.f32 %v7295_v37, %v7161_v30 }
 0x14a   : > { %v2465_v10 = vcombine.low %v2072_v56, %v2074_v34  ;;  %v6008_v11 = vpack.c.bf16 %v2464_v45, %v2464_v45  ;;  %2836 = vst [vmem:[#allocation2 + $0x30] sm:$0x1] %v2835_v7  ;;  %v2457_v12 = vcombine.low %v2449_v50, %v2456_v63  ;;  %v2109_v16 = vcombine.high %v1807_v51, %v1807_v51 }
 0x14b   : > { %v2548_v13 = vcombine.low %v2157_v59, %v2159_v1  ;;  %v2555_v14 = vrot.slane %v2547_v3, %v7172_v38  ;;  %v2116_v17 = vrot.slane %v1807_v51, %v7172_v38  ;;  %v1755_v18 = vmul.f32 %v7161_v30, %v7299_v44 }
 0x14c   : > { %v2473_v15 = vrot.slane %v2465_v10, %v7172_v38  ;;  %2806 = vst [vmem:[#allocation2 + $0x44] sm:$0x1] %v6008_v11  ;;  %v6007_v20 = vpack.c.bf16 %v2457_v12, %v2457_v12  ;;  %v1787_v22 = vadd.f32 %v7166_v33, %v1757_v0  ;;  %v1760_v25 = vmul.f32 %v7320_v2, %v7161_v30 }
 0x14d   : > { %v2562_v21 = vrot.slane %v2548_v13, %v7172_v38  ;;  %v2123_v37 = vrot.slane %v2109_v16, %v7172_v38  ;;  %v2124_v27 = vcombine.high %v2116_v17, %v2116_v17  ;;  %v2506_v23 = vcombine.low %v2108_v5, %v2116_v17 }
 0x14e   : > { %v2481_v26 = vcombine.low %v2473_v15, %v2480_v24  ;;  %v2872_v28 = vld [vmem:[#allocation2 + $0x50] sm:$0x1]  ;;  %2805 = vst [vmem:[#allocation2 + $0x40] sm:$0xf] %v6007_v20  ;;  %v1810_v32 = vmax.f32 %v1787_v22, 0.0  ;;  %v1785_v44 = vadd.f32 %v7166_v33, %v1755_v18  ;;  %v1790_v35 = vadd.f32 %v7166_v33, %v1760_v25 }
 0x14f   : > { %v7371_v31 = vcombine.low %v2555_v14, %v2562_v21  ;;  %v2837_v9 = vld [vmem:[#allocation2 + $0x3c] sm:$0x1]  ;;  %v2873_v36 = vsel %vm7205_vm5, 0, %v2872_v28  ;;  %v2507_v2 = vcombine.low %v2124_v27, %v2123_v37  ;;  %v2514_v24 = vrot.slane %v2506_v23, %v7172_v38 }
 0x150   : > { %v6057_v39 = vpack.c.bf16 %v2498_v61, %v2481_v26  ;;  %v2838_v40 = vsel %vm7231_vm6, 0, %v2837_v9  ;;  %2874 = vst [vmem:[#allocation2 + $0x50] sm:$0x1] %v2873_v36  ;;  %v2160_v42 = vcombine.high %v1810_v32, %v1810_v32  ;;  %v2167_v43 = vrot.slane %v1810_v32, %v7172_v38 }
 0x151   : > { %v1808_v47 = vmax.f32 %v1785_v44, 0.0  ;;  %2839 = vst [vmem:[#allocation2 + $0x3c] sm:$0x1] %v2838_v40  ;;  %v2521_v48 = vrot.slane %v2507_v2, %v7172_v38  ;;  %v2125_v49 = vcombine.high %v2123_v37, %v2123_v37  ;;  %v1813_v6 = vmax.f32 %v1790_v35, 0.0 }
 0x152   : > { %6106 = vst [vmem:[#allocation2 + $0x48] sm:$0xff] %v6057_v39   ;;  %v1758_v50 = vmul.f32 %v7161_v30, %v7324_v8  ;;  %v2174_v53 = vrot.slane %v2160_v42, %v7172_v38  ;;  %v2175_v54 = vcombine.high %v2167_v43, %v2167_v43  ;;  %v1759_v16 = vmul.f32 %v7161_v30, %v7331_v19 }
 0x153   : > { %v2869_v52 = vld [vmem:[#allocation2 + $0x44] sm:$0x1]  ;;  %v2126_v55 = vcombine.high %v1808_v47, %v1808_v47  ;;  %v2133_v56 = vrot.slane %v1808_v47, %v7172_v38  ;;  %v2522_v58 = vcombine.low %v2514_v24, %v2521_v48  ;;  %v7389_v41 = vrot.slane %v1813_v6, %v7172_v38 }
 0x154   : > { %v2870_v57 = vsel %vm7205_vm5, 0, %v2869_v52  ;;  %v1788_v59 = vadd.f32 %v7166_v33, %v1758_v50  ;;  %v2176_v60 = vcombine.high %v2174_v53, %v2174_v53  ;;  %v2564_v61 = vcombine.low %v2167_v43, %v2175_v54 }
 0x155   : > { %2871 = vst [vmem:[#allocation2 + $0x44] sm:$0x1] %v2870_v57  ;;  %v2140_v8 = vrot.slane %v2126_v55, %v7172_v38  ;;  %v2141_v34 = vcombine.high %v2133_v56, %v2133_v56  ;;  %v6012_v45 = vpack.c.bf16 %v2522_v58, %v2522_v58  ;;  %v2523_v46 = vcombine.low %v2125_v49, %v2133_v56 }
 0x156   : > { %v2218_v62 = vcombine.high %v7389_v41, %v7389_v41  ;;  %v1811_v63 = vmax.f32 %v1788_v59, 0.0  ;;  %v2565_v1 = vcombine.low %v2174_v53, %v2176_v60  ;;  %v2572_v3 = vrot.slane %v2564_v61, %v7172_v38 }
 0x157   : > { %v2142_v5 = vcombine.high %v2140_v8, %v2140_v8  ;;  %v2524_v7 = vcombine.low %v2141_v34, %v2140_v8  ;;  %2810 = vst [vmem:[#allocation2 + $0x54] sm:$0xf] %v6012_v45  ;;  %v2531_v10 = vrot.slane %v2523_v46, %v7172_v38  ;;  %v1789_v27 = vadd.f32 %v7166_v33, %v1759_v16 }
 0x158   : > { %v2628_v11 = vrot.slane %v2218_v62, %v7172_v38  ;;  %v2177_v51 = vcombine.high %v1811_v63, %v1811_v63  ;;  %v2184_v12 = vrot.slane %v1811_v63, %v7172_v38  ;;  %v2579_v14 = vrot.slane %v2565_v1, %v7172_v38 }
 0x159   : > { %v2840_v13 = vld [vmem:[#allocation2 + $0x48] sm:$0x1]  ;;  %v2538_v0 = vrot.slane %v2524_v7, %v7172_v38  ;;  %v2546_v15 = vrot.slane %v2142_v5, %v7172_v38  ;;  %v1812_v19 = vmax.f32 %v1789_v27, 0.0 }
 0x15a   : > { %v2841_v17 = vsel %vm7231_vm6, 0, %v2840_v13  ;;  %v6020_v18 = vpack.c.bf16 %v2628_v11, %v2628_v11  ;;  %v2191_v20 = vrot.slane %v2177_v51, %v7172_v38  ;;  %v2192_v21 = vcombine.high %v2184_v12, %v2184_v12 }
 0x15b   : > { %2842 = vst [vmem:[#allocation2 + $0x48] sm:$0x1] %v2841_v17  ;;  %v2580_v22 = vcombine.low %v2572_v3, %v2579_v14  ;;  %v2539_v25 = vcombine.low %v2531_v10, %v2538_v0  ;;  %v6014_v26 = vpack.c.bf16 %v2546_v15, %v2546_v15  ;;  %v2587_v37 = vrot.slane %v2184_v12, %v7172_v38 }
 0x15c   : > { %2818 = vst [vmem:[#allocation2 + $0x74] sm:$0x1] %v6020_v18  ;;  %v2193_v32 = vcombine.high %v2191_v20, %v2191_v20  ;;  %v2588_v35 = vcombine.low %v2192_v21, %v2191_v20  ;;  %v2194_v36 = vcombine.high %v1812_v19, %v1812_v19  ;;  %v2201_v39 = vrot.slane %v1812_v19, %v7172_v38 }
 0x15d   : > { %v6062_v23 = vpack.c.bf16 %v2580_v22, %v7371_v31  ;;  %v6013_v28 = vpack.c.bf16 %v2539_v25, %v2539_v25  ;;  %2812 = vst [vmem:[#allocation2 + $0x5c] sm:$0x1] %v6014_v26  ;;  %v6017_v30 = vpack.c.bf16 %v2587_v37, %v2587_v37 }
 0x15e   : > { %v2843_v44 = vld [vmem:[#allocation2 + $0x54] sm:$0x1]  ;;  %v2208_v33 = vrot.slane %v2194_v36, %v7172_v38  ;;  %v2209_v31 = vcombine.high %v2201_v39, %v2201_v39  ;;  %v2589_v2 = vcombine.low %v2193_v32, %v2201_v39  ;;  %v2596_v40 = vrot.slane %v2588_v35, %v7172_v38 }
 0x15f   : > { %6107 = vst [vmem:[#allocation2 + $0x60] sm:$0xff] %v6062_v23   ;;  %2811 = vst [vmem:[#allocation2 + $0x58] sm:$0xf] %v6013_v28  ;;  %v2844_v9 = vsel %vm7231_vm6, 0, %v2843_v44 }
 0x160   : > { %2815 = vst [vmem:[#allocation2 + $0x68] sm:$0x1] %v6017_v30  ;;  %2845 = vst [vmem:[#allocation2 + $0x54] sm:$0x1] %v2844_v9  ;;  %v2210_v47 = vcombine.high %v2208_v33, %v2208_v33  ;;  %v2603_v48 = vrot.slane %v2589_v2, %v7172_v38  ;;  %v2605_v49 = vcombine.low %v2209_v31, %v2208_v33 }
 0x162   : > { %v2604_v53 = vcombine.low %v2596_v40, %v2603_v48  ;;  %v2606_v54 = vcombine.low %v2210_v47, %v7389_v41  ;;  %v2613_v57 = vrot.slane %v2605_v49, %v7172_v38 }
 0x163   : > { %v2881_v24 = vld [vmem:[#allocation2 + $0x74] sm:$0x1] }
 0x164   : > { %v2875_v42 = vld [vmem:[#allocation2 + $0x5c] sm:$0x1]  ;;  %v2882_v43 = vsel %vm7205_vm5, 0, %v2881_v24  ;;  %v2620_v58 = vrot.slane %v2606_v54, %v7172_v38  ;;  %v6018_v59 = vpack.c.bf16 %v2604_v53, %v2604_v53 }
 0x165   : > { %v2876_v6 = vsel %vm7205_vm5, 0, %v2875_v42  ;;  %2883 = vst [vmem:[#allocation2 + $0x74] sm:$0x1] %v2882_v43 }
 0x166   : > { %v2846_v50 = vld [vmem:[#allocation2 + $0x60] sm:$0x1]  ;;  %2877 = vst [vmem:[#allocation2 + $0x5c] sm:$0x1] %v2876_v6  ;;  %v2621_v60 = vcombine.low %v2613_v57, %v2620_v58  ;;  %2816 = vst [vmem:[#allocation2 + $0x6c] sm:$0xf] %v6018_v59 }
 0x167   : > { %v2878_v52 = vld [vmem:[#allocation2 + $0x68] sm:$0x1]  ;;  %v2847_v55 = vsel %vm7231_vm6, 0, %v2846_v50 }
 0x168   : > { %v2879_v56 = vsel %vm7205_vm5, 0, %v2878_v52  ;;  %2848 = vst [vmem:[#allocation2 + $0x60] sm:$0x1] %v2847_v55  ;;  %v6019_v61 = vpack.c.bf16 %v2621_v60, %v2621_v60 }
 0x169   : > { %2880 = vst [vmem:[#allocation2 + $0x68] sm:$0x1] %v2879_v56  ;;  %2887 = sbr.rel (%p5699_p0) target bundleno = 368 (0x170), region = 52 }
 0x16a   : > { %2817 = vst [vmem:[#allocation2 + $0x70] sm:$0xf] %v6019_v61 }
 0x16d   : > { %v2849_v8 = vld [vmem:[#allocation2 + $0x6c] sm:$0x1] }
 0x16e   : > { %v2850_v41 = vsel %vm7231_vm6, 0, %v2849_v8 }
 0x16f   : > { %2851 = vst [vmem:[#allocation2 + $0x6c] sm:$0x1] %v2850_v41 }
 0x170 PF: > { %s8418_s23 = sshll.u32 %s6833_s27, 3 }
 0x171   : > { %s2891_s9 = ssub.s32 17, %s8418_s23 }
 0x172   : > { %p5700_p1 = scmp.gt.s32.totalorder %s2891_s9, 9 }
 0x173   : > { %s6021_s10 = smul.u32 (!%p5700_p1), 12, %s2891_s9  ;;  %v6854_v38 = vmov (!%p5700_p1), 0  }
 0x174   : > { %2895 = sbr.rel (%p5700_p1) target bundleno = 379 (0x17b), region = 56 }
 0x175   : > { %s2898_s13 = scalar_lea.vmem (!%p5700_p1), [#allocation2], %s6021_s10 }
 0x176   : > { %2899 = vst [vmem:[%s2898_s13] sm:$0xf] (!%p5700_p1), %v6854_v38  ;;  %2900 = vst [vmem:[%s2898_s13 + $0x4] sm:$0xf] (!%p5700_p1), %v6854_v38 }
 0x177   : > { %2901 = vst [vmem:[%s2898_s13 + $0x8] sm:$0x1] (!%p5700_p1), %v6854_v38 }
 0x17b PF: > { %v6659_v4 = vld [vmem:[%s8403_s2 + $0x80] sm:$0xff]   ;;  %v6662_v46 = vld [vmem:[%s8403_s2 + $0x88] sm:$0xff]   ;;  %v6665_v1 = vld [vmem:[%s8403_s2 + $0x90] sm:$0xff]   ;;  %vm3257_vm7 = vcmask 1042432   ;;  %vm3258_vm8 = vcmask 1046532   ;;  %s6038_s10 = sshll.u32 %s6833_s27, 4 }
 0x17c   : > { %v6660_v34 = vld [vmem:[%s8403_s2 + $0x40] sm:$0xff]   ;;  %6400 = vmatprep.subr.bf16.mxu1 %v6659_v4  ;;  %v6663_v62 = vld [vmem:[%s8403_s2 + $0x48] sm:$0xff]   ;;  %v6666_v3 = vld [vmem:[%s8403_s2 + $0x50] sm:$0xff]   ;;  %vm2926_vm10 = vsmask.f32 3328  ;;  %s5987_s13 = sshll.u32 %s6837_s28, 5 }
 0x17d   : > { %v6661_v45 = vld [vmem:[%s8403_s2] sm:$0xff]   ;;  %6146 = vmatprep.subr.bf16.mxu0 %v6660_v34  ;;  %6401 = vmatpush3.bf16.msra.mxu1 %v6659_v4  ;;  %v6664_v63 = vld [vmem:[%s8403_s2 + $0x8] sm:$0xff]   ;;  %v6667_v5 = vld [vmem:[%s8403_s2 + $0x10] sm:$0xff]   ;;  %vm2927_vm11 = vsmask.f32 7440  ;;  %s5514_s27 = sadd.s32 %s6038_s10, %s5987_s13  ;;  %s5517_s28 = sshll.u32 %s7430_s18, 4  ;;  %s8338_s28 = int_to_ptr.vmem [resolvable:$true] %s5517_s28 }
 0x17e   : > { %6147 = vmatpush3.bf16.msra.mxu0 %v6661_v45  ;;  %6402 = vmatprep.subr.bf16.mxu1 %v6662_v46  ;;  %v6668_v7 = vld [vmem:[%s8403_s2 + $0x98] sm:$0xff]   ;;  %v6671_v51 = vld [vmem:[%s8403_s2 + $0xa0] sm:$0xff]   ;;  %v6674_v14 = vld [vmem:[%s8403_s2 + $0xa8] sm:$0xff]   ;;  %s5988_s22 = sshll.u32 %s5514_s27, 6  ;;  %s8423_s21 = sand.u32 1, %s6825_s25  }
 0x17f   : > { %6148 = vmatprep.subr.bf16.mxu0 %v6663_v62  ;;  %v6669_v10 = vld [vmem:[%s8403_s2 + $0x58] sm:$0xff]   ;;  %v6672_v12 = vld [vmem:[%s8403_s2 + $0x60] sm:$0xff]   ;;  %v6675_v0 = vld [vmem:[%s8403_s2 + $0x68] sm:$0xff]   ;;  %s8343_s20 = scalar_lea.hbm %s8408_s7, %s5988_s22  ;;  %s8349_s16 = scalar_lea.sflag [#allocation4], %s8423_s21 }
 0x180   : > { %v6670_v11 = vld [vmem:[%s8403_s2 + $0x18] sm:$0xff]   ;;  %v6673_v13 = vld [vmem:[%s8403_s2 + $0x20] sm:$0xff]   ;;  %v6676_v15 = vld [vmem:[%s8403_s2 + $0x28] sm:$0xff]   ;;  %s6755_s23 = scalar_lea.vmem %s8338_s28, 1024  ;;  %s6855_s9 = smov [#allocation3]  }
 0x181   : > { %6403 = vmatpush3.bf16.msra.mxu1 %v6662_v46  ;;  %v6677_v16 = vld [vmem:[%s8403_s2 + $0xb0] sm:$0xff]   ;;  %v6680_v20 = vld [vmem:[%s8403_s2 + $0xb8] sm:$0xff]   ;;  %v7504_v22 = vld [vmem:[#allocation2 + $0x4] sm:$0xf]  ;;  %p6756_p2 = scmp.ne.s32.totalorder %s8338_s28, %s6755_s23  ;;  %s6759_s10 = sshll.u32 %s6855_s9, 4  ;;  %s6760_s10 = int_to_ptr.vmem [resolvable:$false] %s6759_s10 }
 0x182   : > { %6149 = vmatpush3.bf16.msra.mxu0 %v6664_v63  ;;  %6404 = vmatprep.subr.bf16.mxu1 %v6665_v1  ;;  %v6678_v17 = vld [vmem:[%s8403_s2 + $0x70] sm:$0xff]   ;;  %v6681_v21 = vld [vmem:[%s8403_s2 + $0x78] sm:$0xff]   ;;  %v2918_v25 = vld [vmem:[#allocation2 + $0x8] sm:$0x1]  ;;  %v3262_v23 = vrot.slane %v7504_v22, 5  ;;  %v2939_v19 = vshll.u32 %v7504_v22, 16  ;;  %p6762_p6 = scmp.lt.s32.totalorder %s8338_s28, %s6760_s10 }
 0x183   : > { %6150 = vmatprep.subr.bf16.mxu0 %v6666_v3  ;;  %v6679_v18 = vld [vmem:[%s8403_s2 + $0x30] sm:$0xff]   ;;  %v3233_v26 = vld [vmem:[#allocation2] sm:$0xe]  ;;  %vm7506_vm9 = vmor %vm3257_vm7, %vm3258_vm8  ;;  %v3265_v28 = vrot.slane %v2918_v25, 5  ;;  %v2943_v33 = vshrl.u32 %v7504_v22, 16  ;;  %v2949_v42 = vshll.u32 %v2918_v25, 16  ;;  %p6757_p4 = pnand %p6756_p2, %p6949_p3 }
 0x184   : > { %v5718_v27 = vrot.slane %v3233_v26, 9  ;;  %v7511_v30 = vld [vmem:[#allocation2] sm:$0xf]  ;;  %v6682_v32 = vld [vmem:[%s8403_s2 + $0x38] sm:$0xff]   ;;  %v3264_v36 = vrot.slane %v3262_v23, 4  ;;  %v2941_v39 = vrot.slane %v2939_v19, 5  ;;  %vm7532_vm12 = vmor %vm2926_vm10, %vm2927_vm11 }
 0x185   : > { %6405 = vmatpush3.bf16.msra.mxu1 %v6665_v1  ;;  %v2930_v44 = vshrl.u32 %v7511_v30, 16  ;;  %v2933_v35 = vshll.u32 %v7511_v30, 16  ;;  %v7522_v31 = vld [vmem:[#allocation2 + $0x10] sm:$0xf]  ;;  %v6684_v2 = vld [vmem:[%s8403_s2 + $0x100] sm:$0xff]   ;;  %v2945_v49 = vrot.slane %v2943_v33, 4  ;;  %v5702_v29 = vcombine.low %v7511_v30, %v7504_v22  ;;  %p6758_p5 = pneg %p6757_p4 }
 0x186   : > { %6151 = vmatpush3.bf16.msra.mxu0 %v6667_v5  ;;  %6406 = vmatprep.subr.bf16.mxu1 %v6668_v7  ;;  %v3263_v9 = vsel %vm7506_vm9, %v5718_v27, %v3262_v23  ;;  %v2919_v43 = vld [vmem:[#allocation2 + $0x14] sm:$0x1]  ;;  %v3269_v47 = vrot.slane %v7522_v31, 5  ;;  %v3266_v48 = vsel %vm7506_vm9, %v3264_v36, %v3265_v28  ;;  %v3234_v6 = vld [vmem:[#allocation2 + $0xc] sm:$0xe]  ;;  %v2951_v57 = vrot.slane %v2949_v42, 5 }
 0x187   : > { %6152 = vmatprep.subr.bf16.mxu0 %v6669_v10  ;;  %v2932_v24 = vrot.slane %v2930_v44, 4  ;;  %v2935_v40 = vrot.slane %v2933_v35, 5  ;;  %v3272_v50 = vrot.slane %v2919_v43, 5  ;;  %v5726_v52 = vcombine.low %v3263_v9, %v3266_v48  ;;  %v6685_v61 = vld [vmem:[%s8403_s2 + $0xc0] sm:$0xff]   ;;  %v6686_v38 = vld [vmem:[%s8403_s2 + $0x108] sm:$0xff]   ;;  %v6689_v28 = vld [vmem:[%s8403_s2 + $0x110] sm:$0xff]  }
 0x188   : > { %v5719_v54 = vrot.slane %v3234_v6, 9  ;;  %v2946_v56 = vor.u32 %v2945_v49, %v2941_v39  ;;  %v3271_v58 = vrot.slane %v3269_v47, 4  ;;  %v7548_v4 = vld [vmem:[#allocation2 + $0x1c] sm:$0xf]  ;;  %v7552_v46 = vld [vmem:[#allocation2 + $0x20] sm:$0x1] }
 0x189   : > { %6407 = vmatpush3.bf16.msra.mxu1 %v6668_v7  ;;  %v2936_v53 = vor.u32 %v2935_v40, %v2932_v24  ;;  %6416 = vmatprep.mubr.bf16.mxu1 %v5726_v52  ;;  %v3235_v62 = vld [vmem:[#allocation2 + $0x18] sm:$0xe]  ;;  %v3276_v63 = vrot.slane %v7548_v4, 5  ;;  %v2963_v1 = vshll.u32 %v7522_v31, 16  ;;  %v3279_v7 = vrot.slane %v7552_v46, 5  ;;  %s6761_s13 = scalar_lea.vmem %s6760_s10, 2048 }
 0x18a   : > { %6153 = vmatpush3.bf16.msra.mxu0 %v6670_v11  ;;  %6408 = vmatprep.subr.bf16.mxu1 %v6671_v51  ;;  %v3270_v60 = vsel %vm7506_vm9, %v5719_v54, %v3269_v47  ;;  %v2947_v8 = vrot.slane %v2946_v56, 4  ;;  %v3273_v41 = vsel %vm7506_vm9, %v3271_v58, %v3272_v50  ;;  %v5720_v5 = vrot.slane %v3235_v62, 9  ;;  %v7559_v10 = vld [vmem:[#allocation2 + $0xc] sm:$0xf]  ;;  %v3236_v27 = vld [vmem:[#allocation2 + $0x24] sm:$0xe]  ;;  %p6763_p7 = scmp.lt.s32.totalorder %s6761_s13, %s6755_s23 }
 0x18b   : > { %6154 = vmatprep.subr.bf16.mxu0 %v6672_v12  ;;  %v2937_v59 = vrot.slane %v2936_v53, 4  ;;  %v5727_v45 = vcombine.low %v3270_v60, %v3273_v41  ;;  %v2967_v11 = vshrl.u32 %v7522_v31, 16  ;;  %v3278_v12 = vrot.slane %v3276_v63, 4  ;;  %v6691_v24 = vld [vmem:[%s8403_s2 + $0x118] sm:$0xff]   ;;  %v7596_v50 = vld [vmem:[#allocation2 + $0x34] sm:$0xf] }
 0x18c   : > { %v2952_v3 = vsel %vm7532_vm12, %v2947_v8, %v2951_v57  ;;  %v5721_v44 = vrot.slane %v3236_v27, 9  ;;  %v2987_v40 = vshll.u32 %v7548_v4, 16  ;;  %v2991_v47 = vshrl.u32 %v7548_v4, 16  ;;  %v7598_v52 = vld [vmem:[#allocation2 + $0x38] sm:$0x1]  ;;  %p6764_p9 = por %p6763_p7, %p6762_p6 }
 0x18d   : > { %6409 = vmatpush3.bf16.msra.mxu1 %v6671_v51  ;;  %v2942_v34 = vsel %vm7532_vm12, %v2937_v59, %v2941_v39  ;;  %v3280_v22 = vsel %vm7506_vm9, %v3278_v12, %v3279_v7  ;;  %v6690_v39 = vld [vmem:[%s8403_s2 + $0xd0] sm:$0xff]   ;;  %v5703_v6 = vcombine.low %v7559_v10, %v7522_v31  ;;  %v3290_v57 = vrot.slane %v7596_v50, 5  ;;  %v7604_v59 = vld [vmem:[#allocation2 + $0x18] sm:$0xf]  ;;  %v3238_v7 = vld [vmem:[#allocation2 + $0x3c] sm:$0xe] }
 0x18e   : > { %6155 = vmatpush3.bf16.msra.mxu0 %v6673_v13  ;;  %6410 = vmatprep.subr.bf16.mxu1 %v6674_v14  ;;  %v5710_v51 = vcombine.low %v2942_v34, %v2952_v3  ;;  %v2954_v13 = vshrl.u32 %v7559_v10, 16  ;;  %v3237_v53 = vld [vmem:[#allocation2 + $0x30] sm:$0xe]  ;;  %v3293_v58 = vrot.slane %v7598_v52, 5  ;;  %v6692_v31 = vld [vmem:[%s8403_s2 + $0xd8] sm:$0xff]   ;;  %v2981_v8 = vshll.u32 %v7604_v59, 16  ;;  %p6765_p10 = pnand %p6764_p9, %p6758_p5 }
 0x18f   : > { %6156 = vmatprep.subr.bf16.mxu0 %v6675_v0  ;;  %v7564_v0 = vld [vmem:[#allocation2 + $0x28] sm:$0xf]  ;;  %v5722_v56 = vrot.slane %v3237_v53, 9  ;;  %v2989_v41 = vrot.slane %v2987_v40, 5  ;;  %v3292_v34 = vrot.slane %v3290_v57, 4  ;;  %v2997_v62 = vshll.u32 %v7552_v46, 16 }
 0x190   : > { %3637 = vmatprep.mubr.bf16.mxu0 %v5710_v51  ;;  %v2956_v25 = vrot.slane %v2954_v13, 4  ;;  %v3283_v23 = vrot.slane %v7564_v0, 5  ;;  %v5723_v13 = vrot.slane %v3238_v7, 9  ;;  %v6701_v7 = vld [vmem:[%s8403_s2 + $0x138] sm:$0xff]  }
 0x191   : > { %6411 = vmatpush3.bf16.msra.mxu1 %v6674_v14  ;;  %v2957_v14 = vshll.u32 %v7559_v10, 16  ;;  %v3294_v51 = vsel %vm7506_vm9, %v3292_v34, %v3293_v58  ;;  %v2999_v12 = vrot.slane %v2997_v62, 5  ;;  %v6700_v62 = vld [vmem:[%s8403_s2 + $0xf0] sm:$0xff]  }
 0x192   : > { %6157 = vmatpush3.bf16.msra.mxu0 %v6676_v15  ;;  %6412 = vmatprep.subr.bf16.mxu1 %v6677_v16  ;;  %v6687_v15 = vld [vmem:[%s8403_s2 + $0xc8] sm:$0xff]   ;;  %v3285_v9 = vrot.slane %v3283_v23, 4 }
 0x193   : > { %6158 = vmatprep.subr.bf16.mxu0 %v6678_v17  ;;  %v2965_v17 = vrot.slane %v2963_v1, 5  ;;  %v2959_v26 = vrot.slane %v2957_v14, 5  ;;  %v6694_v1 = vld [vmem:[%s8403_s2 + $0x120] sm:$0xff]  }
 0x195   : > { %6413 = vmatpush3.bf16.msra.mxu1 %v6677_v16  ;;  %v3277_v16 = vsel %vm7506_vm9, %v5720_v5, %v3276_v63  ;;  %v2960_v35 = vor.u32 %v2959_v26, %v2956_v25  ;;  %v7616_v63 = vld [vmem:[#allocation2 + $0x44] sm:$0x1]  ;;  %v2983_v5 = vrot.slane %v2981_v8, 5  ;;  %v3011_v25 = vshll.u32 %v7564_v0, 16 }
 0x196   : > { %6159 = vmatpush3.bf16.msra.mxu0 %v6679_v18  ;;  %6414 = vmatprep.subr.bf16.mxu1 %v6680_v20  ;;  %v2969_v18 = vrot.slane %v2967_v11, 4  ;;  %v5728_v30 = vcombine.low %v3277_v16, %v3280_v22  ;;  %v3300_v11 = vrot.slane %v7616_v63, 5  ;;  %v6696_v22 = vld [vmem:[%s8403_s2 + $0x128] sm:$0xff]  }
 0x197   : > { %6160 = vmatprep.subr.bf16.mxu0 %v6681_v21  ;;  %v7571_v21 = vld [vmem:[#allocation2 + $0x2c] sm:$0x1]  ;;  %v2961_v42 = vrot.slane %v2960_v35, 4  ;;  %v3239_v35 = vld [vmem:[#allocation2 + $0x48] sm:$0xe] }
 0x198   : > { %v2970_v19 = vor.u32 %v2969_v18, %v2965_v17  ;;  %v3286_v36 = vrot.slane %v7571_v21, 5  ;;  %v3021_v53 = vshll.u32 %v7571_v21, 16 }
 0x199   : > { %6415 = vmatpush3.bf16.msra.mxu1 %v6680_v20  ;;  %v2973_v20 = vshll.u32 %v2919_v43, 16  ;;  %v2966_v54 = vsel %vm7532_vm12, %v2961_v42, %v2965_v17  ;;  %v6695_v17 = vld [vmem:[%s8403_s2 + $0xe0] sm:$0xff]  }
 0x19a   : > { %6161 = vmatpush3.bf16.msra.mxu0 %v6682_v32  ;;  %6210 = vmatprep.subr.bf16.mxu1 %v6684_v2  ;;  %v2971_v33 = vrot.slane %v2970_v19, 4  ;;  %v3284_v2 = vsel %vm7506_vm9, %v5721_v44, %v3283_v23  ;;  %v3287_v43 = vsel %vm7506_vm9, %v3285_v9, %v3286_v36  ;;  %v3015_v23 = vshrl.u32 %v7564_v0, 16  ;;  %v7643_v44 = vld [vmem:[#allocation2 + $0x50] sm:$0x1] }
 0x19b   : > { %v2975_v32 = vrot.slane %v2973_v20, 5  ;;  %v5729_v49 = vcombine.low %v3284_v2, %v3287_v43  ;;  %v5704_v19 = vcombine.low %v7604_v59, %v7548_v4  ;;  %v5724_v36 = vrot.slane %v3239_v35, 9  ;;  %v7649_v2 = vld [vmem:[#allocation2 + $0x24] sm:$0xf]  ;;  %v6697_v4 = vld [vmem:[%s8403_s2 + $0xe8] sm:$0xff]  }
 0x19c   : > { %6417 = vmatmul.mubr.bf16.vlgmr.msra.gmra.mrb[0].mxu1 %v5727_v45  ;;  %v2993_v45 = vrot.slane %v2991_v47, 4  ;;  %v3002_v40 = vshrl.u32 %v7649_v2, 16  ;;  %v3005_v42 = vshll.u32 %v7649_v2, 16  ;;  %v3013_v43 = vrot.slane %v3011_v25, 5  ;;  %v7656_v47 = vld [vmem:[#allocation2 + $0x58] sm:$0xf] }
 0x19d   : > { %6211 = vmatpush3.bf16.msra.mxu1 %v6685_v61  ;;  %3638 = vmatmul.mubr.bf16.vlgmr.msra.gmra.mrb[24].mxu0 %v5702_v29  ;;  %v2976_v48 = vsel %vm7532_vm12, %v2971_v33, %v2975_v32  ;;  %v2978_v61 = vshrl.u32 %v7604_v59, 16  ;;  %v7611_v29 = vld [vmem:[#allocation2 + $0x40] sm:$0xf]  ;;  %v7641_v32 = vld [vmem:[#allocation2 + $0x4c] sm:$0xf]  ;;  %v3307_v33 = vrot.slane %v7643_v44, 5 }
 0x19e   : > { %6212 = vmatprep.subr.bf16.mxu1 %v6686_v38  ;;  %6420 = vmatprep.mubr.bf16.mxu1 %v5728_v30  ;;  %v5711_v60 = vcombine.low %v2966_v54, %v2976_v48  ;;  %v3291_v38 = vsel %vm7506_vm9, %v5722_v56, %v3290_v57  ;;  %v3297_v10 = vrot.slane %v7611_v29, 5  ;;  %v2994_v46 = vor.u32 %v2993_v45, %v2989_v41  ;;  %v7661_v54 = vld [vmem:[#allocation2 + $0x5c] sm:$0x1]  ;;  %v6699_v56 = vld [vmem:[%s8403_s2 + $0x130] sm:$0xff]  }
 0x19f   : > { %v2980_v3 = vrot.slane %v2978_v61, 4  ;;  %v5730_v14 = vcombine.low %v3291_v38, %v3294_v51  ;;  %v3004_v57 = vrot.slane %v3002_v40, 4  ;;  %v3007_v58 = vrot.slane %v3005_v42, 5  ;;  %v3240_v59 = vld [vmem:[#allocation2 + $0x54] sm:$0xe]  ;;  %v6704_v51 = vld [vmem:[%s8403_s2 + $0x180] sm:$0xff]  }
 0x1a0   : > { %3645 = vmatprep.mubr.bf16.mxu0 %v5711_v60  ;;  %v3299_v16 = vrot.slane %v3297_v10, 4  ;;  %v2995_v18 = vrot.slane %v2994_v46, 4  ;;  %v3298_v20 = vsel %vm7506_vm9, %v5723_v13, %v3297_v10  ;;  %v3311_v60 = vrot.slane %v7656_v47, 5 }
 0x1a1   : > { %6213 = vmatpush3.bf16.msra.mxu1 %v6687_v15  ;;  %v2984_v15 = vor.u32 %v2983_v5, %v2980_v3  ;;  %v3023_v8 = vrot.slane %v3021_v53, 5  ;;  %v3008_v34 = vor.u32 %v3007_v58, %v3004_v57 }
 0x1a2   : > { %6214 = vmatprep.subr.bf16.mxu1 %v6689_v28  ;;  %v3301_v27 = vsel %vm7506_vm9, %v3299_v16, %v3300_v11  ;;  %v3000_v28 = vsel %vm7532_vm12, %v2995_v18, %v2999_v12  ;;  %v3313_v45 = vrot.slane %v3311_v60, 4  ;;  %v7695_v16 = vld [vmem:[#allocation2 + $0x30] sm:$0xf]  ;;  %v3039_v18 = vshrl.u32 %v7596_v50, 16 }
 0x1a3   : > { %v2985_v26 = vrot.slane %v2984_v15, 4  ;;  %v5731_v30 = vcombine.low %v3298_v20, %v3301_v27  ;;  %v3009_v10 = vrot.slane %v3008_v34, 4  ;;  %v6703_v15 = vld [vmem:[%s8403_s2 + $0xf8] sm:$0xff]   ;;  %v3029_v25 = vshll.u32 %v7695_v16, 16  ;;  %v7707_v27 = vld [vmem:[%s8403_s2 + $0x140] sm:$0xff]  }
 0x1a4   : > { %6421 = vmatmul.mubr.bf16.gmra.mrb[4].mxu1 %v5729_v49 }
 0x1a5   : > { %6215 = vmatpush3.bf16.msra.mxu1 %v6690_v39  ;;  %3646 = vmatmul.mubr.bf16.gmra.mrb[28].mxu0 %v5703_v6  ;;  %v2990_v9 = vsel %vm7532_vm12, %v2985_v26, %v2989_v41  ;;  %v3304_v39 = vrot.slane %v7641_v32, 5  ;;  %v3017_v6 = vrot.slane %v3015_v23, 4  ;;  %v5725_v41 = vrot.slane %v3240_v59, 9 }
 0x1a6   : > { %6216 = vmatprep.subr.bf16.mxu1 %v6691_v24  ;;  %6424 = vmatprep.mubr.bf16.mxu1 %v5730_v14  ;;  %v5712_v24 = vcombine.low %v2990_v9, %v3000_v28  ;;  %v3014_v13 = vsel %vm7532_vm12, %v3009_v10, %v3013_v43  ;;  %v5705_v14 = vcombine.low %v7649_v2, %v7564_v0  ;;  %v3045_v26 = vshll.u32 %v7598_v52, 16  ;;  %v7702_v0 = vld [vmem:[#allocation2 + $0xc] sm:$0xf] }
 0x1a7   : > { %v3305_v48 = vsel %vm7506_vm9, %v5724_v36, %v3304_v39  ;;  %v3306_v49 = vrot.slane %v3304_v39, 4  ;;  %v3018_v21 = vor.u32 %v3017_v6, %v3013_v43  ;;  %v3312_v5 = vsel %vm7506_vm9, %v5725_v41, %v3311_v60  ;;  %v6709_v60 = vld [vmem:[%s8403_s2 + $0x188] sm:$0xff]  }
 0x1a8   : > { %3653 = vmatprep.mubr.bf16.mxu0 %v5712_v24  ;;  %v3041_v28 = vrot.slane %v3039_v18, 4  ;;  %v3031_v9 = vrot.slane %v3029_v25, 5  ;;  %v3047_v36 = vrot.slane %v3045_v26, 5  ;;  %v3728_v52 = vshrl.u32 %v7702_v0, 16  ;;  %v6712_v25 = vld [vmem:[%s8403_s2 + $0x148] sm:$0xff]  }
 0x1a9   : > { %6217 = vmatpush3.bf16.msra.mxu1 %v6692_v31  ;;  %v3314_v31 = vrot.slane %v7661_v54, 5  ;;  %v3308_v61 = vsel %vm7506_vm9, %v3306_v49, %v3307_v33  ;;  %v3019_v3 = vrot.slane %v3018_v21, 4  ;;  %v3731_v33 = vshll.u32 %v7702_v0, 16 }
 0x1aa   : > { %6218 = vmatprep.subr.bf16.mxu1 %v6694_v1  ;;  %v5732_v38 = vcombine.low %v3305_v48, %v3308_v61  ;;  %v6702_v1 = vld [vmem:[%s8403_s2 + $0x1c0] sm:$0xff]   ;;  %v3730_v42 = vrot.slane %v3728_v52, 4  ;;  %v5706_v48 = vcombine.low %v7695_v16, %v7596_v50  ;;  %v3063_v41 = vshrl.u32 %v7611_v29, 16 }
 0x1ab   : > { %v3315_v11 = vsel %vm7506_vm9, %v3313_v45, %v3314_v31  ;;  %v3024_v46 = vsel %vm7532_vm12, %v3019_v3, %v3023_v8  ;;  %6290 = vmatprep.subr.bf16.mxu0 %v6702_v1  ;;  %v3733_v6 = vrot.slane %v3731_v33, 5  ;;  %v3059_v31 = vshll.u32 %v7611_v29, 16  ;;  %v7732_v8 = vld [vmem:[#allocation2 + $0x3c] sm:$0xf] }
 0x1ac   : > { %6425 = vmatmul.mubr.bf16.gmra.mrb[8].mxu1 %v5731_v30  ;;  %v5733_v12 = vcombine.low %v3312_v5, %v3315_v11  ;;  %6291 = vmatpush3.bf16.msra.mxu0 %v6704_v51  ;;  %v5713_v20 = vcombine.low %v3014_v13, %v3024_v46  ;;  %v7709_v30 = vld [vmem:[#allocation2 + $0x10] sm:$0xf]  ;;  %v3050_v45 = vshrl.u32 %v7732_v8, 16  ;;  %v7741_v3 = vld [vmem:[#allocation2 + $0x1c] sm:$0xf]  ;;  %v3065_v51 = vrot.slane %v3063_v41, 4 }
 0x1ad   : > { %6219 = vmatpush3.bf16.msra.mxu1 %v6695_v17  ;;  %3654 = vmatmul.mubr.bf16.gmra.mrb[32].mxu0 %v5704_v19  ;;  %v3035_v17 = vshll.u32 %v7596_v50, 16  ;;  %v7711_v19 = vld [vmem:[#allocation2 + $0x14] sm:$0x1]  ;;  %v3737_v2 = vshll.u32 %v7709_v30, 16  ;;  %v3741_v24 = vshrl.u32 %v7709_v30, 16  ;;  %v5758_v59 = vcombine.low %v7702_v0, %v7709_v30 }
 0x1ae   : > { %6220 = vmatprep.subr.bf16.mxu1 %v6696_v22  ;;  %6428 = vmatprep.mubr.bf16.mxu1 %v5732_v38  ;;  %v3026_v22 = vshrl.u32 %v7695_v16, 16  ;;  %v3747_v43 = vshll.u32 %v7711_v19, 16  ;;  %v3734_v61 = vor.u32 %v3733_v6, %v3730_v42  ;;  %v7735_v38 = vld [vmem:[#allocation2 + $0x18] sm:$0xf]  ;;  %v3061_v1 = vrot.slane %v3059_v31, 5  ;;  %v6713_v5 = vld [vmem:[%s8403_s2 + $0x1d0] sm:$0xff]  }
 0x1af   : > { %v3037_v23 = vrot.slane %v3035_v17, 5  ;;  %3661 = vmatprep.mubr.bf16.mxu0 %v5713_v20  ;;  %v3739_v53 = vrot.slane %v3737_v2, 5  ;;  %v7746_v46 = vld [vmem:[#allocation2 + $0x20] sm:$0x1]  ;;  %v3052_v13 = vrot.slane %v3050_v45, 4  ;;  %v3752_v16 = vshrl.u32 %v7735_v38, 16 }
 0x1b0   : > { %v3028_v35 = vrot.slane %v3026_v22, 4  ;;  %v3749_v58 = vrot.slane %v3747_v43, 5  ;;  %v3735_v10 = vrot.slane %v3734_v61, 4  ;;  %v3066_v20 = vor.u32 %v3065_v51, %v3061_v1  ;;  %v7784_v31 = vld [vmem:[#allocation2 + $0x24] sm:$0xf] }
 0x1b1   : > { %6221 = vmatpush3.bf16.msra.mxu1 %v6697_v4  ;;  %v3042_v39 = vor.u32 %v3041_v28, %v3037_v23  ;;  %v6708_v4 = vld [vmem:[%s8403_s2 + $0x1c8] sm:$0xff]   ;;  %v3755_v22 = vshll.u32 %v7735_v38, 16  ;;  %v3754_v28 = vrot.slane %v3752_v16, 4  ;;  %v3765_v52 = vshrl.u32 %v7741_v3, 16 }
 0x1b2   : > { %6222 = vmatprep.subr.bf16.mxu1 %v6699_v56  ;;  %v3032_v40 = vor.u32 %v3031_v9, %v3028_v35  ;;  %v3743_v56 = vrot.slane %v3741_v24, 4  ;;  %6292 = vmatprep.subr.bf16.mxu0 %v6708_v4  ;;  %v3740_v17 = vsel %vm7532_vm12, %v3735_v10, %v3739_v53  ;;  %v3067_v35 = vrot.slane %v3066_v20, 4  ;;  %v6716_v4 = vld [vmem:[%s8403_s2 + $0x198] sm:$0xff]   ;;  %v7791_v41 = vld [vmem:[#allocation2 + $0x2c] sm:$0x1]  ;;  %v6721_v20 = vld [vmem:[%s8403_s2 + $0x1a0] sm:$0xff]  }
 0x1b3   : > { %v3043_v49 = vrot.slane %v3042_v39, 4  ;;  %6293 = vmatpush3.bf16.msra.mxu0 %v6709_v60  ;;  %v3757_v9 = vrot.slane %v3755_v22, 5  ;;  %v3771_v33 = vshll.u32 %v7746_v46, 16  ;;  %v4277_v2 = vrot.slane %v7746_v46, 5 }
 0x1b4   : > { %6429 = vmatmul.mubr.bf16.gmra.mrb[12].mxu1 %v5733_v12  ;;  %v3033_v57 = vrot.slane %v3032_v40, 4  ;;  %v3744_v21 = vor.u32 %v3743_v56, %v3739_v53  ;;  %v6714_v12 = vld [vmem:[%s8403_s2 + $0x190] sm:$0xff]   ;;  %6294 = vmatprep.subr.bf16.mxu0 %v6713_v5  ;;  %v5707_v24 = vcombine.low %v7732_v8, %v7611_v29  ;;  %v5759_v29 = vcombine.low %v7735_v38, %v7741_v3  ;;  %v7780_v53 = vld [vmem:[#allocation2 + $0x48] sm:$0xf] }
 0x1b5   : > { %6223 = vmatpush3.bf16.msra.mxu1 %v6700_v62  ;;  %3662 = vmatmul.mubr.bf16.gmra.mrb[36].mxu0 %v5705_v14  ;;  %v3048_v50 = vsel %vm7532_vm12, %v3043_v49, %v3047_v36  ;;  %v3053_v62 = vshll.u32 %v7732_v8, 16  ;;  %v3761_v36 = vshll.u32 %v7741_v3, 16  ;;  %v3758_v42 = vor.u32 %v3757_v9, %v3754_v28 }
 0x1b6   : > { %6224 = vmatprep.subr.bf16.mxu1 %v6701_v7  ;;  %v3038_v34 = vsel %vm7532_vm12, %v3033_v57, %v3037_v23  ;;  %v3745_v11 = vrot.slane %v3744_v21, 4  ;;  %v3773_v6 = vrot.slane %v3771_v33, 5  ;;  %v3083_v56 = vshll.u32 %v7641_v32, 16 }
 0x1b7   : > { %v5714_v7 = vcombine.low %v3038_v34, %v3048_v50  ;;  %v3055_v14 = vrot.slane %v3053_v62, 5  ;;  %6295 = vmatpush3.bf16.msra.mxu0 %v6714_v12  ;;  %v3763_v43 = vrot.slane %v3761_v36, 5  ;;  %v3074_v60 = vshrl.u32 %v7780_v53, 16 }
 0x1b8   : > { %v3750_v18 = vsel %vm7532_vm12, %v3745_v11, %v3749_v58  ;;  %v3759_v58 = vrot.slane %v3758_v42, 4  ;;  %v3077_v50 = vshll.u32 %v7780_v53, 16  ;;  %v3085_v61 = vrot.slane %v3083_v56, 5  ;;  %v7828_v42 = vld [vmem:[#allocation2 + $0x30] sm:$0xf] }
 0x1b9   : > { %6225 = vmatpush3.bf16.msra.mxu1 %v6703_v15  ;;  %v3069_v15 = vshll.u32 %v7616_v63, 16  ;;  %3669 = vmatprep.mubr.bf16.mxu0 %v5714_v7  ;;  %v6715_v63 = vld [vmem:[%s8403_s2 + $0x1d8] sm:$0xff]   ;;  %v5766_v26 = vcombine.low %v3740_v17, %v3750_v18  ;;  %v3056_v0 = vor.u32 %v3055_v14, %v3052_v13  ;;  %v3087_v21 = vshrl.u32 %v7641_v32, 16  ;;  %v6720_v14 = vld [vmem:[%s8403_s2 + $0x1e0] sm:$0xff]  }
 0x1ba   : > { %6432 = vmatprep.subr.bf16.mxu1 %v7707_v27  ;;  %6296 = vmatprep.subr.bf16.mxu0 %v6715_v63  ;;  %v3093_v8 = vshll.u32 %v7643_v44, 16  ;;  %v3764_v38 = vsel %vm7532_vm12, %v3759_v58, %v3763_v43  ;;  %v3076_v45 = vrot.slane %v3074_v60, 4  ;;  %v3776_v62 = vshrl.u32 %v7784_v31, 16  ;;  %v7841_v60 = vld [vmem:[#allocation2 + $0x38] sm:$0x1] }
 0x1bb   : > { %v3071_v23 = vrot.slane %v3069_v15, 5  ;;  %4160 = vmatprep.mubr.bf16.mxu1 %v5766_v26  ;;  %v3057_v39 = vrot.slane %v3056_v0, 4  ;;  %6297 = vmatpush3.bf16.msra.mxu0 %v6716_v4  ;;  %v3079_v5 = vrot.slane %v3077_v50, 5  ;;  %v3089_v7 = vrot.slane %v3087_v21, 4  ;;  %v6722_v26 = vld [vmem:[%s8403_s2 + $0x1e8] sm:$0xff]  }
 0x1bc   : > { %4161 = vmatmul.mubr.bf16.vlgmr.msra.gmra.mrb[16].mxu1 %v5758_v59  ;;  %v3095_v10 = vrot.slane %v3093_v8, 5  ;;  %v3779_v44 = vshll.u32 %v7784_v31, 16  ;;  %v3778_v51 = vrot.slane %v3776_v62, 4  ;;  %v3795_v63 = vshll.u32 %v7791_v41, 16  ;;  %6298 = vmatprep.subr.bf16.mxu0 %v6720_v14 }
 0x1bd   : > { %3670 = vmatmul.mubr.bf16.gmra.mrb[40].mxu0 %v5706_v48  ;;  %v3072_v40 = vsel %vm7532_vm12, %v3067_v35, %v3071_v23  ;;  %v3767_v48 = vrot.slane %v3765_v52, 4  ;;  %6433 = vmatpush3.bf16.msra.mxu1 %v7707_v27  ;;  %v3062_v49 = vsel %vm7532_vm12, %v3057_v39, %v3061_v1  ;;  %v7786_v27 = vld [vmem:[#allocation2 + $0x28] sm:$0xf]  ;;  %v6719_v1 = vld [vmem:[%s8403_s2 + $0x150] sm:$0xff]   ;;  %v3080_v16 = vor.u32 %v3079_v5, %v3076_v45 }
 0x1be   : > { %v5715_v57 = vcombine.low %v3062_v49, %v3072_v40  ;;  %6434 = vmatprep.subr.bf16.mxu1 %v6712_v25  ;;  %v3785_v12 = vshll.u32 %v7786_v27, 16  ;;  %v3789_v13 = vshrl.u32 %v7786_v27, 16  ;;  %v3090_v17 = vor.u32 %v3089_v7, %v3085_v61  ;;  %v6723_v39 = vld [vmem:[%s8403_s2 + $0x1a8] sm:$0xff]   ;;  %v7825_v40 = vld [vmem:[#allocation2 + $0x54] sm:$0xf] }
 0x1bf   : > { %v3768_v59 = vor.u32 %v3767_v48, %v3763_v43  ;;  %v3781_v18 = vrot.slane %v3779_v44, 5  ;;  %v3081_v0 = vrot.slane %v3080_v16, 4  ;;  %v3797_v9 = vrot.slane %v3795_v63, 5  ;;  %6299 = vmatpush3.bf16.msra.mxu0 %v6721_v20 }
 0x1c0   : > { %3677 = vmatprep.mubr.bf16.mxu0 %v5715_v57  ;;  %v3787_v22 = vrot.slane %v3785_v12, 5  ;;  %v3091_v23 = vrot.slane %v3090_v17, 4  ;;  %v5708_v36 = vcombine.low %v7780_v53, %v7641_v32  ;;  %v5760_v52 = vcombine.low %v7784_v31, %v7786_v27  ;;  %6300 = vmatprep.subr.bf16.mxu0 %v6722_v26  ;;  %v6726_v53 = vld [vmem:[%s8403_s2 + $0x158] sm:$0xff]   ;;  %v6727_v31 = vld [vmem:[%s8403_s2 + $0x1f0] sm:$0xff]   ;;  %v6732_v17 = vld [vmem:[%s8403_s2 + $0x160] sm:$0xff]  }
 0x1c1   : > { %v3769_v34 = vrot.slane %v3768_v59, 4  ;;  %6435 = vmatpush3.bf16.msra.mxu1 %v6712_v25  ;;  %v3791_v25 = vrot.slane %v3789_v13, 4  ;;  %v3782_v28 = vor.u32 %v3781_v18, %v3778_v51  ;;  %v3086_v33 = vsel %vm7532_vm12, %v3081_v0, %v3085_v61  ;;  %v7869_v0 = vld [vmem:[#allocation2 + $0x3c] sm:$0xf] }
 0x1c2   : > { %6436 = vmatprep.subr.bf16.mxu1 %v6719_v1  ;;  %v3107_v32 = vshll.u32 %v7656_v47, 16  ;;  %v3098_v49 = vshrl.u32 %v7825_v40, 16  ;;  %v3111_v58 = vshrl.u32 %v7656_v47, 16  ;;  %v3117_v59 = vshll.u32 %v7661_v54, 16 }
 0x1c3   : > { %v3774_v11 = vsel %vm7532_vm12, %v3769_v34, %v3773_v6  ;;  %v3792_v35 = vor.u32 %v3791_v25, %v3787_v22  ;;  %v3783_v4 = vrot.slane %v3782_v28, 4  ;;  %v3101_v6 = vshll.u32 %v7825_v40, 16  ;;  %6301 = vmatpush3.bf16.msra.mxu0 %v6723_v39 }
 0x1c4   : > { %v5767_v15 = vcombine.low %v3764_v38, %v3774_v11  ;;  %v3109_v57 = vrot.slane %v3107_v32, 5  ;;  %v3100_v61 = vrot.slane %v3098_v49, 4  ;;  %v3800_v8 = vshrl.u32 %v7828_v42, 16  ;;  %v6728_v38 = vld [vmem:[%s8403_s2 + $0x1b0] sm:$0xff]   ;;  %6302 = vmatprep.subr.bf16.mxu0 %v6727_v31  ;;  %v6730_v11 = vld [vmem:[%s8403_s2 + $0x1b8] sm:$0xff]  }
 0x1c5   : > { %3678 = vmatmul.mubr.bf16.gmra.mrb[44].mxu0 %v5707_v24  ;;  %6437 = vmatpush3.bf16.msra.mxu1 %v6719_v1  ;;  %v3096_v24 = vsel %vm7532_vm12, %v3091_v23, %v3095_v10  ;;  %v3793_v48 = vrot.slane %v3792_v35, 4  ;;  %v3788_v56 = vsel %vm7532_vm12, %v3783_v4, %v3787_v22  ;;  %v3103_v21 = vrot.slane %v3101_v6, 5  ;;  %v6729_v1 = vld [vmem:[%s8403_s2 + $0x1f8] sm:$0xff]   ;;  %v6738_v6 = vld [vmem:[%s8403_s2 + $0x170] sm:$0xff]  }
 0x1c6   : > { %4168 = vmatprep.mubr.bf16.mxu1 %v5767_v15  ;;  %v5716_v43 = vcombine.low %v3086_v33, %v3096_v24  ;;  %v3113_v34 = vrot.slane %v3111_v58, 4  ;;  %v3119_v45 = vrot.slane %v3117_v59, 5  ;;  %v3803_v62 = vshll.u32 %v7828_v42, 16  ;;  %6438 = vmatprep.subr.bf16.mxu1 %v6726_v53  ;;  %v7882_v4 = vld [vmem:[#allocation2 + $0x18] sm:$0xf] }
 0x1c7   : > { %4169 = vmatmul.mubr.bf16.gmra.mrb[20].mxu1 %v5759_v29  ;;  %v7832_v29 = vld [vmem:[#allocation2 + $0x34] sm:$0xf]  ;;  %v3798_v50 = vsel %vm7532_vm12, %v3793_v48, %v3797_v9  ;;  %v3104_v5 = vor.u32 %v3103_v21, %v3100_v61  ;;  %v3802_v7 = vrot.slane %v3800_v8, 4  ;;  %v3819_v13 = vshll.u32 %v7841_v60, 16  ;;  %6303 = vmatpush3.bf16.msra.mxu0 %v6728_v38  ;;  %v7875_v9 = vld [vmem:[#allocation2 + $0x40] sm:$0xf] }
 0x1c8   : > { %3685 = vmatprep.mubr.bf16.mxu0 %v5716_v43  ;;  %v5768_v54 = vcombine.low %v3788_v56, %v3798_v50  ;;  %v3809_v10 = vshll.u32 %v7832_v29, 16  ;;  %v3813_v44 = vshrl.u32 %v7832_v29, 16  ;;  %v3114_v51 = vor.u32 %v3113_v34, %v3109_v57  ;;  %6304 = vmatprep.subr.bf16.mxu0 %v6729_v1  ;;  %v7891_v49 = vld [vmem:[#allocation2 + $0x1c] sm:$0xf]  ;;  %v7898_v58 = vld [vmem:[#allocation2 + $0x20] sm:$0x1] }
 0x1c9   : > { %6439 = vmatpush3.bf16.msra.mxu1 %v6726_v53  ;;  %v3805_v12 = vrot.slane %v3803_v62, 5  ;;  %v3105_v14 = vrot.slane %v3104_v5, 4  ;;  %v3821_v22 = vrot.slane %v3819_v13, 5  ;;  %v5709_v26 = vcombine.low %v7825_v40, %v7656_v47  ;;  %v6735_v40 = vld [vmem:[%s8403_s2 + $0x168] sm:$0xff]  }
 0x1ca   : > { %4176 = vmatprep.mubr.bf16.mxu1 %v5768_v54  ;;  %v3811_v15 = vrot.slane %v3809_v10, 5  ;;  %v3815_v16 = vrot.slane %v3813_v44, 4  ;;  %v3115_v18 = vrot.slane %v3114_v51, 4  ;;  %6440 = vmatprep.subr.bf16.mxu1 %v6732_v17  ;;  %v5761_v35 = vcombine.low %v7828_v42, %v7832_v29  ;;  %v7910_v10 = vld [vmem:[#allocation2 + $0x48] sm:$0xf] }
 0x1cb   : > { %v3806_v20 = vor.u32 %v3805_v12, %v3802_v7  ;;  %v3110_v25 = vsel %vm7532_vm12, %v3105_v14, %v3109_v57  ;;  %6305 = vmatpush3.bf16.msra.mxu0 %v6730_v11  ;;  %v3827_v47 = vshll.u32 %v7869_v0, 16  ;;  %v3833_v24 = vshll.u32 %v7875_v9, 16  ;;  %v7912_v44 = vld [vmem:[#allocation2 + $0x4c] sm:$0xf] }
 0x1cc   : > { %v3816_v63 = vor.u32 %v3815_v16, %v3811_v15  ;;  %v3120_v23 = vsel %vm7532_vm12, %v3115_v18, %v3119_v45  ;;  %v3837_v43 = vshrl.u32 %v7875_v9, 16  ;;  %v4556_v59 = vshrl.u32 %v7882_v4, 16  ;;  %v6741_v45 = vld [vmem:[%s8403_s2 + $0x178] sm:$0xff]  }
 0x1cd   : > { %3686 = vmatmul.mubr.bf16.gmra.mrb[48].mxu0 %v5708_v36  ;;  %v3807_v28 = vrot.slane %v3806_v20, 4  ;;  %v7877_v36 = vld [vmem:[#allocation2 + $0x44] sm:$0x1]  ;;  %6441 = vmatpush3.bf16.msra.mxu1 %v6732_v17  ;;  %v5717_v39 = vcombine.low %v3110_v25, %v3120_v23  ;;  %v3829_v56 = vrot.slane %v3827_v47, 5  ;;  %v3835_v57 = vrot.slane %v3833_v24, 5 }
 0x1ce   : > { %v3817_v33 = vrot.slane %v3816_v63, 4  ;;  %v3843_v48 = vshll.u32 %v7877_v36, 16  ;;  %6442 = vmatprep.subr.bf16.mxu1 %v6735_v40  ;;  %v3839_v50 = vrot.slane %v3837_v43, 4  ;;  %v4559_v21 = vshll.u32 %v7882_v4, 16  ;;  %v7916_v17 = vld [vmem:[#allocation2 + $0x50] sm:$0x1] }
 0x1cf   : > { %4177 = vmatmul.mubr.bf16.gmra.mrb[24].mxu1 %v5760_v52  ;;  %v3824_v52 = vshrl.u32 %v7869_v0, 16  ;;  %v3812_v32 = vsel %vm7532_vm12, %v3807_v28, %v3811_v15  ;;  %3693 = vmatprep.mubr.bf16.mxu0 %v5717_v39  ;;  %v4558_v38 = vrot.slane %v4556_v59, 4  ;;  %v4565_v54 = vshll.u32 %v7891_v49, 16  ;;  %v7922_v20 = vld [vmem:[%s8403_s2 + $0x200] sm:$0xff]   ;;  %v7930_v23 = vld [vmem:[#allocation2 + $0x28] sm:$0xf] }
 0x1d0   : > { %v3822_v53 = vsel %vm7532_vm12, %v3817_v33, %v3821_v22  ;;  %v3845_v61 = vrot.slane %v3843_v48, 5  ;;  %v4569_v34 = vshrl.u32 %v7891_v49, 16  ;;  %v3840_v62 = vor.u32 %v3839_v50, %v3835_v57 }
 0x1d1   : > { %v3826_v42 = vrot.slane %v3824_v52, 4  ;;  %v5769_v31 = vcombine.low %v3812_v32, %v3822_v53  ;;  %6443 = vmatpush3.bf16.msra.mxu1 %v6735_v40  ;;  %v4561_v1 = vrot.slane %v4559_v21, 5  ;;  %v4575_v5 = vshll.u32 %v7898_v58, 16  ;;  %v7941_v53 = vld [vmem:[#allocation2 + $0x2c] sm:$0x1] }
 0x1d2   : > { %6444 = vmatprep.subr.bf16.mxu1 %v6738_v6  ;;  %v5762_v7 = vcombine.low %v7869_v0, %v7875_v9  ;;  %v4567_v51 = vrot.slane %v4565_v54, 5  ;;  %v4571_v12 = vrot.slane %v4569_v34, 4  ;;  %v5862_v13 = vcombine.low %v7882_v4, %v7891_v49  ;;  %v7928_v0 = vld [vmem:[#allocation2 + $0x24] sm:$0xf]  ;;  %v7947_v34 = vld [vmem:[#allocation2 + $0x54] sm:$0xf] }
 0x1d3   : > { %v3830_v8 = vor.u32 %v3829_v56, %v3826_v42  ;;  %4184 = vmatprep.mubr.bf16.mxu1 %v5769_v31  ;;  %v3841_v14 = vrot.slane %v3840_v62, 4  ;;  %v4562_v15 = vor.u32 %v4561_v1, %v4558_v38  ;;  %v4577_v16 = vrot.slane %v4575_v5, 5  ;;  %v7952_v5 = vld [vmem:[#allocation2 + $0x58] sm:$0xf] }
 0x1d4   : > { %v3848_v18 = vshrl.u32 %v7910_v10, 16  ;;  %v4572_v25 = vor.u32 %v4571_v12, %v4567_v51  ;;  %v3851_v63 = vshll.u32 %v7910_v10, 16  ;;  %v3861_v39 = vshrl.u32 %v7912_v44, 16 }
 0x1d5   : > { %3694 = vmatmul.mubr.bf16.gmra.mrb[52].mxu0 %v5709_v26  ;;  %v3831_v11 = vrot.slane %v3830_v8, 4  ;;  %6445 = vmatpush3.bf16.msra.mxu1 %v6738_v6  ;;  %v3857_v26 = vshll.u32 %v7912_v44, 16  ;;  %v3846_v28 = vsel %vm7532_vm12, %v3841_v14, %v3845_v61  ;;  %v3867_v42 = vshll.u32 %v7916_v17, 16  ;;  %v7958_v14 = vld [vmem:[#allocation2 + $0x5c] sm:$0x1] }
 0x1d6   : > { %6446 = vmatprep.subr.bf16.mxu1 %v6741_v45  ;;  %v3850_v52 = vrot.slane %v3848_v18, 4  ;;  %v4573_v47 = vrot.slane %v4572_v25, 4  ;;  %v3853_v24 = vrot.slane %v3851_v63, 5  ;;  %v3863_v32 = vrot.slane %v3861_v39, 4  ;;  %v7969_v39 = vld [vmem:[#allocation2 + $0x34] sm:$0xf] }
 0x1d7   : > { %4185 = vmatmul.mubr.bf16.gmra.mrb[28].mxu1 %v5761_v35  ;;  %v3836_v22 = vsel %vm7532_vm12, %v3831_v11, %v3835_v57  ;;  %v4563_v35 = vrot.slane %v4562_v15, 4  ;;  %v3859_v4 = vrot.slane %v3857_v26, 5  ;;  %v4580_v43 = vshrl.u32 %v7928_v0, 16 }
 0x1d8   : > { %v5770_v33 = vcombine.low %v3836_v22, %v3846_v28  ;;  %v4578_v48 = vsel %vm7532_vm12, %v4573_v47, %v4577_v16  ;;  %v3854_v6 = vor.u32 %v3853_v24, %v3850_v52  ;;  %v4583_v56 = vshll.u32 %v7928_v0, 16  ;;  %v7964_v22 = vld [vmem:[#allocation2 + $0x30] sm:$0xf] }
 0x1d9   : > { %v4568_v40 = vsel %vm7532_vm12, %v4563_v35, %v4567_v51  ;;  %6447 = vmatpush3.bf16.msra.mxu1 %v6741_v45  ;;  %v4589_v57 = vshll.u32 %v7930_v23, 16  ;;  %v3864_v31 = vor.u32 %v3863_v32, %v3859_v4  ;;  %v3869_v50 = vrot.slane %v3867_v42, 5 }
 0x1da   : > { %4192 = vmatprep.mubr.bf16.mxu1 %v5770_v33  ;;  %6464 = vmatprep.subr.bf16.mxu1 %v7922_v20  ;;  %v5870_v59 = vcombine.low %v4568_v40, %v4578_v48  ;;  %v4582_v61 = vrot.slane %v4580_v43, 4  ;;  %v3855_v21 = vrot.slane %v3854_v6, 4  ;;  %v4585_v8 = vrot.slane %v4583_v56, 5 }
 0x1db   : > { %v4591_v38 = vrot.slane %v4589_v57, 5  ;;  %v4593_v54 = vshrl.u32 %v7930_v23, 16  ;;  %v3865_v45 = vrot.slane %v3864_v31, 4  ;;  %v4599_v62 = vshll.u32 %v7941_v53, 16 }
 0x1dc   : > { %4988 = vmatprep.mubr.bf16.mxu0 %v5870_v59  ;;  %v5763_v1 = vcombine.low %v7910_v10, %v7912_v44  ;;  %v4586_v11 = vor.u32 %v4585_v8, %v4582_v61  ;;  %v5863_v12 = vcombine.low %v7928_v0, %v7930_v23  ;;  %v3872_v18 = vshrl.u32 %v7947_v34, 16  ;;  %v7981_v8 = vld [vmem:[#allocation2 + $0x60] sm:$0xf] }
 0x1dd   : > { %4989 = vmatmul.mubr.bf16.vlgmr.msra.gmra.mrb[56].mxu0 %v5862_v13  ;;  %v4595_v51 = vrot.slane %v4593_v54, 4  ;;  %v3870_v15 = vsel %vm7532_vm12, %v3865_v45, %v3869_v50  ;;  %v4601_v16 = vrot.slane %v4599_v62, 5  ;;  %v3875_v10 = vshll.u32 %v7947_v34, 16 }
 0x1de   : > { %v4587_v25 = vrot.slane %v4586_v11, 4  ;;  %v3881_v26 = vshll.u32 %v7952_v5, 16  ;;  %v3874_v28 = vrot.slane %v3872_v18, 4  ;;  %v3885_v0 = vshrl.u32 %v7952_v5, 16  ;;  %v7994_v18 = vld [vmem:[#allocation2 + $0x3c] sm:$0xf] }
 0x1df   : > { %4193 = vmatmul.mubr.bf16.gmra.mrb[32].mxu1 %v5762_v7  ;;  %v3860_v7 = vsel %vm7532_vm12, %v3855_v21, %v3859_v4  ;;  %v4596_v63 = vor.u32 %v4595_v51, %v4591_v38  ;;  %v3877_v35 = vrot.slane %v3875_v10, 5  ;;  %v3891_v52 = vshll.u32 %v7958_v14, 16  ;;  %v7973_v4 = vld [vmem:[#allocation2 + $0x38] sm:$0x1] }
 0x1e0   : > { %v5771_v13 = vcombine.low %v3860_v7, %v3870_v15  ;;  %v4592_v33 = vsel %vm7532_vm12, %v4587_v25, %v4591_v38  ;;  %v3883_v24 = vrot.slane %v3881_v26, 5  ;;  %v4604_v40 = vshrl.u32 %v7964_v22, 16  ;;  %v7986_v7 = vld [vmem:[#allocation2 + $0x64] sm:$0xf] }
 0x1e1   : > { %v4597_v47 = vrot.slane %v4596_v63, 4  ;;  %v3878_v32 = vor.u32 %v3877_v35, %v3874_v28  ;;  %v3887_v42 = vrot.slane %v3885_v0, 4  ;;  %v3893_v43 = vrot.slane %v3891_v52, 5  ;;  %v7998_v63 = vld [vmem:[#allocation2 + $0x40] sm:$0xf] }
 0x1e2   : > { %4200 = vmatprep.mubr.bf16.mxu1 %v5771_v13  ;;  %v4607_v48 = vshll.u32 %v7964_v22, 16  ;;  %v4606_v56 = vrot.slane %v4604_v40, 4  ;;  %v4613_v57 = vshll.u32 %v7969_v39, 16  ;;  %v4617_v59 = vshrl.u32 %v7969_v39, 16 }
 0x1e3   : > { %v4602_v6 = vsel %vm7532_vm12, %v4597_v47, %v4601_v16  ;;  %v3879_v50 = vrot.slane %v3878_v32, 4  ;;  %v3888_v61 = vor.u32 %v3887_v42, %v3883_v24  ;;  %v4623_v45 = vshll.u32 %v7973_v4, 16  ;;  %v7992_v16 = vld [vmem:[#allocation2 + $0x68] sm:$0x1] }
 0x1e4   : > { %v5871_v31 = vcombine.low %v4592_v33, %v4602_v6  ;;  %v4609_v21 = vrot.slane %v4607_v48, 5  ;;  %v4615_v38 = vrot.slane %v4613_v57, 5  ;;  %v4619_v54 = vrot.slane %v4617_v59, 4  ;;  %v8009_v48 = vld [vmem:[#allocation2 + $0x44] sm:$0x1] }
 0x1e5   : > { %v5764_v62 = vcombine.low %v7947_v34, %v7952_v5  ;;  %v3889_v11 = vrot.slane %v3888_v61, 4  ;;  %v5864_v15 = vcombine.low %v7964_v22, %v7969_v39  ;;  %v4625_v13 = vrot.slane %v4623_v45, 5  ;;  %v4241_v61 = vld [vmem:[#allocation2 + $0xc] sm:$0xe] }
 0x1e6   : > { %4996 = vmatprep.mubr.bf16.mxu0 %v5871_v31  ;;  %v4610_v51 = vor.u32 %v4609_v21, %v4606_v56  ;;  %v4620_v10 = vor.u32 %v4619_v54, %v4615_v38  ;;  %v3896_v34 = vshrl.u32 %v7981_v8, 16  ;;  %v3899_v25 = vshll.u32 %v7981_v8, 16 }
 0x1e7   : > { %4201 = vmatmul.mubr.bf16.gmra.mrb[36].mxu1 %v5763_v1  ;;  %v3884_v1 = vsel %vm7532_vm12, %v3879_v50, %v3883_v24  ;;  %4997 = vmatmul.mubr.bf16.gmra.mrb[60].mxu0 %v5863_v12  ;;  %v3894_v26 = vsel %vm7532_vm12, %v3889_v11, %v3893_v43  ;;  %v3905_v35 = vshll.u32 %v7986_v7, 16  ;;  %v3909_v22 = vshrl.u32 %v7986_v7, 16 }
 0x1e8   : > { %v4611_v28 = vrot.slane %v4610_v51, 4  ;;  %v5772_v0 = vcombine.low %v3884_v1, %v3894_v26  ;;  %v4621_v52 = vrot.slane %v4620_v10, 4  ;;  %v3898_v33 = vrot.slane %v3896_v34, 4  ;;  %v8015_v1 = vld [vmem:[#allocation2 + $0x48] sm:$0xf] }
 0x1e9   : > { %v3901_v12 = vrot.slane %v3899_v25, 5  ;;  %v3907_v24 = vrot.slane %v3905_v35, 5  ;;  %v3911_v40 = vrot.slane %v3909_v22, 4  ;;  %v3915_v32 = vshll.u32 %v7992_v16, 16 }
 0x1ea   : > { %v4616_v47 = vsel %vm7532_vm12, %v4611_v28, %v4615_v38  ;;  %4208 = vmatprep.mubr.bf16.mxu1 %v5772_v0  ;;  %v4626_v42 = vsel %vm7532_vm12, %v4621_v52, %v4625_v13  ;;  %v4628_v6 = vshrl.u32 %v7994_v18, 16  ;;  %v4631_v56 = vshll.u32 %v7994_v18, 16  ;;  %v8020_v13 = vld [vmem:[#allocation2 + $0x4c] sm:$0xf] }
 0x1eb   : > { %v3902_v43 = vor.u32 %v3901_v12, %v3898_v33  ;;  %v5872_v57 = vcombine.low %v4616_v47, %v4626_v42  ;;  %v3912_v59 = vor.u32 %v3911_v40, %v3907_v24  ;;  %v3917_v31 = vrot.slane %v3915_v32, 5  ;;  %v8030_v47 = vld [vmem:[#allocation2 + $0x50] sm:$0x1]  ;;  %v4242_v42 = vld [vmem:[#allocation2 + $0x18] sm:$0xe] }
 0x1ec   : > { %v4637_v50 = vshll.u32 %v7998_v63, 16  ;;  %v4630_v38 = vrot.slane %v4628_v6, 4  ;;  %v4633_v54 = vrot.slane %v4631_v56, 5  ;;  %v4641_v45 = vshrl.u32 %v7998_v63, 16  ;;  %v4243_v56 = vld [vmem:[#allocation2 + $0x24] sm:$0xe] }
 0x1ed   : > { %v3903_v21 = vrot.slane %v3902_v43, 4  ;;  %5004 = vmatprep.mubr.bf16.mxu0 %v5872_v57  ;;  %v3913_v11 = vrot.slane %v3912_v59, 4  ;;  %v4647_v10 = vshll.u32 %v8009_v48, 16  ;;  %v5865_v28 = vcombine.low %v7994_v18, %v7998_v63 }
 0x1ee   : > { %v4639_v51 = vrot.slane %v4637_v50, 5  ;;  %v4634_v25 = vor.u32 %v4633_v54, %v4630_v38  ;;  %v4643_v26 = vrot.slane %v4641_v45, 4  ;;  %v5822_v0 = vrot.slane %v4241_v61, 9  ;;  %v8043_v61 = vld [vmem:[#allocation2 + $0x54] sm:$0xf] }
 0x1ef   : > { %4209 = vmatmul.mubr.bf16.gmra.mrb[40].mxu1 %v5764_v62  ;;  %v5765_v62 = vcombine.low %v7981_v8, %v7986_v7  ;;  %5005 = vmatmul.mubr.bf16.gmra.mrb[64].mxu0 %v5864_v15  ;;  %v3908_v34 = vsel %vm7532_vm12, %v3903_v21, %v3907_v24  ;;  %v3918_v35 = vsel %vm7532_vm12, %v3913_v11, %v3917_v31  ;;  %v4649_v22 = vrot.slane %v4647_v10, 5 }
 0x1f0   : > { %v4267_v52 = vrot.slane %v7709_v30, 5  ;;  %v5773_v33 = vcombine.low %v3908_v34, %v3918_v35  ;;  %v4635_v8 = vrot.slane %v4634_v25, 4  ;;  %v4644_v12 = vor.u32 %v4643_v26, %v4639_v51 }
 0x1f1   : > { %v4270_v15 = vrot.slane %v7711_v19, 5  ;;  %v4652_v18 = vshrl.u32 %v8015_v1, 16  ;;  %v4655_v32 = vshll.u32 %v8015_v1, 16  ;;  %v4661_v6 = vshll.u32 %v8020_v13, 16 }
 0x1f2   : > { %v4268_v24 = vsel %vm7506_vm9, %v5822_v0, %v4267_v52  ;;  %v4269_v40 = vrot.slane %v4267_v52, 4  ;;  %4216 = vmatprep.mubr.bf16.mxu1 %v5773_v33  ;;  %v4640_v30 = vsel %vm7532_vm12, %v4635_v8, %v4639_v51  ;;  %v4645_v43 = vrot.slane %v4644_v12, 4  ;;  %v8052_v33 = vld [vmem:[#allocation2 + $0x58] sm:$0xf] }
 0x1f3   : > { %v4665_v19 = vshrl.u32 %v8020_v13, 16  ;;  %v4654_v59 = vrot.slane %v4652_v18, 4  ;;  %v4657_v31 = vrot.slane %v4655_v32, 5  ;;  %v4671_v50 = vshll.u32 %v8030_v47, 16  ;;  %v4244_v32 = vld [vmem:[#allocation2 + $0x30] sm:$0xe] }
 0x1f4   : > { %v4271_v57 = vsel %vm7506_vm9, %v4269_v40, %v4270_v15  ;;  %v4650_v21 = vsel %vm7532_vm12, %v4645_v43, %v4649_v22  ;;  %v4663_v54 = vrot.slane %v4661_v6, 5  ;;  %v5823_v34 = vrot.slane %v4242_v42, 9 }
 0x1f5   : > { %v5846_v38 = vcombine.low %v4268_v24, %v4271_v57  ;;  %v4667_v45 = vrot.slane %v4665_v19, 4  ;;  %v5873_v11 = vcombine.low %v4640_v30, %v4650_v21  ;;  %v4658_v51 = vor.u32 %v4657_v31, %v4654_v59  ;;  %v8057_v24 = vld [vmem:[#allocation2 + $0x5c] sm:$0x1]  ;;  %v4245_v31 = vld [vmem:[#allocation2 + $0x3c] sm:$0xe] }
 0x1f6   : > { %v4673_v10 = vrot.slane %v4671_v50, 5  ;;  %v4274_v25 = vrot.slane %v7741_v3, 5  ;;  %v5866_v26 = vcombine.low %v8015_v1, %v8020_v13  ;;  %v5824_v35 = vrot.slane %v4243_v56, 9  ;;  %v6745_v56 = vld [vmem:[%s8403_s2 + $0x208] sm:$0xff]  }
 0x1f7   : > { %4217 = vmatmul.mubr.bf16.gmra.mrb[44].mxu1 %v5765_v62  ;;  %v4668_v62 = vor.u32 %v4667_v45, %v4663_v54  ;;  %5012 = vmatprep.mubr.bf16.mxu0 %v5873_v11  ;;  %v4659_v0 = vrot.slane %v4658_v51, 4  ;;  %v4281_v52 = vrot.slane %v7786_v27, 5  ;;  %v4284_v22 = vrot.slane %v7791_v41, 5  ;;  %v8080_v51 = vld [vmem:[#allocation2 + $0x60] sm:$0xf] }
 0x1f8   : > { %6448 = vmatprep.mubr.bf16.mxu1 %v5846_v38  ;;  %v4676_v8 = vshrl.u32 %v8043_v61, 16  ;;  %5013 = vmatmul.mubr.bf16.gmra.mrb[68].mxu0 %v5865_v28  ;;  %v4275_v15 = vsel %vm7506_vm9, %v5823_v34, %v4274_v25  ;;  %v4276_v3 = vrot.slane %v4274_v25, 4  ;;  %v4679_v1 = vshll.u32 %v8043_v61, 16 }
 0x1f9   : > { %v4669_v12 = vrot.slane %v4668_v62, 4  ;;  %v4664_v40 = vsel %vm7532_vm12, %v4659_v0, %v4663_v54  ;;  %v4282_v27 = vsel %vm7506_vm9, %v5824_v35, %v4281_v52  ;;  %v4283_v41 = vrot.slane %v4281_v52, 4 }
 0x1fa   : > { %v4678_v18 = vrot.slane %v4676_v8, 4  ;;  %v4278_v42 = vsel %vm7506_vm9, %v4276_v3, %v4277_v2  ;;  %v4681_v30 = vrot.slane %v4679_v1, 5  ;;  %v4685_v43 = vshll.u32 %v8052_v33, 16  ;;  %v8096_v8 = vld [vmem:[#allocation2 + $0x68] sm:$0x1] }
 0x1fb   : > { %v4674_v28 = vsel %vm7532_vm12, %v4669_v12, %v4673_v10  ;;  %v5847_v19 = vcombine.low %v4275_v15, %v4278_v42  ;;  %v4285_v57 = vsel %vm7506_vm9, %v4283_v41, %v4284_v22  ;;  %v4689_v59 = vshrl.u32 %v8052_v33, 16 }
 0x1fc   : > { %v5874_v6 = vcombine.low %v4664_v40, %v4674_v28  ;;  %v5848_v50 = vcombine.low %v4282_v27, %v4285_v57  ;;  %v4682_v46 = vor.u32 %v4681_v30, %v4678_v18  ;;  %v4687_v21 = vrot.slane %v4685_v43, 5  ;;  %v4246_v18 = vld [vmem:[#allocation2 + $0x48] sm:$0xe]  ;;  %v6748_v28 = vld [vmem:[%s8403_s2 + $0x218] sm:$0xff]  }
 0x1fd   : > { %v4695_v2 = vshll.u32 %v8057_v24, 16  ;;  %v4691_v38 = vrot.slane %v4689_v59, 4  ;;  %v5825_v54 = vrot.slane %v4244_v32, 9  ;;  %v4288_v45 = vrot.slane %v7832_v29, 5  ;;  %v6747_v29 = vld [vmem:[%s8403_s2 + $0x210] sm:$0xff]  }
 0x1fe   : > { %5020 = vmatprep.mubr.bf16.mxu0 %v5874_v6  ;;  %v4291_v11 = vrot.slane %v7841_v60, 5  ;;  %v4683_v10 = vrot.slane %v4682_v46, 4  ;;  %v5867_v62 = vcombine.low %v8043_v61, %v8052_v33  ;;  %v5826_v25 = vrot.slane %v4245_v31, 9  ;;  %v4247_v6 = vld [vmem:[#allocation2 + $0x54] sm:$0xe] }
 0x1ff   : > { %6449 = vmatmul.mubr.bf16.vlgmr.msra.gmra.mrb[0].mxu1 %v5847_v19  ;;  %v4697_v34 = vrot.slane %v4695_v2, 5  ;;  %v4692_v35 = vor.u32 %v4691_v38, %v4687_v21  ;;  %v4289_v0 = vsel %vm7506_vm9, %v5825_v54, %v4288_v45  ;;  %v4290_v52 = vrot.slane %v4288_v45, 4  ;;  %v8115_v2 = vld [vmem:[#allocation2 + $0x6c] sm:$0xf] }
 0x200   : > { %6465 = vmatpush3.bf16.msra.mxu1 %v7922_v20  ;;  %6452 = vmatprep.mubr.bf16.mxu1 %v5848_v50  ;;  %v4295_v60 = vrot.slane %v7875_v9, 5  ;;  %v8091_v20 = vld [vmem:[#allocation2 + $0x64] sm:$0xf]  ;;  %v4688_v22 = vsel %vm7532_vm12, %v4683_v10, %v4687_v21  ;;  %v4298_v61 = vrot.slane %v7877_v36, 5  ;;  %v4700_v12 = vshrl.u32 %v8080_v51, 16 }
 0x201   : > { %6466 = vmatprep.subr.bf16.mxu1 %v6745_v56  ;;  %5021 = vmatmul.mubr.bf16.gmra.mrb[72].mxu0 %v5866_v26  ;;  %v4703_v15 = vshll.u32 %v8080_v51, 16  ;;  %v4693_v3 = vrot.slane %v4692_v35, 4  ;;  %v4292_v1 = vsel %vm7506_vm9, %v4290_v52, %v4291_v11  ;;  %v4709_v36 = vshll.u32 %v8091_v20, 16  ;;  %v8131_v52 = vld [vmem:[#allocation2 + $0x74] sm:$0x1] }
 0x202   : > { %v4296_v9 = vsel %vm7506_vm9, %v5826_v25, %v4295_v60  ;;  %v4297_v40 = vrot.slane %v4295_v60, 4  ;;  %v5849_v26 = vcombine.low %v4289_v0, %v4292_v1  ;;  %v4702_v27 = vrot.slane %v4700_v12, 4  ;;  %v8126_v0 = vld [vmem:[#allocation2 + $0x70] sm:$0xf]  ;;  %v4248_v1 = vld [vmem:[#allocation2 + $0x60] sm:$0xe] }
 0x203   : > { %v4705_v41 = vrot.slane %v4703_v15, 5  ;;  %v4698_v32 = vsel %vm7532_vm12, %v4693_v3, %v4697_v34  ;;  %v4713_v30 = vshrl.u32 %v8091_v20, 16  ;;  %v4719_v43 = vshll.u32 %v8096_v8, 16 }
 0x204   : > { %6467 = vmatpush3.bf16.msra.mxu1 %v6745_v56  ;;  %v4299_v42 = vsel %vm7506_vm9, %v4297_v40, %v4298_v61  ;;  %v5875_v19 = vcombine.low %v4688_v22, %v4698_v32  ;;  %v4711_v59 = vrot.slane %v4709_v36, 5  ;;  %v5827_v46 = vrot.slane %v4246_v18, 9  ;;  %v6751_v40 = vld [vmem:[%s8403_s2 + $0x228] sm:$0xff]   ;;  %v5069_v36 = vld [vmem:[#allocation2 + $0x18] sm:$0xe] }
 0x205   : > { %6468 = vmatprep.subr.bf16.mxu1 %v6747_v29  ;;  %v5850_v56 = vcombine.low %v4296_v9, %v4299_v42  ;;  %v4706_v57 = vor.u32 %v4705_v41, %v4702_v27  ;;  %v4715_v31 = vrot.slane %v4713_v30, 4  ;;  %v4721_v50 = vrot.slane %v4719_v43, 5 }
 0x206   : > { %v4302_v21 = vrot.slane %v7912_v44, 5  ;;  %5028 = vmatprep.mubr.bf16.mxu0 %v5875_v19  ;;  %v4305_v54 = vrot.slane %v7916_v17, 5  ;;  %v5868_v45 = vcombine.low %v8080_v51, %v8091_v20  ;;  %v5828_v11 = vrot.slane %v4247_v6, 9  ;;  %v6750_v44 = vld [vmem:[%s8403_s2 + $0x220] sm:$0xff]  }
 0x207   : > { %6453 = vmatmul.mubr.bf16.gmra.mrb[4].mxu1 %v5849_v26  ;;  %v4707_v38 = vrot.slane %v4706_v57, 4  ;;  %v4716_v10 = vor.u32 %v4715_v31, %v4711_v59  ;;  %v4309_v35 = vrot.slane %v7952_v5, 5  ;;  %v4312_v51 = vrot.slane %v7958_v14, 5 }
 0x208   : > { %6469 = vmatpush3.bf16.msra.mxu1 %v6747_v29  ;;  %6456 = vmatprep.mubr.bf16.mxu1 %v5850_v56  ;;  %v4303_v34 = vsel %vm7506_vm9, %v5827_v46, %v4302_v21  ;;  %v4304_v25 = vrot.slane %v4302_v21, 4  ;;  %v4724_v29 = vshrl.u32 %v8115_v2, 16  ;;  %v4727_v60 = vshll.u32 %v8115_v2, 16 }
 0x209   : > { %6470 = vmatprep.subr.bf16.mxu1 %v6748_v28  ;;  %5029 = vmatmul.mubr.bf16.gmra.mrb[76].mxu0 %v5867_v62  ;;  %v4712_v17 = vsel %vm7532_vm12, %v4707_v38, %v4711_v59  ;;  %v4717_v22 = vrot.slane %v4716_v10, 4  ;;  %v4310_v5 = vsel %vm7506_vm9, %v5828_v11, %v4309_v35  ;;  %v4311_v12 = vrot.slane %v4309_v35, 4  ;;  %v6753_v59 = vld [vmem:[%s8403_s2 + $0x230] sm:$0xff]   ;;  %v5070_v38 = vld [vmem:[#allocation2 + $0x24] sm:$0xe] }
 0x20a   : > { %v4306_v61 = vsel %vm7506_vm9, %v4304_v25, %v4305_v54  ;;  %v4726_v15 = vrot.slane %v4724_v29, 4  ;;  %v4729_v3 = vrot.slane %v4727_v60, 5  ;;  %v4733_v14 = vshll.u32 %v8126_v0, 16  ;;  %v5071_v54 = vld [vmem:[#allocation2 + $0x30] sm:$0xe] }
 0x20b   : > { %v5851_v62 = vcombine.low %v4303_v34, %v4306_v61  ;;  %v4722_v9 = vsel %vm7532_vm12, %v4717_v22, %v4721_v50  ;;  %v4313_v26 = vsel %vm7506_vm9, %v4311_v12, %v4312_v51  ;;  %v4737_v27 = vshrl.u32 %v8126_v0, 16 }
 0x20c   : > { %6471 = vmatpush3.bf16.msra.mxu1 %v6748_v28  ;;  %v4743_v41 = vshll.u32 %v8131_v52, 16  ;;  %v5876_v18 = vcombine.low %v4712_v17, %v4722_v9  ;;  %v5852_v32 = vcombine.low %v4310_v5, %v4313_v26  ;;  %v4730_v28 = vor.u32 %v4729_v3, %v4726_v15 }
 0x20d   : > { %6472 = vmatprep.subr.bf16.mxu1 %v6750_v44  ;;  %v4735_v42 = vrot.slane %v4733_v14, 5  ;;  %v4739_v30 = vrot.slane %v4737_v27, 4  ;;  %v5829_v43 = vrot.slane %v4248_v1, 9  ;;  %v4316_v6 = vrot.slane %v7986_v7, 5  ;;  %v5073_v1 = vld [vmem:[#allocation2 + $0x48] sm:$0xe] }
 0x20e   : > { %5036 = vmatprep.mubr.bf16.mxu0 %v5876_v18  ;;  %v4731_v19 = vrot.slane %v4730_v28, 4  ;;  %v4745_v56 = vrot.slane %v4743_v41, 5  ;;  %v4319_v57 = vrot.slane %v7992_v16, 5  ;;  %v5926_v31 = vrot.slane %v5069_v36, 9 }
 0x20f   : > { %6457 = vmatmul.mubr.bf16.gmra.mrb[8].mxu1 %v5851_v62  ;;  %v4740_v50 = vor.u32 %v4739_v30, %v4735_v42  ;;  %v4317_v46 = vsel %vm7506_vm9, %v5829_v43, %v4316_v6  ;;  %v4318_v21 = vrot.slane %v4316_v6, 4  ;;  %v5095_v7 = vrot.slane %v7891_v49, 5  ;;  %v5074_v30 = vld [vmem:[#allocation2 + $0x54] sm:$0xe] }
 0x210   : > { %6473 = vmatpush3.bf16.msra.mxu1 %v6750_v44  ;;  %6460 = vmatprep.mubr.bf16.mxu1 %v5852_v32  ;;  %v5105_v11 = vrot.slane %v7941_v53, 5  ;;  %v4736_v16 = vsel %vm7532_vm12, %v4731_v19, %v4735_v42  ;;  %v5098_v10 = vrot.slane %v7898_v58, 5  ;;  %v5102_v34 = vrot.slane %v7930_v23, 5  ;;  %v6754_v58 = vld [vmem:[%s8403_s2 + $0x238] sm:$0xff]  }
 0x211   : > { %6474 = vmatprep.subr.bf16.mxu1 %v6751_v40  ;;  %5037 = vmatmul.mubr.bf16.gmra.mrb[80].mxu0 %v5868_v45  ;;  %v4741_v25 = vrot.slane %v4740_v50, 4  ;;  %v4320_v44 = vsel %vm7506_vm9, %v4318_v21, %v4319_v57  ;;  %v5096_v35 = vsel %vm7506_vm9, %v5926_v31, %v5095_v7  ;;  %v5097_v49 = vrot.slane %v5095_v7, 4 }
 0x212   : > { %v5853_v17 = vcombine.low %v4317_v46, %v4320_v44  ;;  %v5927_v51 = vrot.slane %v5070_v38, 9  ;;  %v5104_v53 = vrot.slane %v5102_v34, 4  ;;  %v5928_v45 = vrot.slane %v5071_v54, 9  ;;  %v5076_v38 = vld [vmem:[#allocation2 + $0x6c] sm:$0xe] }
 0x213   : > { %v4746_v29 = vsel %vm7532_vm12, %v4741_v25, %v4745_v56  ;;  %v5099_v23 = vsel %vm7506_vm9, %v5097_v49, %v5098_v10  ;;  %v5109_v60 = vrot.slane %v7969_v39, 5  ;;  %v5112_v22 = vrot.slane %v7973_v4, 5 }
 0x214   : > { %6475 = vmatpush3.bf16.msra.mxu1 %v6751_v40  ;;  %v5877_v61 = vcombine.low %v4736_v16, %v4746_v29  ;;  %v5869_v5 = vcombine.low %v8115_v2, %v8126_v0  ;;  %v5950_v12 = vcombine.low %v5096_v35, %v5099_v23  ;;  %v5103_v62 = vsel %vm7506_vm9, %v5927_v51, %v5102_v34  ;;  %v5072_v2 = vld [vmem:[#allocation2 + $0x3c] sm:$0xe] }
 0x215   : > { %6476 = vmatprep.subr.bf16.mxu1 %v6753_v59  ;;  %v5111_v55 = vrot.slane %v5109_v60, 4  ;;  %v5106_v15 = vsel %vm7506_vm9, %v5104_v53, %v5105_v11  ;;  %v5116_v3 = vrot.slane %v7998_v63, 5  ;;  %v5110_v39 = vsel %vm7506_vm9, %v5928_v45, %v5109_v60 }
 0x216   : > { %5044 = vmatprep.mubr.bf16.mxu0 %v5877_v61  ;;  %v5123_v14 = vrot.slane %v8020_v13, 5  ;;  %v5951_v9 = vcombine.low %v5103_v62, %v5106_v15  ;;  %v5929_v26 = vrot.slane %v5072_v2, 9  ;;  %v5119_v63 = vrot.slane %v8009_v48, 5 }
 0x217   : > { %6461 = vmatmul.mubr.bf16.gmra.mrb[12].mxu1 %v5853_v17  ;;  %v5113_v4 = vsel %vm7506_vm9, %v5111_v55, %v5112_v22  ;;  %v5118_v27 = vrot.slane %v5116_v3, 4  ;;  %v5930_v41 = vrot.slane %v5073_v1, 9  ;;  %v5126_v18 = vrot.slane %v8030_v47, 5  ;;  %v5075_v47 = vld [vmem:[#allocation2 + $0x60] sm:$0xe] }
 0x218   : > { %6477 = vmatpush3.bf16.msra.mxu1 %v6753_v59  ;;  %6480 = vmatprep.mubr.bf16.mxu1 %v5950_v12  ;;  %v5952_v40 = vcombine.low %v5110_v39, %v5113_v4  ;;  %v5125_v36 = vrot.slane %v5123_v14, 4  ;;  %v5117_v32 = vsel %vm7506_vm9, %v5929_v26, %v5116_v3  ;;  %v5130_v28 = vrot.slane %v8052_v33, 5 }
 0x219   : > { %6478 = vmatprep.subr.bf16.mxu1 %v6754_v58  ;;  %5045 = vmatmul.mubr.bf16.gmra.mrb[84].mxu0 %v5869_v5  ;;  %v5120_v13 = vsel %vm7506_vm9, %v5118_v27, %v5119_v63  ;;  %v5124_v42 = vsel %vm7506_vm9, %v5930_v41, %v5123_v14  ;;  %v5137_v43 = vrot.slane %v8091_v20, 5  ;;  %v5931_v56 = vrot.slane %v5074_v30, 9 }
 0x21a   : > { %v5127_v48 = vsel %vm7506_vm9, %v5125_v36, %v5126_v18  ;;  %v5953_v6 = vcombine.low %v5117_v32, %v5120_v13  ;;  %v5132_v57 = vrot.slane %v5130_v28, 4  ;;  %v5133_v59 = vrot.slane %v8057_v24, 5 }
 0x21b   : > { %v5954_v19 = vcombine.low %v5124_v42, %v5127_v48  ;;  %v5932_v31 = vrot.slane %v5075_v47, 9  ;;  %v5139_v50 = vrot.slane %v5137_v43, 4  ;;  %v5140_v33 = vrot.slane %v8096_v8, 5 }
 0x21c   : > { %6479 = vmatpush3.bf16.msra.mxu1 %v6754_v58  ;;  %v5131_v46 = vsel %vm7506_vm9, %v5931_v56, %v5130_v28  ;;  %v5134_v21 = vsel %vm7506_vm9, %v5132_v57, %v5133_v59  ;;  %v5144_v20 = vrot.slane %v8126_v0, 5  ;;  %v5933_v8 = vrot.slane %v5076_v38, 9 }
 0x21d   : > { %v5138_v7 = vsel %vm7506_vm9, %v5932_v31, %v5137_v43  ;;  %v5141_v24 = vsel %vm7506_vm9, %v5139_v50, %v5140_v33  ;;  %v5955_v54 = vcombine.low %v5131_v46, %v5134_v21  ;;  %v5147_v10 = vrot.slane %v8131_v52, 5 }
 0x21e   : > { %v5956_v11 = vcombine.low %v5138_v7, %v5141_v24  ;;  %v5146_v16 = vrot.slane %v5144_v20, 4  ;;  %v5145_v34 = vsel %vm7506_vm9, %v5933_v8, %v5144_v20 }
 0x21f   : > { %6481 = vmatmul.mubr.bf16.vlgmr.msra.gmra.mrb[0].mxu1 %v5951_v9 }
 0x220   : > { %6484 = vmatprep.mubr.bf16.mxu1 %v5952_v40  ;;  %v5148_v0 = vsel %vm7506_vm9, %v5146_v16, %v5147_v10 }
 0x221   : > { %v5957_v25 = vcombine.low %v5145_v34, %v5148_v0 }
 0x227   : > { %6485 = vmatmul.mubr.bf16.gmra.mrb[4].mxu1 %v5953_v6 }
 0x228   : > { %6488 = vmatprep.mubr.bf16.mxu1 %v5954_v19 }
 0x22f   : > { %6489 = vmatmul.mubr.bf16.gmra.mrb[8].mxu1 %v5955_v54 }
 0x230   : > { %6492 = vmatprep.mubr.bf16.mxu1 %v5956_v11 }
 0x237   : > { %6493 = vmatmul.mubr.bf16.gmra.mrb[12].mxu1 %v5957_v25 }
 0x270   : > { %v6162_v44 = vpop.f32.mrb[24].mxu0 }
 0x271   : > { %v6163_v35 = vpop.f32.mrb[25].mxu0 }
 0x272   : > { %v6164_v49 = vadd.f32 %v6163_v35, %v6162_v44  ;;  %v6165_v17 = vpop.f32.mrb[26].mxu0 }
 0x273   : > { %v6166_v51 = vpop.f32.mrb[27].mxu0 }
 0x274   : > { %v6167_v53 = vadd.f32 %v6166_v51, %v6165_v17 }
 0x278   : > { %v6168_v45 = vpop.f32.mrb[28].mxu0 }
 0x279   : > { %v6169_v29 = vpop.f32.mrb[29].mxu0 }
 0x27a   : > { %v6170_v58 = vadd.f32 %v6169_v29, %v6168_v45  ;;  %v6171_v52 = vpop.f32.mrb[30].mxu0 }
 0x27b   : > { %v6172_v23 = vpop.f32.mrb[31].mxu0 }
 0x27c   : > { %v6173_v60 = vadd.f32 %v6172_v23, %v6171_v52 }
 0x280   : > { %v6174_v22 = vpop.f32.mrb[32].mxu0 }
 0x281   : > { %v6175_v61 = vpop.f32.mrb[33].mxu0 }
 0x282   : > { %v6176_v5 = vadd.f32 %v6175_v61, %v6174_v22  ;;  %v6177_v12 = vpop.f32.mrb[34].mxu0 }
 0x283   : > { %v6178_v37 = vpop.f32.mrb[35].mxu0 }
 0x284   : > { %v6179_v55 = vadd.f32 %v6178_v37, %v6177_v12 }
 0x288   : > { %v6180_v62 = vpop.f32.mrb[36].mxu0 }
 0x289   : > { %v6181_v15 = vpop.f32.mrb[37].mxu0 }
 0x28a   : > { %v6182_v3 = vadd.f32 %v6181_v15, %v6180_v62  ;;  %v6183_v39 = vpop.f32.mrb[38].mxu0 }
 0x28b   : > { %v6184_v4 = vpop.f32.mrb[39].mxu0 }
 0x28c   : > { %v6185_v2 = vadd.f32 %v6184_v4, %v6183_v39 }
 0x28f   : > { %v6226_v26 = vpop.f32.mrb[16].mxu1 }
 0x290   : > { %v6186_v14 = vpop.f32.mrb[40].mxu0  ;;  %v6227_v63 = vpop.f32.mrb[17].mxu1 }
 0x291   : > { %v6187_v1 = vpop.f32.mrb[41].mxu0  ;;  %v6228_v36 = vadd.f32 %v6227_v63, %v6226_v26  ;;  %v6229_v18 = vpop.f32.mrb[18].mxu1 }
 0x292   : > { %v6188_v9 = vadd.f32 %v6187_v1, %v6186_v14  ;;  %v6189_v40 = vpop.f32.mrb[42].mxu0  ;;  %v6230_v32 = vpop.f32.mrb[19].mxu1 }
 0x293   : > { %v6190_v27 = vpop.f32.mrb[43].mxu0  ;;  %v6499_v13 = vadd.f32 %v6228_v36, %v6164_v49  ;;  %v6231_v28 = vadd.f32 %v6230_v32, %v6229_v18 }
 0x294   : > { %v6191_v41 = vadd.f32 %v6190_v27, %v6189_v40 }
 0x295   : > { %v6505_v48 = vadd.f32 %v6231_v28, %v6167_v53 }
 0x298   : > { %v6192_v42 = vpop.f32.mrb[44].mxu0 }
 0x299   : > { %v6193_v30 = vpop.f32.mrb[45].mxu0 }
 0x29a   : > { %v6194_v43 = vadd.f32 %v6193_v30, %v6192_v42  ;;  %v6195_v47 = vpop.f32.mrb[46].mxu0  ;;  %v6232_v56 = vpop.f32.mrb[20].mxu1 }
 0x29b   : > { %v6196_v6 = vpop.f32.mrb[47].mxu0  ;;  %v6233_v57 = vpop.f32.mrb[21].mxu1 }
 0x29c   : > { %v8215_v19 = vadd.f32 %v6196_v6, %v6195_v47  ;;  %v6234_v59 = vadd.f32 %v6233_v57, %v6232_v56  ;;  %v6235_v31 = vpop.f32.mrb[22].mxu1 }
 0x29d   : > { %v6236_v50 = vpop.f32.mrb[23].mxu1 }
 0x29e   : > { %v6496_v33 = vadd.f32 %v6234_v59, %v6170_v58  ;;  %v6237_v46 = vadd.f32 %v6236_v50, %v6235_v31 }
 0x2a0   : > { %v6198_v21 = vpop.f32.mrb[48].mxu0  ;;  %v6502_v20 = vadd.f32 %v6237_v46, %v6173_v60 }
 0x2a1   : > { %v6199_v7 = vpop.f32.mrb[49].mxu0 }
 0x2a2   : > { %v8217_v24 = vadd.f32 %v6199_v7, %v6198_v21  ;;  %v6201_v38 = vpop.f32.mrb[50].mxu0  ;;  %v6238_v54 = vpop.f32.mrb[24].mxu1 }
 0x2a3   : > { %v6202_v11 = vpop.f32.mrb[51].mxu0  ;;  %v6239_v8 = vpop.f32.mrb[25].mxu1 }
 0x2a4   : > { %v8219_v16 = vadd.f32 %v6202_v11, %v6201_v38  ;;  %v6240_v10 = vadd.f32 %v6239_v8, %v6238_v54  ;;  %v6241_v34 = vpop.f32.mrb[26].mxu1 }
 0x2a5   : > { %v6242_v0 = vpop.f32.mrb[27].mxu1 }
 0x2a6   : > { %v8221_v25 = vadd.f32 %v6240_v10, %v6176_v5  ;;  %v6243_v44 = vadd.f32 %v6242_v0, %v6241_v34 }
 0x2a8   : > { %v8223_v35 = vadd.f32 %v6243_v44, %v6179_v55  ;;  %v6204_v49 = vpop.f32.mrb[52].mxu0 }
 0x2a9   : > { %v6205_v17 = vpop.f32.mrb[53].mxu0 }
 0x2aa   : > { %v8225_v51 = vadd.f32 %v6205_v17, %v6204_v49  ;;  %v6207_v53 = vpop.f32.mrb[54].mxu0  ;;  %v6244_v45 = vpop.f32.mrb[28].mxu1 }
 0x2ab   : > { %v6208_v29 = vpop.f32.mrb[55].mxu0  ;;  %v6245_v58 = vpop.f32.mrb[29].mxu1 }
 0x2ac   : > { %v8227_v52 = vadd.f32 %v6208_v29, %v6207_v53  ;;  %v6246_v23 = vadd.f32 %v6245_v58, %v6244_v45  ;;  %v6247_v60 = vpop.f32.mrb[30].mxu1 }
 0x2ad   : > { %v6248_v22 = vpop.f32.mrb[31].mxu1 }
 0x2ae   : > { %v8229_v61 = vadd.f32 %v6246_v23, %v6182_v3  ;;  %v6249_v5 = vadd.f32 %v6248_v22, %v6247_v60 }
 0x2b0   : > { %v8231_v12 = vadd.f32 %v6249_v5, %v6185_v2  ;;  %v6306_v62 = vpop.f32.mrb[56].mxu0 }
 0x2b1   : > { %v6307_v4 = vpop.f32.mrb[57].mxu0 }
 0x2b2   : > { %v6250_v37 = vpop.f32.mrb[32].mxu1  ;;  %v6308_v40 = vadd.f32 %v6307_v4, %v6306_v62  ;;  %v6309_v26 = vpop.f32.mrb[58].mxu0 }
 0x2b3   : > { %v6251_v55 = vpop.f32.mrb[33].mxu1  ;;  %v6310_v63 = vpop.f32.mrb[59].mxu0 }
 0x2b4   : > { %v6252_v15 = vadd.f32 %v6251_v55, %v6250_v37  ;;  %v6253_v39 = vpop.f32.mrb[34].mxu1  ;;  %v6311_v18 = vadd.f32 %v6310_v63, %v6309_v26  ;;  %v8235_v3 = vadd.f32 %v6499_v13, %v6308_v40 }
 0x2b5   : > { %v6254_v14 = vpop.f32.mrb[35].mxu1 }
 0x2b6   : > { %v8233_v1 = vadd.f32 %v6252_v15, %v6188_v9  ;;  %v6255_v27 = vadd.f32 %v6254_v14, %v6253_v39  ;;  %v8237_v2 = vadd.f32 %v6505_v48, %v6311_v18 }
 0x2b8   : > { %v6529_v36 = vadd.f32 %v6255_v27, %v6191_v41 }
 0x2ba   : > { %v6256_v32 = vpop.f32.mrb[36].mxu1  ;;  %v6312_v6 = vpop.f32.mrb[60].mxu0 }
 0x2bb   : > { %v6257_v28 = vpop.f32.mrb[37].mxu1  ;;  %v6313_v9 = vpop.f32.mrb[61].mxu0 }
 0x2bc   : > { %v6258_v42 = vadd.f32 %v6257_v28, %v6256_v32  ;;  %v6259_v30 = vpop.f32.mrb[38].mxu1  ;;  %v6314_v59 = vadd.f32 %v6313_v9, %v6312_v6  ;;  %v6315_v31 = vpop.f32.mrb[62].mxu0 }
 0x2bd   : > { %v6260_v47 = vpop.f32.mrb[39].mxu1  ;;  %v6316_v46 = vpop.f32.mrb[63].mxu0 }
 0x2be   : > { %v6520_v56 = vadd.f32 %v6258_v42, %v6194_v43  ;;  %v6261_v57 = vadd.f32 %v6260_v47, %v6259_v30  ;;  %v6317_v41 = vadd.f32 %v6316_v46, %v6315_v31  ;;  %v8240_v21 = vadd.f32 %v6496_v33, %v6314_v59 }
 0x2c0   : > { %v6526_v50 = vadd.f32 %v6261_v57, %v8215_v19  ;;  %v8242_v48 = vadd.f32 %v6502_v20, %v6317_v41 }
 0x2c2   : > { %v6262_v13 = vpop.f32.mrb[40].mxu1  ;;  %v6318_v11 = vpop.f32.mrb[64].mxu0 }
 0x2c3   : > { %v6263_v7 = vpop.f32.mrb[41].mxu1  ;;  %v6319_v10 = vpop.f32.mrb[65].mxu0 }
 0x2c4   : > { %v6264_v38 = vadd.f32 %v6263_v7, %v6262_v13  ;;  %v6265_v54 = vpop.f32.mrb[42].mxu1  ;;  %v6320_v0 = vadd.f32 %v6319_v10, %v6318_v11  ;;  %v6321_v44 = vpop.f32.mrb[66].mxu0  ;;  %v8274_v11 = vld [vmem:[%s8406_s5] ss:$0 sm:$0xff] }
 0x2c5   : > { %v6266_v8 = vpop.f32.mrb[43].mxu1  ;;  %v6322_v49 = vpop.f32.mrb[67].mxu0 }
 0x2c6   : > { %v6535_v43 = vadd.f32 %v6264_v38, %v8217_v24  ;;  %v6267_v34 = vadd.f32 %v6266_v8, %v6265_v54  ;;  %v6323_v17 = vadd.f32 %v6322_v49, %v6321_v44  ;;  %v8247_v33 = vadd.f32 %v8221_v25, %v6320_v0 }
 0x2c8   : > { %v6541_v19 = vadd.f32 %v6267_v34, %v8219_v16  ;;  %v8250_v45 = vadd.f32 %v8223_v35, %v6323_v17  ;;  %v8282_v34 = vld [vmem:[%s8407_s6] ss:$0 sm:$0xff] }
 0x2ca   : > { %v6268_v53 = vpop.f32.mrb[44].mxu1 }
 0x2cb   : > { %v6269_v20 = vpop.f32.mrb[45].mxu1  ;;  %v6324_v22 = vpop.f32.mrb[68].mxu0 }
 0x2cc   : > { %v6270_v29 = vadd.f32 %v6269_v20, %v6268_v53  ;;  %v6271_v58 = vpop.f32.mrb[46].mxu1  ;;  %v6325_v5 = vpop.f32.mrb[69].mxu0 }
 0x2cd   : > { %v6272_v23 = vpop.f32.mrb[47].mxu1  ;;  %v6326_v37 = vadd.f32 %v6325_v5, %v6324_v22  ;;  %v6327_v55 = vpop.f32.mrb[70].mxu0 }
 0x2ce   : > { %v6532_v24 = vadd.f32 %v6270_v29, %v8225_v51  ;;  %v6273_v60 = vadd.f32 %v6272_v23, %v6271_v58  ;;  %v6328_v62 = vpop.f32.mrb[71].mxu0 }
 0x2cf   : > { %v6329_v25 = vadd.f32 %v6328_v62, %v6327_v55  ;;  %v6509_v15 = vadd.f32 %v8229_v61, %v6326_v37 }
 0x2d0   : > { %v6538_v16 = vadd.f32 %v6273_v60, %v8227_v52 }
 0x2d1   : > { %v6515_v39 = vadd.f32 %v8231_v12, %v6329_v25 }
 0x2d4   : > { %v6330_v35 = vpop.f32.mrb[72].mxu0 }
 0x2d5   : > { %v6331_v4 = vpop.f32.mrb[73].mxu0 }
 0x2d6   : > { %v6332_v14 = vadd.f32 %v6331_v4, %v6330_v35  ;;  %v6333_v40 = vpop.f32.mrb[74].mxu0 }
 0x2d7   : > { %v6334_v26 = vpop.f32.mrb[75].mxu0 }
 0x2d8   : > { %v6335_v27 = vadd.f32 %v6334_v26, %v6333_v40  ;;  %v8257_v51 = vadd.f32 %v8233_v1, %v6332_v14 }
 0x2da   : > { %v8259_v63 = vadd.f32 %v6529_v36, %v6335_v27 }
 0x2dc   : > { %v6336_v52 = vpop.f32.mrb[76].mxu0 }
 0x2dd   : > { %v6337_v18 = vpop.f32.mrb[77].mxu0 }
 0x2de   : > { %v6338_v32 = vadd.f32 %v6337_v18, %v6336_v52  ;;  %v6339_v28 = vpop.f32.mrb[78].mxu0 }
 0x2df   : > { %v6340_v42 = vpop.f32.mrb[79].mxu0 }
 0x2e0   : > { %v6341_v30 = vadd.f32 %v6340_v42, %v6339_v28  ;;  %v8261_v61 = vadd.f32 %v6520_v56, %v6338_v32 }
 0x2e2   : > { %v8263_v12 = vadd.f32 %v6526_v50, %v6341_v30 }
 0x2e4   : > { %v6342_v47 = vpop.f32.mrb[80].mxu0 }
 0x2e5   : > { %v6343_v6 = vpop.f32.mrb[81].mxu0 }
 0x2e6   : > { %v6344_v57 = vadd.f32 %v6343_v6, %v6342_v47  ;;  %v6345_v9 = vpop.f32.mrb[82].mxu0 }
 0x2e7   : > { %v6346_v59 = vpop.f32.mrb[83].mxu0 }
 0x2e8   : > { %v6347_v31 = vadd.f32 %v6346_v59, %v6345_v9  ;;  %v8265_v1 = vadd.f32 %v6535_v43, %v6344_v57 }
 0x2ea   : > { %v8267_v36 = vadd.f32 %v6541_v19, %v6347_v31 }
 0x2ec   : > { %v6348_v46 = vpop.f32.mrb[84].mxu0 }
 0x2ed   : > { %v6349_v41 = vpop.f32.mrb[85].mxu0 }
 0x2ee   : > { %v6350_v13 = vadd.f32 %v6349_v41, %v6348_v46  ;;  %v6351_v7 = vpop.f32.mrb[86].mxu0 }
 0x2ef   : > { %v6352_v38 = vpop.f32.mrb[87].mxu0 }
 0x2f0   : > { %v6353_v54 = vadd.f32 %v6352_v38, %v6351_v7  ;;  %v8269_v56 = vadd.f32 %v6532_v24, %v6350_v13 }
 0x2f2   : > { %v6482_v50 = vpop.f32.mrb[0].mxu1  ;;  %v8277_v10 = vadd.f32 %v6538_v16, %v6353_v54 }
 0x2f3   : > { %v6498_v8 = vadd.f32 %v8240_v21, %v6482_v50  ;;  %v5279_v43 = vpop.f32.mrb[1].mxu1 }
 0x2f4   : > { %v6501_v0 = vadd.f32 %v8235_v3, %v5279_v43  ;;  %v6483_v44 = vpop.f32.mrb[2].mxu1 }
 0x2f5   : > { %v5367_v19 = vmul.f32 %v6498_v8, %v8274_v11  ;;  %v6504_v49 = vadd.f32 %v8242_v48, %v6483_v44  ;;  %v5282_v17 = vpop.f32.mrb[3].mxu1 }
 0x2f6   : > { %v5365_v53 = vmul.f32 %v6501_v0, %v8274_v11  ;;  %v6507_v21 = vadd.f32 %v8237_v2, %v5282_v17 }
 0x2f7   : > { %v5390_v20 = vadd.f32 %v8282_v34, %v5367_v19  ;;  %v5368_v29 = vmul.f32 %v6504_v49, %v8274_v11 }
 0x2f8   : > { %v5388_v58 = vadd.f32 %v8282_v34, %v5365_v53  ;;  %v5366_v23 = vmul.f32 %v6507_v21, %v8274_v11 }
 0x2f9   : > { %v5391_v3 = vadd.f32 %v8282_v34, %v5368_v29  ;;  %v5406_v48 = vmax.f32 %v5390_v20, 0.0 }
 0x2fa   : > { %v5389_v24 = vadd.f32 %v8282_v34, %v5366_v23  ;;  %v6486_v60 = vpop.f32.mrb[4].mxu1  ;;  %v5404_v2 = vmax.f32 %v5388_v58, 0.0 }
 0x2fb   : > { %v5407_v22 = vmax.f32 %v5391_v3, 0.0  ;;  %v6510_v5 = vadd.f32 %v6509_v15, %v6486_v60  ;;  %v5295_v16 = vpop.f32.mrb[5].mxu1 }
 0x2fc   : > { %v5405_v37 = vmax.f32 %v5389_v24, 0.0  ;;  %v6513_v55 = vadd.f32 %v8247_v33, %v5295_v16  ;;  %v6487_v62 = vpop.f32.mrb[6].mxu1 }
 0x2fd   : > { %v6072_v25 = vpack.c.bf16 %v5407_v22, %v5406_v48  ;;  %v5371_v35 = vmul.f32 %v6510_v5, %v8274_v11  ;;  %v6516_v4 = vadd.f32 %v6515_v39, %v6487_v62  ;;  %v5298_v14 = vpop.f32.mrb[7].mxu1 }
 0x2fe   : > { %v6067_v40 = vpack.c.bf16 %v5405_v37, %v5404_v2  ;;  %v5369_v26 = vmul.f32 %v6513_v55, %v8274_v11  ;;  %v6519_v27 = vadd.f32 %v8250_v45, %v5298_v14 }
 0x2ff   : > { %6108 = vst [vmem:[%s7430_s18 + $0x8] sm:$0xff] %v6072_v25   ;;  %v5394_v15 = vadd.f32 %v8282_v34, %v5371_v35  ;;  %v5372_v52 = vmul.f32 %v6516_v4, %v8274_v11 }
 0x300   : > { %6068 = vst [vmem:[%s7430_s18] sm:$0xff] %v6067_v40   ;;  %v5392_v18 = vadd.f32 %v8282_v34, %v5369_v26  ;;  %v5370_v33 = vmul.f32 %v6519_v27, %v8274_v11 }
 0x301   : > { %v5395_v32 = vadd.f32 %v8282_v34, %v5372_v52  ;;  %v5410_v42 = vmax.f32 %v5394_v15, 0.0 }
 0x302   : > { %v5393_v39 = vadd.f32 %v8282_v34, %v5370_v33  ;;  %v6490_v28 = vpop.f32.mrb[8].mxu1  ;;  %v5408_v6 = vmax.f32 %v5392_v18, 0.0 }
 0x303   : > { %v5411_v30 = vmax.f32 %v5395_v32, 0.0  ;;  %v6522_v45 = vadd.f32 %v8261_v61, %v6490_v28  ;;  %v5311_v47 = vpop.f32.mrb[9].mxu1 }
 0x304   : > { %v5409_v57 = vmax.f32 %v5393_v39, 0.0  ;;  %v6525_v9 = vadd.f32 %v8257_v51, %v5311_v47  ;;  %v6491_v59 = vpop.f32.mrb[10].mxu1 }
 0x305   : > { %v6082_v31 = vpack.c.bf16 %v5411_v30, %v5410_v42  ;;  %v5375_v46 = vmul.f32 %v6522_v45, %v8274_v11  ;;  %v6528_v41 = vadd.f32 %v8263_v12, %v6491_v59  ;;  %v5314_v13 = vpop.f32.mrb[11].mxu1 }
 0x306   : > { %v6077_v7 = vpack.c.bf16 %v5409_v57, %v5408_v6  ;;  %v5373_v38 = vmul.f32 %v6525_v9, %v8274_v11  ;;  %v6531_v54 = vadd.f32 %v8259_v63, %v5314_v13 }
 0x307   : > { %6110 = vst [vmem:[%s7430_s18 + $0x18] sm:$0xff] %v6082_v31   ;;  %v5398_v61 = vadd.f32 %v8282_v34, %v5375_v46  ;;  %v5376_v50 = vmul.f32 %v6528_v41, %v8274_v11 }
 0x308   : > { %6109 = vst [vmem:[%s7430_s18 + $0x10] sm:$0xff] %v6077_v7   ;;  %v5396_v51 = vadd.f32 %v8282_v34, %v5373_v38  ;;  %v5374_v8 = vmul.f32 %v6531_v54, %v8274_v11 }
 0x309   : > { %v5399_v43 = vadd.f32 %v8282_v34, %v5376_v50  ;;  %v5414_v44 = vmax.f32 %v5398_v61, 0.0 }
 0x30a   : > { %v5397_v12 = vadd.f32 %v8282_v34, %v5374_v8  ;;  %v6494_v0 = vpop.f32.mrb[12].mxu1  ;;  %v5412_v17 = vmax.f32 %v5396_v51, 0.0 }
 0x30b   : > { %v5415_v19 = vmax.f32 %v5399_v43, 0.0  ;;  %v6534_v63 = vadd.f32 %v8269_v56, %v6494_v0  ;;  %v5327_v49 = vpop.f32.mrb[13].mxu1 }
 0x30c   : > { %v5413_v53 = vmax.f32 %v5397_v12, 0.0  ;;  %v6537_v21 = vadd.f32 %v8265_v1, %v5327_v49  ;;  %v6495_v20 = vpop.f32.mrb[14].mxu1 }
 0x30d   : > { %v6092_v29 = vpack.c.bf16 %v5415_v19, %v5414_v44  ;;  %v5379_v58 = vmul.f32 %v6534_v63, %v8274_v11  ;;  %v6540_v23 = vadd.f32 %v8277_v10, %v6495_v20  ;;  %v5330_v3 = vpop.f32.mrb[15].mxu1 }
 0x30e   : > { %v6087_v24 = vpack.c.bf16 %v5413_v53, %v5412_v17  ;;  %v5377_v60 = vmul.f32 %v6537_v21, %v8274_v11  ;;  %v6543_v56 = vadd.f32 %v8267_v36, %v5330_v3 }
 0x30f   : > { %6112 = vst [vmem:[%s7430_s18 + $0x28] sm:$0xff] %v6092_v29   ;;  %v5402_v48 = vadd.f32 %v8282_v34, %v5379_v58  ;;  %v5380_v1 = vmul.f32 %v6540_v23, %v8274_v11 }
 0x310   : > { %6111 = vst [vmem:[%s7430_s18 + $0x20] sm:$0xff] %v6087_v24   ;;  %v5400_v22 = vadd.f32 %v8282_v34, %v5377_v60  ;;  %v5378_v10 = vmul.f32 %v6543_v56, %v8274_v11 }
 0x311   : > { %v5403_v5 = vadd.f32 %v8282_v34, %v5380_v1  ;;  %v5418_v36 = vmax.f32 %v5402_v48, 0.0 }
 0x312   : > { %v5401_v16 = vadd.f32 %v8282_v34, %v5378_v10  ;;  %v5416_v37 = vmax.f32 %v5400_v22, 0.0 }
 0x313   : > { %v5419_v2 = vmax.f32 %v5403_v5, 0.0 }
 0x314   : > { %v5417_v55 = vmax.f32 %v5401_v16, 0.0 }
 0x315   : > { %v6102_v62 = vpack.c.bf16 %v5419_v2, %v5418_v36 }
 0x316   : > { %v6097_v11 = vpack.c.bf16 %v5417_v55, %v5416_v37 }
 0x317   : > { %6114 = vst [vmem:[%s7430_s18 + $0x38] sm:$0xff] %v6102_v62  }
 0x318   : > { %6113 = vst [vmem:[%s7430_s18 + $0x30] sm:$0xff] %v6097_v11  }
 0x319   : > { %6768 = shalt.err (!%p6765_p10)
}
 0x31a   : > { %s6769_s18 = scalar_lea.hbm %s8343_s20, 1024  ;;  %s6773_s17 = scalar_lea.hbm %s8408_s7, 4096 }
 0x31b   : > { %p6770_p11 = scmp.ne.s32.totalorder %s8343_s20, %s6769_s18  ;;  %p6774_p0 = scmp.lt.u32.totalorder %s8343_s20, %s8408_s7 }
 0x31c   : > { %p6775_p1 = scmp.lt.u32.totalorder %s6773_s17, %s6769_s18  ;;  %p6777_p4 = scmp.lt.u32.totalorder %s6769_s18, %s8343_s20 }
 0x31d   : > { %p6771_p12 = pnand %p6770_p11, %p6949_p3 }
 0x31e   : > { %p6776_p2 = por %p6775_p1, %p6774_p0 }
 0x31f   : > { %p6772_p13 = pneg %p6771_p12 }
 0x320   : > { %p6778_p5 = por %p6777_p4, %p6776_p2 }
 0x322   : > { %p6779_p6 = pnand %p6778_p5, %p6772_p13 }
 0x324   : > { %6782 = shalt.err (!%p6779_p6)
}
 0x325   : > { %s6856_s23 = smov 64   ;;  %s6857_s9 = smov 4  }
 0x326   : > { %6579 = dma.vmem_to_hbm [thread:$0]  (%p6949_p3), %s8338_s28, 1024, %s8343_s20, %s8349_s16, %s6856_s23, %s6856_s23, %s6857_s9  }
 0x327 PF: > { %p6585_p7 = scmp.ge.s32.totalorder %s6849_s8, 2  ;;  %s5532_s10 = sand.u32 1, %s6821_s24  }
 0x328   : > { %s5533_s13 = scalar_lea.sflag [#allocation4], %s5532_s10 }
 0x329   : > { %p6582_p9 = pnand %p6585_p7, %p6958_p8 }
 0x32b   : > { %6816 = dma.done.wait (!%p6582_p9), %s5533_s13, 1024  }
 0x32c   : > { %6818 = vsyncadd (!%p6582_p9), %s5533_s13, 4294966272  ;;  %s20_s8 = sadd.s32 1, %s6849_s8   ;;  %s8424_s14 = sld [smem:[#allocation6_spill]] }
 0x32d   : > { %p17_p10 = scmp.ge.s32.totalorder %s20_s8, 6   ;;  %s8425_s24 = smov %s6825_s25 }
 0x32e   : > { %s8426_s25 = smov %s6829_s26  ;;  %s8427_s26 = smov %s6967_s19 }
 0x32f   : > { %s8428_s27 = smov %s6841_s29  ;;  %s8429_s28 = smov %s6845_s30 }
 0x330   : > { %s8430_s29 = smov %s8433_s11  ;;  %19 = sbr.rel (!%p17_p10) target bundleno = 5 (0x5), region = 96 }
 0x332   : > { %s8431_s30 = smov %s8424_s14 }
 0x337   :  { %5538 = vsyncpa [#allocation4], 1 }
 0x338   :  { %5540 = vsyncpa [#allocation4 + $0x1], 1 }

</bundles_post_ra>
